<compile_context>
chip_gen: v5e
topology: v5e:2x2
jax: 0.10.0
libtpu: 0.0.40
codegen_flags: <defaults>
</compile_context>

<pallas_src>
import numpy as np
import jax
import jax.numpy as jnp
from jax.experimental import pallas as pl
from jax.experimental.pallas import tpu as pltpu


def node_block_kernel(first_blk_ref, nblk_ref,          # scalar-prefetch (SMEM)
                      x_ref, e_ref, recv_ref,
                      w1x_ref, w1e_ref, b1_ref,
                      w2_ref, b2_ref, w3_ref, b3_ref,
                      gamma_ref, beta_ref,
                      out_ref,
                      agg_ref):
    i = pl.program_id(0)                # node-tile index ("parallel")
    k = pl.program_id(1)                # edge-block step for this node tile ("arbitrary")
    TN = x_ref.shape[0]
    TE = e_ref.shape[0]

    @pl.when(k == 0)
    def _():
        agg_ref[...] = jnp.zeros_like(agg_ref)

    # Only edge blocks that overlap this node tile do real work; padding steps
    # skip both the VPU one-hot generation and the MXU matmul.
    @pl.when(k < nblk_ref[i])
    def _():
        recv_local = recv_ref[...] - i * TN                              # [1, TE]
        row_ids = jax.lax.broadcasted_iota(jnp.int32, (TN, TE), 0)
        one_hot = (row_ids == recv_local).astype(jnp.bfloat16)          # 0/1 exact
        agg_ref[...] += jnp.dot(one_hot, e_ref[...],
                                preferred_element_type=jnp.float32)     # [TN, De] f32

    # Last edge step: MLP + LayerNorm on the finished accumulator.
    @pl.when(k == pl.num_programs(1) - 1)
    def _():
        # concat([x, agg], -1) @ w1  ==  x @ w1[:Dn] + agg @ w1[Dn:]
        # First layer kept fully f32 (agg precision); later layers bf16 operands.
        h = (jnp.dot(x_ref[...], w1x_ref[...], preferred_element_type=jnp.float32)
             + jnp.dot(agg_ref[...], w1e_ref[...], preferred_element_type=jnp.float32)
             + b1_ref[...])
        h = jnp.maximum(h, 0.0)
        h = jnp.dot(h.astype(jnp.bfloat16), w2_ref[...],
                    preferred_element_type=jnp.float32) + b2_ref[...]
        h = jnp.maximum(h, 0.0)
        y = jnp.dot(h.astype(jnp.bfloat16), w3_ref[...],
                    preferred_element_type=jnp.float32) + b3_ref[...]

        # LayerNorm over the feature axis (f32 math, rsqrt -> EUP).
        mean = jnp.mean(y, axis=-1, keepdims=True)
        var = jnp.mean((y - mean) ** 2, axis=-1, keepdims=True)
        yn = (y - mean) * jax.lax.rsqrt(var + 1e-5)
        out_ref[...] = yn * gamma_ref[...] + beta_ref[...]


def prepare_params(params, node_dim):
    """One-time weight split / cast (hoisted out of the per-call hot path)."""
    w1 = params["w1"]
    return {
        "w1x": w1[:node_dim, :].astype(jnp.float32),
        "w1e": w1[node_dim:, :].astype(jnp.float32),
        "b1": params["b1"].astype(jnp.float32),
        "w2": params["w2"].astype(jnp.bfloat16),
        "b2": params["b2"].astype(jnp.float32),
        "w3": params["w3"].astype(jnp.bfloat16),
        "b3": params["b3"].astype(jnp.float32),
        "gamma": params["gamma"].astype(jnp.float32),
        "beta": params["beta"].astype(jnp.float32),
    }


def node_block_forward(x, edge_attr, receivers_idx, prepared,
                       *, tile_n=256, tile_e=512):
    """x: [N, Dn] f32, edge_attr: [E, De] f32, receivers_idx: [E] int32."""
    N, Dn = x.shape
    E, De = edge_attr.shape
    H = prepared["w2"].shape[0]
    out_dim = prepared["w3"].shape[1]

    # ---- host-side preprocessing: sort edges by receiver; derive the
    # per-node-tile edge-block ranges consumed by the index_maps. ----
    recv_np = np.asarray(jax.device_get(receivers_idx)).astype(np.int32)
    order_np = np.argsort(recv_np, kind="stable").astype(np.int32)
    recv_sorted_np = recv_np[order_np]

    Np = pl.cdiv(N, tile_n) * tile_n
    Ep = pl.cdiv(E, tile_e) * tile_e
    n_nt = Np // tile_n
    n_eb = Ep // tile_e

    node_lo = np.arange(n_nt, dtype=np.int64) * tile_n
    starts = np.searchsorted(recv_sorted_np, node_lo, side="left")
    ends = np.searchsorted(recv_sorted_np, node_lo + tile_n, side="left")
    has = ends > starts
    first_blk = np.where(has, starts // tile_e, 0).astype(np.int32)
    nblk = np.where(has, (ends - 1) // tile_e - starts // tile_e + 1, 0).astype(np.int32)
    max_blk = max(int(nblk.max()) if n_nt > 0 else 1, 1)

    # ---- device-side gather + padding.
    # TODO(synk): ragged last tile via pl.BoundedSlice would avoid padded copies.
    order = jnp.asarray(order_np)
    e_sorted = edge_attr[order].astype(jnp.bfloat16)
    e_p = e_sorted if E == Ep else jnp.zeros((Ep, De), jnp.bfloat16).at[:E].set(e_sorted)
    recv_p = jnp.full((1, Ep), -1, jnp.int32).at[0, :E].set(jnp.asarray(recv_sorted_np))
    x_p = x if N == Np else jnp.zeros((Np, Dn), x.dtype).at[:N].set(x)

    grid = (n_nt, max_blk)

    def edge_blk(i, k, fb, nb):
        last = fb[i] + jnp.maximum(nb[i] - 1, 0)
        return jnp.minimum(fb[i] + k, last)

    x_map = lambda i, k, fb, nb: (i, 0)
    e_map = lambda i, k, fb, nb: (edge_blk(i, k, fb, nb), 0)
    recv_map = lambda i, k, fb, nb: (0, edge_blk(i, k, fb, nb))
    const_map = lambda i, k, fb, nb: (0, 0)

    scatter_flops = 2 * tile_n * tile_e * De * int(nblk.sum())
    mlp_flops = 2 * Np * (Dn * H + De * H + H * H + H * out_dim)
    bytes_accessed = (x_p.size * 4 + e_p.size * 2 + recv_p.size * 4
                      + Np * out_dim * 4
                      + (prepared["w1x"].size + prepared["w1e"].size) * 4
                      + (prepared["w2"].size + prepared["w3"].size) * 2)

    out = pl.pallas_call(
        node_block_kernel,
        out_shape=jax.ShapeDtypeStruct((Np, out_dim), jnp.float32),
        grid_spec=pltpu.PrefetchScalarGridSpec(
            num_scalar_prefetch=2,
            grid=grid,
            in_specs=[
                pl.BlockSpec((tile_n, Dn), x_map),       # x tile (f32)
                pl.BlockSpec((tile_e, De), e_map),       # sorted edge tile (bf16)
                pl.BlockSpec((1, tile_e), recv_map),     # sorted receivers tile
                pl.BlockSpec((Dn, H), const_map),        # w1[:Dn]  (resident, f32)
                pl.BlockSpec((De, H), const_map),        # w1[Dn:]  (resident, f32)
                pl.BlockSpec((1, H), const_map),         # b1
                pl.BlockSpec((H, H), const_map),         # w2 (bf16)
                pl.BlockSpec((1, H), const_map),         # b2
                pl.BlockSpec((H, out_dim), const_map),   # w3 (bf16)
                pl.BlockSpec((1, out_dim), const_map),   # b3
                pl.BlockSpec((1, out_dim), const_map),   # gamma
                pl.BlockSpec((1, out_dim), const_map),   # beta
            ],
            out_specs=pl.BlockSpec((tile_n, out_dim), x_map),
            scratch_shapes=[pltpu.VMEM((tile_n, De), jnp.float32)],
        ),
        compiler_params=pltpu.CompilerParams(
            # TODO(synk): on v7x consider pltpu.CORE_PARALLEL on the node axis if
            # a trace shows one idle TensorCore.
            dimension_semantics=("parallel", "arbitrary"),
        ),
        cost_estimate=pl.CostEstimate(
            flops=scatter_flops + mlp_flops,
            transcendentals=Np,
            bytes_accessed=bytes_accessed),
    )(jnp.asarray(first_blk), jnp.asarray(nblk),
      x_p, e_p, recv_p,
      prepared["w1x"], prepared["w1e"], prepared["b1"],
      prepared["w2"], prepared["b2"],
      prepared["w3"], prepared["b3"],
      prepared["gamma"], prepared["beta"])

    return out[:N]


def make_params(key, in_dim, hidden, out_dim):
    ks = jax.random.split(key, 3)
    s1 = 1.0 / jnp.sqrt(in_dim)
    s2 = 1.0 / jnp.sqrt(hidden)
    return {
        "w1": jax.random.uniform(ks[0], (in_dim, hidden), jnp.float32, -s1, s1),
        "b1": jnp.zeros((1, hidden), jnp.float32),
        "w2": jax.random.uniform(ks[1], (hidden, hidden), jnp.float32, -s2, s2),
        "b2": jnp.zeros((1, hidden), jnp.float32),
        "w3": jax.random.uniform(ks[2], (hidden, out_dim), jnp.float32, -s2, s2),
        "b3": jnp.zeros((1, out_dim), jnp.float32),
        "gamma": jnp.ones((1, out_dim), jnp.float32),
        "beta": jnp.zeros((1, out_dim), jnp.float32),
    }


def reference_forward(x, edge_attr, receivers_idx, params):
    """Pure-JAX f32 reference of the PyTorch NodeBlock forward."""
    N = x.shape[0]
    agg = jnp.zeros((N, edge_attr.shape[1]), edge_attr.dtype).at[receivers_idx].add(edge_attr)
    cat = jnp.concatenate([x, agg], axis=-1)
    h = jnp.maximum(cat @ params["w1"] + params["b1"], 0.0)
    h = jnp.maximum(h @ params["w2"] + params["b2"], 0.0)
    y = h @ params["w3"] + params["b3"]
    mean = jnp.mean(y, axis=-1, keepdims=True)
    var = jnp.mean((y - mean) ** 2, axis=-1, keepdims=True)
    return (y - mean) / jnp.sqrt(var + 1e-5) * params["gamma"] + params["beta"]


if __name__ == "__main__":
    key = jax.random.PRNGKey(0)
    k_x, k_e, k_r, k_p = jax.random.split(key, 4)

    # Small graph, lane-friendly feature dims (multiples of 128); 2 node tiles
    # so the scalar-prefetched data-dependent edge-block ranges are exercised.
    N, E, Dn, De, H = 512, 2048, 128, 128, 128
    x = jax.random.normal(k_x, (N, Dn), jnp.float32)
    edge_attr = jax.random.normal(k_e, (E, De), jnp.float32)
    receivers_idx = jax.random.randint(k_r, (E,), 0, N, jnp.int32)
    params = make_params(k_p, Dn + De, H, Dn)
    prepared = prepare_params(params, Dn)

    out = node_block_forward(x, edge_attr, receivers_idx, prepared)
    out = jax.block_until_ready(out)

    ref = reference_forward(x, edge_attr, receivers_idx, params)
    assert out.shape == (N, Dn)
    # bf16 edge streaming + bf16 MLP operands (f32 accumulation, f32 first layer)
    # -> loosened tolerance vs the f32 reference.
    assert jnp.max(jnp.abs(out - ref)) < 1e-1, "mismatch vs reference"

    print("KERNEL_OK")
</pallas_src>

<mosaic_0001>
module attributes {stable_mosaic.version = 11 : i64} {
  func.func @node_block_kernel(%arg0: i32, %arg1: i32, %arg2: memref<2xi32, #tpu.memory_space<smem>>, %arg3: memref<2xi32, #tpu.memory_space<smem>>, %arg4: memref<256x128xf32, #tpu.memory_space<vmem>>, %arg5: memref<512x128xbf16, #tpu.memory_space<vmem>>, %arg6: memref<1x512xi32, #tpu.memory_space<vmem>>, %arg7: memref<128x128xf32, #tpu.memory_space<vmem>>, %arg8: memref<128x128xf32, #tpu.memory_space<vmem>>, %arg9: memref<1x128xf32, #tpu.memory_space<vmem>>, %arg10: memref<128x128xbf16, #tpu.memory_space<vmem>>, %arg11: memref<1x128xf32, #tpu.memory_space<vmem>>, %arg12: memref<128x128xbf16, #tpu.memory_space<vmem>>, %arg13: memref<1x128xf32, #tpu.memory_space<vmem>>, %arg14: memref<1x128xf32, #tpu.memory_space<vmem>>, %arg15: memref<1x128xf32, #tpu.memory_space<vmem>>, %arg16: memref<256x128xf32, #tpu.memory_space<vmem>>, %arg17: memref<256x128xf32, #tpu.memory_space<vmem>>) attributes {dimension_semantics = [#tpu.dimension_semantics<parallel>, #tpu.dimension_semantics<arbitrary>], iteration_bounds = array<i64: 2, 3>, scalar_prefetch = 2 : i64, scratch_operands = 1 : i64, tpu.core_type = #tpu.core_type<tc>, window_params = [{transform_indices = @transform_0, window_bounds = array<i64: 256, 128>}, {transform_indices = @transform_1, window_bounds = array<i64: 512, 128>}, {transform_indices = @transform_2, window_bounds = array<i64: 1, 512>}, {pipeline_mode = #tpu.pipeline_mode<synchronous>, transform_indices = @transform_3, window_bounds = array<i64: 128, 128>}, {pipeline_mode = #tpu.pipeline_mode<synchronous>, transform_indices = @transform_4, window_bounds = array<i64: 128, 128>}, {pipeline_mode = #tpu.pipeline_mode<synchronous>, transform_indices = @transform_5, window_bounds = array<i64: 1, 128>}, {pipeline_mode = #tpu.pipeline_mode<synchronous>, transform_indices = @transform_6, window_bounds = array<i64: 128, 128>}, {pipeline_mode = #tpu.pipeline_mode<synchronous>, transform_indices = @transform_7, window_bounds = array<i64: 1, 128>}, {pipeline_mode = #tpu.pipeline_mode<synchronous>, transform_indices = @transform_8, window_bounds = array<i64: 128, 128>}, {pipeline_mode = #tpu.pipeline_mode<synchronous>, transform_indices = @transform_9, window_bounds = array<i64: 1, 128>}, {pipeline_mode = #tpu.pipeline_mode<synchronous>, transform_indices = @transform_10, window_bounds = array<i64: 1, 128>}, {pipeline_mode = #tpu.pipeline_mode<synchronous>, transform_indices = @transform_11, window_bounds = array<i64: 1, 128>}, {transform_indices = @transform_12, window_bounds = array<i64: 256, 128>}]} {
    %c0_i32 = arith.constant 0 : i32
    %0 = arith.cmpi eq, %arg1, %c0_i32 : i32
    %1 = arith.extui %0 : i1 to i32
    %c0_i32_0 = arith.constant 0 : i32
    %2 = arith.cmpi ne, %1, %c0_i32_0 : i32
    scf.if %2 {
      %cst = arith.constant 0.000000e+00 : f32
      %11 = vector.broadcast %cst : f32 to vector<256x128xf32>
      %c0 = arith.constant 0 : index
      %c0_3 = arith.constant 0 : index
      %12 = vector.load %arg17[%c0, %c0_3] : memref<256x128xf32, #tpu.memory_space<vmem>>, vector<256x128xf32>
      tpu.vector_store %arg17[%c0, %c0_3], %11 {strides = array<i32>} : memref<256x128xf32, #tpu.memory_space<vmem>>, vector<256x128xf32>,
    } else {
    }
    %3 = arith.index_cast %arg0 : i32 to index
    %4 = memref.load %arg3[%3] : memref<2xi32, #tpu.memory_space<smem>>
    %5 = arith.cmpi slt, %arg1, %4 : i32
    %6 = arith.extui %5 : i1 to i32
    %c0_i32_1 = arith.constant 0 : i32
    %7 = arith.cmpi ne, %6, %c0_i32_1 : i32
    scf.if %7 {
      %c0 = arith.constant 0 : index
      %c0_3 = arith.constant 0 : index
      %11 = vector.load %arg6[%c0, %c0_3] : memref<1x512xi32, #tpu.memory_space<vmem>>, vector<1x512xi32>
      %c256_i32 = arith.constant 256 : i32
      %12 = arith.muli %arg0, %c256_i32 : i32
      %13 = vector.broadcast %12 : i32 to vector<1x512xi32>
      %14 = arith.subi %11, %13 : vector<1x512xi32>
      %15 = tpu.iota {dimensions = array<i32: 0>} : vector<256x512xi32>
      %16 = vector.broadcast %14 : vector<1x512xi32> to vector<256x512xi32>
      %17 = arith.cmpi eq, %15, %16 : vector<256x512xi32>
      %18 = arith.extui %17 : vector<256x512xi1> to vector<256x512xi32>
      %19 = arith.sitofp %18 : vector<256x512xi32> to vector<256x512xf32>
      %20 = arith.truncf %19 : vector<256x512xf32> to vector<256x512xbf16>
      %c0_4 = arith.constant 0 : index
      %c0_5 = arith.constant 0 : index
      %21 = vector.load %arg17[%c0_4, %c0_5] : memref<256x128xf32, #tpu.memory_space<vmem>>, vector<256x128xf32>
      %c0_6 = arith.constant 0 : index
      %c0_7 = arith.constant 0 : index
      %22 = vector.load %arg5[%c0_6, %c0_7] : memref<512x128xbf16, #tpu.memory_space<vmem>>, vector<512x128xbf16>
      %cst = arith.constant dense<0.000000e+00> : vector<256x128xf32>
      %23 = tpu.matmul %20, %22, %cst {dimension_numbers = #tpu.dot_dimension_numbers<[1], [0], [0], [1], [0, 0, 1, 1], [], []>} : vector<256x512xbf16>, vector<512x128xbf16>, vector<256x128xf32> -> vector<256x128xf32>
      %24 = arith.addf %21, %23 : vector<256x128xf32>
      %c0_8 = arith.constant 0 : index
      %c0_9 = arith.constant 0 : index
      %25 = vector.load %arg17[%c0_8, %c0_9] : memref<256x128xf32, #tpu.memory_space<vmem>>, vector<256x128xf32>
      tpu.vector_store %arg17[%c0_8, %c0_9], %24 {strides = array<i32>} : memref<256x128xf32, #tpu.memory_space<vmem>>, vector<256x128xf32>,
    } else {
    }
    %c2_i32 = arith.constant 2 : i32
    %8 = arith.cmpi eq, %arg1, %c2_i32 : i32
    %9 = arith.extui %8 : i1 to i32
    %c0_i32_2 = arith.constant 0 : i32
    %10 = arith.cmpi ne, %9, %c0_i32_2 : i32
    scf.if %10 {
      %c0 = arith.constant 0 : index
      %c0_3 = arith.constant 0 : index
      %11 = vector.load %arg4[%c0, %c0_3] : memref<256x128xf32, #tpu.memory_space<vmem>>, vector<256x128xf32>
      %c0_4 = arith.constant 0 : index
      %c0_5 = arith.constant 0 : index
      %12 = vector.load %arg7[%c0_4, %c0_5] : memref<128x128xf32, #tpu.memory_space<vmem>>, vector<128x128xf32>
      %cst = arith.constant dense<0.000000e+00> : vector<256x128xf32>
      %13 = tpu.matmul %11, %12, %cst {dimension_numbers = #tpu.dot_dimension_numbers<[1], [0], [0], [1], [0, 0, 1, 1], [], []>} : vector<256x128xf32>, vector<128x128xf32>, vector<256x128xf32> -> vector<256x128xf32>
      %c0_6 = arith.constant 0 : index
      %c0_7 = arith.constant 0 : index
      %14 = vector.load %arg17[%c0_6, %c0_7] : memref<256x128xf32, #tpu.memory_space<vmem>>, vector<256x128xf32>
      %c0_8 = arith.constant 0 : index
      %c0_9 = arith.constant 0 : index
      %15 = vector.load %arg8[%c0_8, %c0_9] : memref<128x128xf32, #tpu.memory_space<vmem>>, vector<128x128xf32>
      %cst_10 = arith.constant dense<0.000000e+00> : vector<256x128xf32>
      %16 = tpu.matmul %14, %15, %cst_10 {dimension_numbers = #tpu.dot_dimension_numbers<[1], [0], [0], [1], [0, 0, 1, 1], [], []>} : vector<256x128xf32>, vector<128x128xf32>, vector<256x128xf32> -> vector<256x128xf32>
      %17 = arith.addf %13, %16 : vector<256x128xf32>
      %c0_11 = arith.constant 0 : index
      %c0_12 = arith.constant 0 : index
      %18 = vector.load %arg9[%c0_11, %c0_12] : memref<1x128xf32, #tpu.memory_space<vmem>>, vector<1x128xf32>
      %19 = vector.broadcast %18 : vector<1x128xf32> to vector<256x128xf32>
      %20 = arith.addf %17, %19 : vector<256x128xf32>
      %cst_13 = arith.constant 0.000000e+00 : f32
      %21 = vector.broadcast %cst_13 : f32 to vector<256x128xf32>
      %22 = arith.maximumf %20, %21 : vector<256x128xf32>
      %23 = arith.truncf %22 : vector<256x128xf32> to vector<256x128xbf16>
      %c0_14 = arith.constant 0 : index
      %c0_15 = arith.constant 0 : index
      %24 = vector.load %arg10[%c0_14, %c0_15] : memref<128x128xbf16, #tpu.memory_space<vmem>>, vector<128x128xbf16>
      %cst_16 = arith.constant dense<0.000000e+00> : vector<256x128xf32>
      %25 = tpu.matmul %23, %24, %cst_16 {dimension_numbers = #tpu.dot_dimension_numbers<[1], [0], [0], [1], [0, 0, 1, 1], [], []>} : vector<256x128xbf16>, vector<128x128xbf16>, vector<256x128xf32> -> vector<256x128xf32>
      %c0_17 = arith.constant 0 : index
      %c0_18 = arith.constant 0 : index
      %26 = vector.load %arg11[%c0_17, %c0_18] : memref<1x128xf32, #tpu.memory_space<vmem>>, vector<1x128xf32>
      %27 = vector.broadcast %26 : vector<1x128xf32> to vector<256x128xf32>
      %28 = arith.addf %25, %27 : vector<256x128xf32>
      %cst_19 = arith.constant 0.000000e+00 : f32
      %29 = vector.broadcast %cst_19 : f32 to vector<256x128xf32>
      %30 = arith.maximumf %28, %29 : vector<256x128xf32>
      %31 = arith.truncf %30 : vector<256x128xf32> to vector<256x128xbf16>
      %c0_20 = arith.constant 0 : index
      %c0_21 = arith.constant 0 : index
      %32 = vector.load %arg12[%c0_20, %c0_21] : memref<128x128xbf16, #tpu.memory_space<vmem>>, vector<128x128xbf16>
      %cst_22 = arith.constant dense<0.000000e+00> : vector<256x128xf32>
      %33 = tpu.matmul %31, %32, %cst_22 {dimension_numbers = #tpu.dot_dimension_numbers<[1], [0], [0], [1], [0, 0, 1, 1], [], []>} : vector<256x128xbf16>, vector<128x128xbf16>, vector<256x128xf32> -> vector<256x128xf32>
      %c0_23 = arith.constant 0 : index
      %c0_24 = arith.constant 0 : index
      %34 = vector.load %arg13[%c0_23, %c0_24] : memref<1x128xf32, #tpu.memory_space<vmem>>, vector<1x128xf32>
      %35 = vector.broadcast %34 : vector<1x128xf32> to vector<256x128xf32>
      %36 = arith.addf %33, %35 : vector<256x128xf32>
      %cst_25 = arith.constant dense<0.000000e+00> : vector<256xf32>
      %37 = vector.multi_reduction <add>, %36, %cst_25 [1] : vector<256x128xf32> to vector<256xf32>
      %38 = vector.shape_cast %37 : vector<256xf32> to vector<256x1xf32>
      %cst_26 = arith.constant 1.280000e+02 : f32
      %39 = vector.broadcast %cst_26 : f32 to vector<256x1xf32>
      %40 = arith.divf %38, %39 : vector<256x1xf32>
      %41 = vector.broadcast %40 : vector<256x1xf32> to vector<256x128xf32>
      %42 = arith.subf %36, %41 : vector<256x128xf32>
      %43 = arith.mulf %42, %42 : vector<256x128xf32>
      %cst_27 = arith.constant dense<0.000000e+00> : vector<256xf32>
      %44 = vector.multi_reduction <add>, %43, %cst_27 [1] : vector<256x128xf32> to vector<256xf32>
      %45 = vector.shape_cast %44 : vector<256xf32> to vector<256x1xf32>
      %cst_28 = arith.constant 1.280000e+02 : f32
      %46 = vector.broadcast %cst_28 : f32 to vector<256x1xf32>
      %47 = arith.divf %45, %46 : vector<256x1xf32>
      %48 = vector.broadcast %40 : vector<256x1xf32> to vector<256x128xf32>
      %49 = arith.subf %36, %48 : vector<256x128xf32>
      %cst_29 = arith.constant 9.99999974E-6 : f32
      %50 = vector.broadcast %cst_29 : f32 to vector<256x1xf32>
      %51 = arith.addf %47, %50 : vector<256x1xf32>
      %52 = math.rsqrt %51 : vector<256x1xf32>
      %53 = vector.broadcast %52 : vector<256x1xf32> to vector<256x128xf32>
      %54 = arith.mulf %49, %53 : vector<256x128xf32>
      %c0_30 = arith.constant 0 : index
      %c0_31 = arith.constant 0 : index
      %55 = vector.load %arg14[%c0_30, %c0_31] : memref<1x128xf32, #tpu.memory_space<vmem>>, vector<1x128xf32>
      %56 = vector.broadcast %55 : vector<1x128xf32> to vector<256x128xf32>
      %57 = arith.mulf %54, %56 : vector<256x128xf32>
      %c0_32 = arith.constant 0 : index
      %c0_33 = arith.constant 0 : index
      %58 = vector.load %arg15[%c0_32, %c0_33] : memref<1x128xf32, #tpu.memory_space<vmem>>, vector<1x128xf32>
      %59 = vector.broadcast %58 : vector<1x128xf32> to vector<256x128xf32>
      %60 = arith.addf %57, %59 : vector<256x128xf32>
      %c0_34 = arith.constant 0 : index
      %c0_35 = arith.constant 0 : index
      %61 = vector.load %arg16[%c0_34, %c0_35] : memref<256x128xf32, #tpu.memory_space<vmem>>, vector<256x128xf32>
      tpu.vector_store %arg16[%c0_34, %c0_35], %60 {strides = array<i32>} : memref<256x128xf32, #tpu.memory_space<vmem>>, vector<256x128xf32>,
    } else {
    }
    return
  }
  func.func @transform_0(%arg0: i32, %arg1: i32, %arg2: memref<2xi32, #tpu.memory_space<smem>>, %arg3: memref<2xi32, #tpu.memory_space<smem>>) -> (i32, i32) {
    %c0_i32 = arith.constant 0 : i32
    %c0_i32_0 = arith.constant 0 : i32
    return %arg0, %c0_i32 : i32, i32
  }
  func.func @transform_1(%arg0: i32, %arg1: i32, %arg2: memref<2xi32, #tpu.memory_space<smem>>, %arg3: memref<2xi32, #tpu.memory_space<smem>>) -> (i32, i32) {
    %0 = arith.index_cast %arg0 : i32 to index
    %1 = memref.load %arg2[%0] : memref<2xi32, #tpu.memory_space<smem>>
    %2 = arith.index_cast %arg0 : i32 to index
    %3 = memref.load %arg3[%2] : memref<2xi32, #tpu.memory_space<smem>>
    %c1_i32 = arith.constant 1 : i32
    %4 = arith.subi %3, %c1_i32 : i32
    %c0_i32 = arith.constant 0 : i32
    %5 = arith.maxsi %4, %c0_i32 : i32
    %6 = arith.addi %1, %5 : i32
    %7 = arith.index_cast %arg0 : i32 to index
    %8 = memref.load %arg2[%7] : memref<2xi32, #tpu.memory_space<smem>>
    %9 = arith.addi %8, %arg1 : i32
    %10 = arith.minsi %9, %6 : i32
    %c0_i32_0 = arith.constant 0 : i32
    %c0_i32_1 = arith.constant 0 : i32
    return %10, %c0_i32_0 : i32, i32
  }
  func.func @transform_2(%arg0: i32, %arg1: i32, %arg2: memref<2xi32, #tpu.memory_space<smem>>, %arg3: memref<2xi32, #tpu.memory_space<smem>>) -> (i32, i32) {
    %0 = arith.index_cast %arg0 : i32 to index
    %1 = memref.load %arg2[%0] : memref<2xi32, #tpu.memory_space<smem>>
    %2 = arith.index_cast %arg0 : i32 to index
    %3 = memref.load %arg3[%2] : memref<2xi32, #tpu.memory_space<smem>>
    %c1_i32 = arith.constant 1 : i32
    %4 = arith.subi %3, %c1_i32 : i32
    %c0_i32 = arith.constant 0 : i32
    %5 = arith.maxsi %4, %c0_i32 : i32
    %6 = arith.addi %1, %5 : i32
    %7 = arith.index_cast %arg0 : i32 to index
    %8 = memref.load %arg2[%7] : memref<2xi32, #tpu.memory_space<smem>>
    %9 = arith.addi %8, %arg1 : i32
    %10 = arith.minsi %9, %6 : i32
    %c0_i32_0 = arith.constant 0 : i32
    %c0_i32_1 = arith.constant 0 : i32
    return %c0_i32_0, %10 : i32, i32
  }
  func.func @transform_3(%arg0: i32, %arg1: i32, %arg2: memref<2xi32, #tpu.memory_space<smem>>, %arg3: memref<2xi32, #tpu.memory_space<smem>>) -> (i32, i32) {
    %c0_i32 = arith.constant 0 : i32
    %c0_i32_0 = arith.constant 0 : i32
    %c0_i32_1 = arith.constant 0 : i32
    return %c0_i32, %c0_i32_0 : i32, i32
  }
  func.func @transform_4(%arg0: i32, %arg1: i32, %arg2: memref<2xi32, #tpu.memory_space<smem>>, %arg3: memref<2xi32, #tpu.memory_space<smem>>) -> (i32, i32) {
    %c0_i32 = arith.constant 0 : i32
    %c0_i32_0 = arith.constant 0 : i32
    %c0_i32_1 = arith.constant 0 : i32
    return %c0_i32, %c0_i32_0 : i32, i32
  }
  func.func @transform_5(%arg0: i32, %arg1: i32, %arg2: memref<2xi32, #tpu.memory_space<smem>>, %arg3: memref<2xi32, #tpu.memory_space<smem>>) -> (i32, i32) {
    %c0_i32 = arith.constant 0 : i32
    %c0_i32_0 = arith.constant 0 : i32
    %c0_i32_1 = arith.constant 0 : i32
    return %c0_i32, %c0_i32_0 : i32, i32
  }
  func.func @transform_6(%arg0: i32, %arg1: i32, %arg2: memref<2xi32, #tpu.memory_space<smem>>, %arg3: memref<2xi32, #tpu.memory_space<smem>>) -> (i32, i32) {
    %c0_i32 = arith.constant 0 : i32
    %c0_i32_0 = arith.constant 0 : i32
    %c0_i32_1 = arith.constant 0 : i32
    return %c0_i32, %c0_i32_0 : i32, i32
  }
  func.func @transform_7(%arg0: i32, %arg1: i32, %arg2: memref<2xi32, #tpu.memory_space<smem>>, %arg3: memref<2xi32, #tpu.memory_space<smem>>) -> (i32, i32) {
    %c0_i32 = arith.constant 0 : i32
    %c0_i32_0 = arith.constant 0 : i32
    %c0_i32_1 = arith.constant 0 : i32
    return %c0_i32, %c0_i32_0 : i32, i32
  }
  func.func @transform_8(%arg0: i32, %arg1: i32, %arg2: memref<2xi32, #tpu.memory_space<smem>>, %arg3: memref<2xi32, #tpu.memory_space<smem>>) -> (i32, i32) {
    %c0_i32 = arith.constant 0 : i32
    %c0_i32_0 = arith.constant 0 : i32
    %c0_i32_1 = arith.constant 0 : i32
    return %c0_i32, %c0_i32_0 : i32, i32
  }
  func.func @transform_9(%arg0: i32, %arg1: i32, %arg2: memref<2xi32, #tpu.memory_space<smem>>, %arg3: memref<2xi32, #tpu.memory_space<smem>>) -> (i32, i32) {
    %c0_i32 = arith.constant 0 : i32
    %c0_i32_0 = arith.constant 0 : i32
    %c0_i32_1 = arith.constant 0 : i32
    return %c0_i32, %c0_i32_0 : i32, i32
  }
  func.func @transform_10(%arg0: i32, %arg1: i32, %arg2: memref<2xi32, #tpu.memory_space<smem>>, %arg3: memref<2xi32, #tpu.memory_space<smem>>) -> (i32, i32) {
    %c0_i32 = arith.constant 0 : i32
    %c0_i32_0 = arith.constant 0 : i32
    %c0_i32_1 = arith.constant 0 : i32
    return %c0_i32, %c0_i32_0 : i32, i32
  }
  func.func @transform_11(%arg0: i32, %arg1: i32, %arg2: memref<2xi32, #tpu.memory_space<smem>>, %arg3: memref<2xi32, #tpu.memory_space<smem>>) -> (i32, i32) {
    %c0_i32 = arith.constant 0 : i32
    %c0_i32_0 = arith.constant 0 : i32
    %c0_i32_1 = arith.constant 0 : i32
    return %c0_i32, %c0_i32_0 : i32, i32
  }
  func.func @transform_12(%arg0: i32, %arg1: i32, %arg2: memref<2xi32, #tpu.memory_space<smem>>, %arg3: memref<2xi32, #tpu.memory_space<smem>>) -> (i32, i32) {
    %c0_i32 = arith.constant 0 : i32
    %c0_i32_0 = arith.constant 0 : i32
    return %arg0, %c0_i32 : i32, i32
  }
}

</mosaic_0001>

<bundles_post_ra>
// kernel: tpu_custom_call.1
= control target key start
LH: loop header
LB: loop body
LE: loop exit
PB: predicated region body
PF: predicated region fallthrough
CT: control target
= control target key end

     0   :  { %s4839_s19 = smov [#allocation4]   ;;  %s4840_s20 = smov [#allocation5]   ;;  %s6257_s0 = inlined_call_operand.hbm [shape: s32[2], index: 0, kind: input, shape index: {}]   ;;  %s6258_s2 = inlined_call_operand.hbm [shape: f32[512,128], index: 2, kind: input, shape index: {}]   ;;  %s6259_s3 = inlined_call_operand.hbm [shape: bf16[2048,128], index: 3, kind: input, shape index: {}]   ;;  %s6260_s4 = inlined_call_operand.hbm [shape: s32[1,2048], index: 4, kind: input, shape index: {}]   ;;  %s6261_s5 = inlined_call_operand.hbm [shape: f32[128,128], index: 5, kind: input, shape index: {}]   ;;  %s6262_s6 = inlined_call_operand.hbm [shape: f32[128,128], index: 6, kind: input, shape index: {}]   ;;  %s6263_s7 = inlined_call_operand.vmem [shape: f32[1,128], index: 7, kind: input, shape index: {}]   ;;  %s6264_s8 = inlined_call_operand.hbm [shape: bf16[128,128], index: 8, kind: input, shape index: {}]   ;;  %s6265_s9 = inlined_call_operand.vmem [shape: f32[1,128], index: 9, kind: input, shape index: {}]   ;;  %s6266_s10 = inlined_call_operand.hbm [shape: bf16[128,128], index: 10, kind: input, shape index: {}]   ;;  %s6267_s11 = inlined_call_operand.vmem [shape: f32[1,128], index: 11, kind: input, shape index: {}]   ;;  %s6268_s12 = inlined_call_operand.vmem [shape: f32[1,128], index: 12, kind: input, shape index: {}]   ;;  %s6269_s13 = inlined_call_operand.vmem [shape: f32[1,128], index: 13, kind: input, shape index: {}]   ;;  %s6270_s14 = inlined_call_operand.hbm [shape: f32[512,128], index: 14, kind: output, shape index: {}]   ;;  %s6271_s1 = inlined_call_operand.hbm [shape: s32[2], index: 1, kind: input, shape index: {}]  }
   0x1   :  { %6300 = sst [smem:[#allocation48_spill]] %s6258_s2  ;;  %s20_s15 = sshll.u32 %s6257_s0, 4  ;;  %s21_s15 = int_to_ptr.hbm [resolvable:$true] %s20_s15 }
   0x2   :  { %6301 = sst [smem:[#allocation49_spill]] %s6259_s3  ;;  %s25_s18 = sshll.u32 %s6271_s1, 4  ;;  %s26_s18 = int_to_ptr.hbm [resolvable:$true] %s25_s18 }
   0x3   :  { %6302 = sst [smem:[#allocation50_spill]] %s6260_s4 }
   0x4   :  { %6303 = sst [smem:[#allocation51_spill]] %s6261_s5 }
   0x5   :  { %6304 = sst [smem:[#allocation52_spill]] %s6262_s6 }
   0x6   :  { %6305 = sst [smem:[#allocation53_spill]] %s6263_s7 }
   0x7   :  { %6306 = sst [smem:[#allocation54_spill]] %s6264_s8 }
   0x8   :  { %6307 = sst [smem:[#allocation55_spill]] %s6265_s9 }
   0x9   :  { %6308 = sst [smem:[#allocation56_spill]] %s6266_s10 }
   0xa   :  { %6309 = sst [smem:[#allocation57_spill]] %s6267_s11 }
   0xb   :  { %6310 = sst [smem:[#allocation58_spill]] %s6268_s12 }
   0xc   :  { %6311 = sst [smem:[#allocation59_spill]] %s6269_s13 }
   0xd   :  { %6312 = sst [smem:[#allocation60_spill]] %s6270_s14 }
   0xe   :  { %23 = dma.hbm_to_smem %s21_s15, 16, %s4839_s19, [#allocation3] }
   0xf   :  { %28 = dma.hbm_to_smem %s26_s18, 16, %s4840_s20, [#allocation3] }
  0x10   :  { %4757 = dma.done.wait [#allocation3], 32 }
  0x11   :  { %4758 = vsyncadd [#allocation3], 4294967264 }
  0x12   :  { %31 = sfence }
  0x13   :  { %32 = vsyncpa [#allocation7], 0 }
  0x14   :  { %34 = vsyncpa [#allocation7 + $0x1], 0 }
  0x15   :  { %35 = vsyncpa [#allocation10], 0 }
  0x16   :  { %37 = vsyncpa [#allocation10 + $0x1], 0 }
  0x17   :  { %38 = vsyncpa [#allocation13], 0 }
  0x18   :  { %39 = vsyncpa [#allocation16], 0 }
  0x19   :  { %40 = vsyncpa [#allocation8], 0 }
  0x1a   :  { %42 = vsyncpa [#allocation8 + $0x1], 0  ;;  %s4935_s0 = smov 0   ;;  %s4937_s1 = smov 0  }
  0x1b   :  { %s4939_s21 = smov 0   ;;  %s4941_s22 = smov 0  }
  0x1c   :  { %s4943_s23 = smov 0   ;;  %s4945_s24 = smov 0  }
  0x1d   :  { %s4947_s25 = smov 0   ;;  %s4949_s26 = smov 0  }
  0x1e   :  { %s4951_s27 = smov 0   ;;  %s4953_s28 = smov 0  }
  0x1f   :  { %s4955_s29 = smov 0   ;;  %s4957_s30 = smov 0  }
  0x20   :  { %s4959_s15 = smov 0   ;;  %s4961_s16 = smov 0  }
  0x21 LB: > { %6313 = sst [smem:[#allocation34_spill]] %s4789_s1  ;;  %s5006_s17 = sadd.s32 4294967295, %s4837_s16   ;;  %s4837_s16 = sphi %s4961_s16, %s48_s16   ;;  %s4833_s15 = sphi %s4959_s15, %s6395_s15   ;;  %s4829_s30 = sphi %s4957_s30, %s6403_s30   ;;  %s4825_s29 = sphi %s4955_s29, %s6393_s29   ;;  %s4821_s28 = sphi %s4953_s28, %s6402_s28   ;;  %s4817_s27 = sphi %s4951_s27, %s6401_s27   ;;  %s4813_s26 = sphi %s4949_s26, %s6400_s26   ;;  %s4809_s25 = sphi %s4947_s25, %s6399_s25   ;;  %s4805_s24 = sphi %s4945_s24, %s6398_s24   ;;  %s4801_s23 = sphi %s4943_s23, %s6390_s23   ;;  %s4797_s22 = sphi %s4941_s22, %s6389_s22   ;;  %s4793_s21 = sphi %s4939_s21, %s6397_s21   ;;  %s4789_s1 = sphi %s4937_s1, %s6388_s1   ;;  %s4785_s0 = sphi %s4935_s0, %s6387_s0  }
  0x22   : > { %6314 = sst [smem:[#allocation35_spill]] %s4793_s21  ;;  %p3629_p0 = scmp.ge.s32.totalorder %s4837_s16, 1 }
  0x23   : > { %6315 = sst [smem:[#allocation36_spill]] %s4801_s23  ;;  %p6292_p1 = scmp.eq.s32.totalorder %s5006_s17, 0 }
  0x24   : > { %6316 = sst [smem:[#allocation37_spill]] %s4805_s24  ;;  %p394_p2 = scmp.lt.s32.totalorder %s4837_s16, 7 }
  0x25   : > { %6317 = sst [smem:[#allocation38_spill]] %s4821_s28  ;;  %s4841_s13 = smov [#allocation12]  }
  0x26   : > { %6318 = sst [smem:[#allocation39_spill]] %s4825_s29  ;;  %p5014_p3 = pnand %p3629_p0, %p394_p2 }
  0x27   : > { %6319 = sst [smem:[#allocation40_spill]] %s4833_s15  ;;  %s407_s12 = sshll.u32 %s4841_s13, 4  ;;  %s408_s12 = int_to_ptr.vmem [resolvable:$true] %s407_s12 }
  0x28   : > { %s6320_s5 = sld [smem:[#allocation51_spill]]  ;;  %p4194_p4 = pneg %p5014_p3 }
  0x29   : > { %s6321_s14 = scalar_select %p5014_p3, 1, 0 }
  0x2a   : > { %p5022_p5 = pnand %p4194_p4, %p6292_p1  ;;  %p6293_p6 = scmp.lt.s32.totalorder %s4837_s16, 6 }
  0x2b   : > { %6322 = sst [smem:[#allocation41_spill]] %s6321_s14  ;;  %s6275_s9 = smov 128  }
  0x2c   : > { %s6324_s8 = sld [smem:[#allocation54_spill]]  ;;  %s6277_s13 = smov 8  }
  0x2d   : > { %s4844_s7 = smov [#allocation15]   ;;  %s6279_s18 = smov 64  }
  0x2e   : > { %s405_s20 = sshll.u32 %s6320_s5, 4  ;;  %s438_s29 = sshll.u32 %s4844_s7, 4  ;;  %s406_s20 = int_to_ptr.hbm [resolvable:$true] %s405_s20  ;;  %s439_s29 = int_to_ptr.vmem [resolvable:$true] %s438_s29 }
  0x2f   : > { %4197 = dma.hbm_to_vmem [thread:$0]  (!%p5022_p5), %s406_s20, 2048, %s408_s12, [#allocation13], %s6275_s9, %s6275_s9, %s6277_s13  }
  0x30   : > { %s6281_s19 = smov 4   ;;  %s60_s12 = sadd.s32 1, %s4833_s15 }
  0x31   : > { %p6291_p8 = scmp.eq.s32.totalorder %s4837_s16, 0  ;;  %s90_s20 = sld [smem:[#allocation4 + %s4833_s15]] }
  0x32   : > { %s436_s5 = sshll.u32 %s6324_s8, 4  ;;  %s57_s8 = sadd.s32 1, %s4829_s30  ;;  %s437_s5 = int_to_ptr.hbm [resolvable:$true] %s436_s5 }
  0x33   : > { %4203 = dma.hbm_to_vmem [thread:$0]  (!%p5022_p5), %s437_s5, 1024, %s439_s29, [#allocation16], %s6279_s18, %s6279_s18, %s6281_s19  }
  0x34   : > { %p58_p7 = scmp.ge.s32.totalorder %s57_s8, 3  ;;  %s91_s7 = sld [smem:[#allocation5 + %s4833_s15]] }
  0x35   : > { %p118_p10 = scmp.ne.s32.totalorder %s4805_s24, %s4801_s23  ;;  %p124_p11 = scmp.ne.s32.totalorder %s4801_s23, %s4797_s22 }
  0x36   : > { %s6405_s8 = smov (%p58_p7, %s57_s8), 0  ;;  %s6407_s12 = smov (!%p58_p7, %s60_s12), %s4833_s15 }
  0x37   : > { %6325 = sst [smem:[#allocation42_spill]] %s6405_s8  ;;  %p62_p9 = scmp.ge.s32.totalorder %s6407_s12, 2 }
  0x38   : > { %s96_s5 = sadd.s32 %s4829_s30, %s90_s20  ;;  %p5059_p12 = por %p118_p10, %p6291_p8 }
  0x39   : > { %s6409_s12 = smov (%p62_p9, %s6407_s12), 0  ;;  %p5066_p13 = por %p124_p11, %p6292_p1 }
  0x3a   : > { %6326 = sst [smem:[#allocation43_spill]] %s6409_s12  ;;  %s3625_s22 = sadd.s32 4294967295, %s91_s7 }
  0x3b   : > { %s99_s18 = sld [smem:[#allocation4 + %s6409_s12]]  ;;  %p93_p0 = scmp.gt.s32.totalorder %s3625_s22, 0 }
  0x3c   : > { %s6328_s19 = scalar_select %p5066_p13, 1, 0 }
  0x3d   : > { %s100_s13 = sld [smem:[#allocation5 + %s6409_s12]]  ;;  %s502_s9 = sand.u32 1, %s4805_s24  }
  0x3e   : > { %6329 = sst [smem:[#allocation44_spill]] %s6328_s19  ;;  %p5076_p2 = pnand %p6293_p6, %p5059_p12 }
  0x3f   : > { %s6411_s22 = smov (!%p93_p0, %s3625_s22), 0  ;;  %s3638_s23 = sshll.u32 %s502_s9, 8 }
  0x40   : > { %s95_s14 = sadd.s32 %s6411_s22, %s90_s20  ;;  %s504_s21 = scalar_lea.vmem [#allocation9], %s3638_s23 }
  0x41   : > { %s105_s4 = sadd.s32 %s99_s18, %s6405_s8  ;;  %p97_p4 = scmp.lt.s32.totalorder %s96_s5, %s95_s14 }
  0x42   : > { %s4171_s7 = scalar_select %p5059_p12, [#allocation4], [#allocation19] }
  0x43   : > { %s3626_s2 = sadd.s32 4294967295, %s100_s13  ;;  %s6413_s5 = smov (!%p97_p4, %s96_s5), %s95_s14 }
  0x44   : > { %p102_p7 = scmp.gt.s32.totalorder %s3626_s2, 0  ;;  %s5083_s1 = sshll.u32 %s504_s21, 4 }
  0x45   : > { %6331 = sst [smem:[#allocation45_spill]] %s5083_s1  ;;  %s6419_s7 = smov (!%p6293_p6, %s4171_s7), [#allocation23] }
  0x46   : > { %s6415_s2 = smov (!%p102_p7, %s3626_s2), 0  ;;  %s6332_s6 = sld [smem:[#allocation52_spill]] }
  0x47   : > { %s104_s19 = sadd.s32 %s6415_s2, %s99_s18  ;;  %s6333_s2 = sadd.s32 1, %s4805_s24 }
  0x48   : > { %p106_p9 = scmp.lt.s32.totalorder %s105_s4, %s104_s19  ;;  %s6335_s10 = sld [smem:[#allocation56_spill]] }
  0x49   : > { %s4172_s9 = scalar_select %p5059_p12, %s4833_s15, 0 }
  0x4a   : > { %s6417_s4 = smov (!%p106_p9, %s105_s4), %s104_s19  ;;  %s4847_s19 = smov [#allocation14]  }
  0x4b   : > { %s108_s14 = ssub.s32 %s6413_s5, %s6417_s4  ;;  %s6421_s9 = smov (!%p6293_p6, %s4172_s9), 0 }
  0x4c   : > { %s419_s22 = sshll.u32 %s6332_s6, 4  ;;  %p109_p10 = scmp.eq.s32.totalorder %s108_s14, 0  ;;  %s420_s22 = int_to_ptr.hbm [resolvable:$true] %s419_s22 }
  0x4d   : > { %s505_s23 = sld [smem:[%s6419_s7 + %s6421_s9]]  ;;  %s421_s1 = sshll.u32 %s4847_s19, 4  ;;  %s422_s1 = int_to_ptr.vmem [resolvable:$true] %s421_s1 }
  0x4e   : > { %s5099_s21 = scalar_select %p109_p10, %s4805_s24, %s6333_s2  }
  0x4f   : > { %s4173_s18 = scalar_select %p5059_p12, [#allocation5], [#allocation20] }
  0x50   : > { %6334 = sst [smem:[#allocation46_spill]] %s5099_s21  ;;  %s453_s14 = sshll.u32 %s6335_s10, 4  ;;  %s454_s14 = int_to_ptr.hbm [resolvable:$true] %s453_s14 }
  0x51   : > { %s6423_s18 = smov (!%p6293_p6, %s4173_s18), [#allocation24]  ;;  %s4848_s29 = smov [#allocation17]  }
  0x52   : > { %s506_s13 = sld [smem:[%s6423_s18 + %s6421_s9]]  ;;  %s455_s20 = sshll.u32 %s4848_s29, 4  ;;  %s456_s20 = int_to_ptr.vmem [resolvable:$true] %s455_s20 }
  0x53   : > { %s511_s7 = sadd.s32 %s4829_s30, %s505_s23  ;;  %s6336_s2 = smov 8  }
  0x54   : > { %s6337_s19 = smov 128   ;;  %s6338_s4 = smov 4  }
  0x55   : > { %4200 = dma.hbm_to_vmem [thread:$0]  (!%p5022_p5), %s420_s22, 2048, %s422_s1, [#allocation13], %s6337_s19, %s6337_s19, %s6336_s2  }
  0x56   : > { %s6339_s5 = smov 64   ;;  %s3624_s18 = sadd.s32 4294967294, %s4837_s16  }
  0x57   : > { %4206 = dma.hbm_to_vmem [thread:$0]  (!%p5022_p5), %s454_s14, 1024, %s456_s20, [#allocation16], %s6339_s5, %s6339_s5, %s6338_s4  }
  0x58   : > { %s3639_s9 = sadd.s32 4294967295, %s506_s13  ;;  %s64_s29 = ssub.s32 %s4833_s15, %s6409_s12 }
  0x59   : > { %p508_p11 = scmp.gt.s32.totalorder %s3639_s9, 0  ;;  %s67_s6 = sadd.s32 1, %s4817_s27 }
  0x5a   : > { %p65_p12 = scmp.eq.s32.totalorder %s64_s29, 0  ;;  %p74_p4 = scmp.ne.s32.totalorder %s4817_s27, %s4813_s26 }
  0x5b   : > { %s6425_s9 = smov (!%p508_p11, %s3639_s9), 0  ;;  %p6294_p7 = scmp.ne.s32.totalorder %s4813_s26, %s4809_s25 }
  0x5c   : > { %s510_s10 = sadd.s32 %s6425_s9, %s505_s23  ;;  %p5130_p5 = por %p6291_p8, %p74_p4 }
  0x5d   : > { %p512_p0 = scmp.lt.s32.totalorder %s511_s7, %s510_s10  ;;  %p381_p9 = scmp.eq.s32.totalorder %s5006_s17, 5 }
  0x5e   : > { %s5126_s11 = scalar_select %p65_p12, %s4817_s27, %s67_s6  }
  0x5f   : > { %s6427_s7 = smov (!%p512_p0, %s511_s7), %s510_s10  ;;  %s6342_s3 = sld [smem:[#allocation49_spill]] }
  0x60   : > { %6340 = sst [smem:[#allocation47_spill]] %s5126_s11  ;;  %s4112_s22 = sshll.u32 %s6427_s7, 8 }
  0x61   : > { %p5145_p10 = por %p6292_p1, %p6294_p7  ;;  %p5149_p11 = por %p381_p9, %p74_p4 }
  0x62   : > { %p5153_p12 = scmp.eq.s32.totalorder %s3624_s18, 5  ;;  %s6346_s7 = sand.u32 1, %s4837_s16  }
  0x63   : > { %s6344_s10 = scalar_select %p5149_p11, 1, 0 }
  0x64   : > { %s5159_s29 = scalar_lea.sflag [#allocation10], %s6346_s7  ;;  %p4587_p8 = pneg %p5076_p2 }
  0x65   : > { %s518_s23 = scalar_lea.hbm %s6342_s3, %s4112_s22  ;;  %s4590_s11 = scalar_lea.hbm %s6342_s3, 1024 }
  0x66   : > { %s519_s6 = sshll.u32 %s518_s23, 4  ;;  %s520_s6 = int_to_ptr.hbm [resolvable:$true] %s519_s6 }
  0x67   : > { %s4583_s22 = sshra.s32 %s520_s6, 4  ;;  %s4584_s22 = int_to_ptr.hbm [resolvable:$true] %s4583_s22 }
  0x68   : > { %s4585_s14 = scalar_lea.hbm %s4584_s22, 256  ;;  %p4591_p4 = scmp.lt.s32.totalorder %s4584_s22, %s6342_s3 }
  0x69   : > { %p4586_p0 = scmp.ne.s32.totalorder %s4584_s22, %s4585_s14  ;;  %p4592_p9 = scmp.lt.s32.totalorder %s4590_s11, %s4585_s14 }
  0x6b   : > { %p4588_p1 = pnand %p4587_p8, %p4586_p0  ;;  %p4593_p7 = por %p4592_p9, %p4591_p4 }
  0x6d   : > { %p4589_p6 = pneg %p4588_p1 }
  0x6f   : > { %p4594_p11 = pnand %p4593_p7, %p4589_p6 }
  0x71   : > { %4597 = shalt.err (!%p4594_p11)
}
  0x72   : > { %s6347_s7 = sld [smem:[#allocation45_spill]]  ;;  %p6349_p1 = scmp.ne.s32.totalorder %s4813_s26, %s4809_s25 }
  0x73   : > { %s6351_s21 = sld [smem:[#allocation34_spill]]  ;;  %s478_s11 = sand.u32 1, %s4817_s27  }
  0x74   : > { %p5182_p6 = por %p5153_p12, %p6349_p1  ;;  %s3635_s22 = sshll.u32 %s478_s11, 8 }
  0x75   : > { %s6352_s14 = sld [smem:[#allocation35_spill]]  ;;  %s4111_s13 = sshll.u32 %s4833_s15, 8 }
  0x76   : > { %p6354_p8 = scmp.lt.s32.totalorder %s4837_s16, 6  ;;  %s479_s9 = scalar_lea.sflag [#allocation7], %s478_s11 }
  0x77   : > { %s134_s3 = sld [smem:[#allocation4 + %s4833_s15]]  ;;  %p6355_p12 = scmp.eq.s32.totalorder %s5006_s17, 0 }
  0x78   : > { %s6348_s24 = int_to_ptr.vmem [resolvable:$true] %s6347_s7  ;;  %s6353_s7 = sld [smem:[#allocation48_spill]] }
  0x79   : > { %4217 = dma.hbm_to_vmem [thread:$0]  (!%p5076_p2), %s520_s6, 4096, %s6348_s24, %s5159_s29, %s6339_s5, %s6339_s5, %s6338_s4  }
  0x7a   : > { %s482_s4 = scalar_lea.vmem [#allocation6], %s3635_s22  ;;  %p4208_p2 = pnand %p6354_p8, %p5130_p5 }
  0x7b   : > { %s490_s5 = sshll.u32 %s482_s4, 4  ;;  %s135_s23 = sld [smem:[#allocation5 + %s4833_s15]]  ;;  %s491_s5 = int_to_ptr.vmem [resolvable:$true] %s490_s5 }
  0x7c   : > { %p168_p7 = scmp.ne.s32.totalorder %s6351_s21, %s4785_s0  ;;  %s143_s22 = sld [smem:[#allocation4 + %s6409_s12]] }
  0x7d   : > { %p162_p11 = scmp.ne.s32.totalorder %s6352_s14, %s6351_s21  ;;  %p6357_p4 = scmp.eq.s32.totalorder %s4837_s16, 0 }
  0x7e   : > { %s487_s24 = scalar_lea.hbm %s6353_s7, %s4111_s13  ;;  %s144_s13 = sld [smem:[#allocation5 + %s6409_s12]] }
  0x7f   : > { %s488_s6 = sshll.u32 %s487_s24, 4  ;;  %p5208_p0 = por %p168_p7, %p6355_p12  ;;  %s489_s6 = int_to_ptr.hbm [resolvable:$true] %s488_s6 }
  0x80   : > { %4210 = dma.hbm_to_vmem [thread:$0]  (!%p4208_p2), %s489_s6, 4096, %s491_s5, %s479_s9, %s6337_s19, %s6337_s19, %s6336_s2  }
  0x81   : > { %s3627_s1 = sadd.s32 4294967295, %s135_s23  ;;  %p5214_p9 = por %p162_p11, %p6357_p4 }
  0x82   : > { %p137_p5 = scmp.gt.s32.totalorder %s3627_s1, 0  ;;  %s140_s2 = sadd.s32 %s4829_s30, %s134_s3 }
  0x83   : > { %p5223_p2 = pnand %p6354_p8, %p5214_p9  ;;  %s149_s7 = sadd.s32 %s143_s22, %s6405_s8 }
  0x84   : > { %s3628_s0 = sadd.s32 4294967295, %s144_s13  ;;  %s6429_s1 = smov (!%p137_p5, %s3627_s1), 0 }
  0x85   : > { %p146_p1 = scmp.gt.s32.totalorder %s3628_s0, 0  ;;  %s139_s21 = sadd.s32 %s6429_s1, %s134_s3 }
  0x86   : > { %p141_p7 = scmp.lt.s32.totalorder %s140_s2, %s139_s21  ;;  %s155_s9 = sadd.s32 1, %s6352_s14 }
  0x87   : > { %s6431_s0 = smov (!%p146_p1, %s3628_s0), 0  ;;  %p6360_p5 = pmov %p6354_p8 }
  0x88   : > { %s6433_s2 = smov (!%p141_p7, %s140_s2), %s139_s21  ;;  %s148_s24 = sadd.s32 %s6431_s0, %s143_s22 }
  0x89   : > { %p150_p11 = scmp.lt.s32.totalorder %s149_s7, %s148_s24  ;;  %p6361_p4 = pmov %p6360_p5 }
  0x8a   : > { %s4176_s4 = scalar_select %p5214_p9, [#allocation4], [#allocation21] }
  0x8b   : > { %s6435_s7 = smov (!%p150_p11, %s149_s7), %s148_s24  ;;  %p6362_p1 = pmov %p6361_p4 }
  0x8c   : > { %s4177_s5 = scalar_select %p5214_p9, %s4833_s15, 0 }
  0x8d   : > { %s152_s6 = ssub.s32 %s6433_s2, %s6435_s7  ;;  %s6437_s4 = smov (!%p6360_p5, %s4176_s4), [#allocation25] }
  0x8e   : > { %p153_p12 = scmp.eq.s32.totalorder %s152_s6, 0  ;;  %s6439_s5 = smov (!%p6361_p4, %s4177_s5), 0 }
  0x8f   : > { %s4178_s23 = scalar_select %p5214_p9, [#allocation5], [#allocation22] }
  0x90   : > { %s5237_s3 = scalar_select %p153_p12, %s6352_s14, %s155_s9  }
  0x91   : > { %s6441_s23 = smov (!%p6362_p1, %s4178_s23), [#allocation26]  ;;  %s536_s13 = sld [smem:[%s6437_s4 + %s6439_s5]] }
  0x92   : > { %s537_s22 = sld [smem:[%s6441_s23 + %s6439_s5]]  ;;  %s533_s1 = sand.u32 1, %s6352_s14  }
  0x93   : > { %s3642_s21 = sshll.u32 %s533_s1, 2  ;;  %s6363_s8 = sld [smem:[#allocation50_spill]] }
  0x94   : > { %s535_s7 = scalar_lea.vmem [#allocation11], %s3642_s21  ;;  %p4647_p11 = pneg %p5223_p2 }
  0x95   : > { %s552_s6 = sshll.u32 %s535_s7, 4  ;;  %s553_s6 = int_to_ptr.vmem [resolvable:$true] %s552_s6 }
  0x97   : > { %s542_s24 = sadd.s32 %s4829_s30, %s536_s13 }
  0x98   : > { %s3643_s0 = sadd.s32 4294967295, %s537_s22 }
  0x99   : > { %p539_p8 = scmp.gt.s32.totalorder %s3643_s0, 0  ;;  %s4650_s22 = scalar_lea.hbm %s6363_s8, 16 }
  0x9b   : > { %s6443_s0 = smov (!%p539_p8, %s3643_s0), 0 }
  0x9c   : > { %s541_s2 = sadd.s32 %s6443_s0, %s536_s13 }
  0x9d   : > { %p543_p7 = scmp.lt.s32.totalorder %s542_s24, %s541_s2 }
  0x9f   : > { %s6445_s24 = smov (!%p543_p7, %s542_s24), %s541_s2 }
  0xa0   : > { %s3644_s9 = sshll.u32 %s6445_s24, 2 }
  0xa1   : > { %s548_s15 = scalar_lea.hbm %s6363_s8, %s3644_s9 }
  0xa2   : > { %s550_s4 = sshll.u32 %s548_s15, 4  ;;  %s551_s4 = int_to_ptr.hbm [resolvable:$true] %s550_s4 }
  0xa3   : > { %s4643_s14 = sshra.s32 %s551_s4, 4  ;;  %s4644_s14 = int_to_ptr.hbm [resolvable:$true] %s4643_s14 }
  0xa4   : > { %s4645_s5 = scalar_lea.hbm %s4644_s14, 4  ;;  %p4651_p4 = scmp.lt.s32.totalorder %s4644_s14, %s6363_s8 }
  0xa5   : > { %p4646_p9 = scmp.ne.s32.totalorder %s4644_s14, %s4645_s5  ;;  %p4652_p1 = scmp.lt.s32.totalorder %s4650_s22, %s4645_s5 }
  0xa7   : > { %p4648_p12 = pnand %p4647_p11, %p4646_p9  ;;  %p4653_p8 = por %p4652_p1, %p4651_p4 }
  0xa9   : > { %p4649_p5 = pneg %p4648_p12 }
  0xab   : > { %p4654_p7 = pnand %p4653_p8, %p4649_p5 }
  0xad   : > { %4657 = shalt.err (!%p4654_p7)
}
  0xae   : > { %4224 = dma.hbm_to_vmem [thread:$0]  (!%p5223_p2), %s551_s4, 64, %s553_s6, %s5159_s29  }
  0xaf   : > { %561 = sbr.rel (%p5014_p3) target bundleno = 1698 (0x6a2), region = 68  ;;  %s5264_s12 = sand.u32 (!%p5014_p3), 1, %s4813_s26  }
  0xb0   : > { %s3646_s21 = sshll.u32 (!%p5014_p3), %s5264_s12, 8  ;;  %s564_s24 = scalar_lea.sflag (!%p5014_p3), [#allocation7], %s5264_s12 }
  0xb1   : > { %s5268_s2 = scalar_lea.vmem (!%p5014_p3), [#allocation6], %s3646_s21 }
  0xb4   : > { %4760 = dma.done.wait (%p5145_p10), %s564_s24, 4096  }
  0xb5   : > { %4762 = vsyncadd (%p5145_p10), %s564_s24, 4294963200  ;;  %s6365_s29 = sld [smem:[#allocation36_spill]]  ;;  %s573_s7 = sand.u32 1, %s5006_s17  }
  0xb6   : > { %s574_s11 = scalar_lea.sflag [#allocation10], %s573_s7 }
  0xbb   : > { %s575_s6 = sand.u32 1, %s6365_s29  }
  0xbc   : > { %s3647_s9 = sshll.u32 %s575_s6, 8 }
  0xbd   : > { %s5276_s4 = scalar_lea.vmem [#allocation9], %s3647_s9 }
  0xbe   : > { %4764 = dma.done.wait (%p5066_p13), %s574_s11, 4096  }
  0xbf   : > { %4766 = vsyncadd (%p5066_p13), %s574_s11, 4294963200  ;;  %s6367_s14 = sld [smem:[#allocation34_spill]] }
  0xc5   : > { %s585_s5 = sand.u32 1, %s6367_s14  }
  0xc6   : > { %s5283_s23 = sshll.u32 %s585_s5, 2 }
  0xc7   : > { %s587_s20 = scalar_lea.vmem [#allocation11], %s5283_s23 }
  0xc8   : > { %4768 = dma.done.wait (%p5208_p0), %s574_s11, 64  }
  0xc9   : > { %4770 = vsyncadd (%p5208_p0), %s574_s11, 4294967232  ;;  %p6368_p3 = scmp.eq.s32.totalorder %s5006_s17, 0 }
  0xcb   : > { %4772 = dma.done.wait (%p6368_p3), [#allocation13], 4096   ;;  %p6369_p10 = pmov %p6368_p3 }
  0xcc   : > { %p6370_p13 = pmov %p6368_p3 }
  0xcd   : > { %4774 = vsyncadd (%p6369_p10), [#allocation13], 4294963200 }
  0xce   : > { %4776 = dma.done.wait (%p6370_p13), [#allocation16], 2048   ;;  %p6371_p2 = pmov %p6368_p3 }
  0xcf   : > { %s5298_s13 = scalar_lea.vmem [#allocation18], %s3646_s21  ;;  %s6372_s22 = sld [smem:[#allocation38_spill]] }
  0xd0   : > { %4778 = vsyncadd (%p6371_p2), [#allocation16], 4294965248 }
  0xd5   : > { %p3654_p9 = scmp.ne.s32.totalorder %s6372_s22, 0 }
  0xd7   : > { %684 = sbr.rel (%p3654_p9) target bundleno = 253 (0xfd), region = 100 }
  0xdc   : > { %v4849_v0 = vmov 0.0  }
  0xdd   : > { %685 = vst [vmem:[#allocation2 + $0xb0] sm:$0xff] %v4849_v0 }
  0xde   : > { %686 = vst [vmem:[#allocation2] sm:$0xff] %v4849_v0 }
  0xdf   : > { %687 = vst [vmem:[#allocation2 + $0xd8] sm:$0xff] %v4849_v0 }
  0xe0   : > { %688 = vst [vmem:[#allocation2 + $0x18] sm:$0xff] %v4849_v0 }
  0xe1   : > { %689 = vst [vmem:[#allocation2 + $0x50] sm:$0xff] %v4849_v0 }
  0xe2   : > { %690 = vst [vmem:[#allocation2 + $0x68] sm:$0xff] %v4849_v0 }
  0xe3   : > { %691 = vst [vmem:[#allocation2 + $0x30] sm:$0xff] %v4849_v0 }
  0xe4   : > { %692 = vst [vmem:[#allocation2 + $0x48] sm:$0xff] %v4849_v0 }
  0xe5   : > { %693 = vst [vmem:[#allocation2 + $0x80] sm:$0xff] %v4849_v0 }
  0xe6   : > { %694 = vst [vmem:[#allocation2 + $0x88] sm:$0xff] %v4849_v0 }
  0xe7   : > { %695 = vst [vmem:[#allocation2 + $0xe8] sm:$0xff] %v4849_v0 }
  0xe8   : > { %696 = vst [vmem:[#allocation2 + $0xb8] sm:$0xff] %v4849_v0 }
  0xe9   : > { %697 = vst [vmem:[#allocation2 + $0x60] sm:$0xff] %v4849_v0 }
  0xea   : > { %698 = vst [vmem:[#allocation2 + $0xf0] sm:$0xff] %v4849_v0 }
  0xeb   : > { %699 = vst [vmem:[#allocation2 + $0x8] sm:$0xff] %v4849_v0 }
  0xec   : > { %700 = vst [vmem:[#allocation2 + $0x78] sm:$0xff] %v4849_v0 }
  0xed   : > { %701 = vst [vmem:[#allocation2 + $0x38] sm:$0xff] %v4849_v0 }
  0xee   : > { %702 = vst [vmem:[#allocation2 + $0x58] sm:$0xff] %v4849_v0 }
  0xef   : > { %703 = vst [vmem:[#allocation2 + $0x40] sm:$0xff] %v4849_v0 }
  0xf0   : > { %704 = vst [vmem:[#allocation2 + $0xc8] sm:$0xff] %v4849_v0 }
  0xf1   : > { %705 = vst [vmem:[#allocation2 + $0xe0] sm:$0xff] %v4849_v0 }
  0xf2   : > { %706 = vst [vmem:[#allocation2 + $0x90] sm:$0xff] %v4849_v0 }
  0xf3   : > { %707 = vst [vmem:[#allocation2 + $0x70] sm:$0xff] %v4849_v0 }
  0xf4   : > { %708 = vst [vmem:[#allocation2 + $0xc0] sm:$0xff] %v4849_v0 }
  0xf5   : > { %709 = vst [vmem:[#allocation2 + $0xa8] sm:$0xff] %v4849_v0 }
  0xf6   : > { %710 = vst [vmem:[#allocation2 + $0xd0] sm:$0xff] %v4849_v0 }
  0xf7   : > { %711 = vst [vmem:[#allocation2 + $0x10] sm:$0xff] %v4849_v0 }
  0xf8   : > { %712 = vst [vmem:[#allocation2 + $0x28] sm:$0xff] %v4849_v0 }
  0xf9   : > { %713 = vst [vmem:[#allocation2 + $0xa0] sm:$0xff] %v4849_v0 }
  0xfa   : > { %714 = vst [vmem:[#allocation2 + $0xf8] sm:$0xff] %v4849_v0 }
  0xfb   : > { %715 = vst [vmem:[#allocation2 + $0x20] sm:$0xff] %v4849_v0 }
  0xfc   : > { %716 = vst [vmem:[#allocation2 + $0x98] sm:$0xff] %v4849_v0 }
  0xfd PF: > { %s6373_s17 = sld [smem:[#allocation39_spill]] }
  0xfe   : > { %s6374_s1 = sld [smem:[#allocation38_spill]] }
 0x103   : > { %s717_s18 = sld [smem:[#allocation5 + %s6373_s17]] }
 0x109   : > { %p3655_p0 = scmp.ge.s32.totalorder %s6374_s1, %s717_s18 }
 0x10a   : > { %s6375_s0 = sld [smem:[#allocation39_spill]] (!%p3655_p0) }
 0x10b   : > { %721 = sbr.rel (%p3655_p0) target bundleno = 693 (0x2b5), region = 104 }
 0x110   : > { %v4120_v1 = vld [vmem:[%s5276_s4 + $0x38] sm:$0xff]  ;;  %v4119_v5 = vld [vmem:[%s5276_s4 + $0x30] sm:$0xff]  ;;  %v4118_v9 = vld [vmem:[%s5276_s4 + $0x28] sm:$0xff]  ;;  %s3656_s15 = sshll.u32 %s6375_s0, 8  ;;  %v726_v17 = vlaneseq  ;;  %v4850_v43 = vmov 1.0|1.0  }
 0x111   : > { %v4128_v2 = vld [vmem:[%s5276_s4 + $0x78] sm:$0xff]  ;;  %1499 = vmatpush.bf16.msra.mxu0 %v4120_v1  ;;  %v4127_v6 = vld [vmem:[%s5276_s4 + $0x70] sm:$0xff]  ;;  %v4126_v10 = vld [vmem:[%s5276_s4 + $0x68] sm:$0xff]  ;;  %v724_v21 = vstv %s3656_s15 }
 0x112   : > { %v4136_v3 = vld [vmem:[%s5276_s4 + $0xb8] sm:$0xff]  ;;  %1588 = vmatpush.bf16.msra.mxu1 %v4128_v2  ;;  %v4135_v7 = vld [vmem:[%s5276_s4 + $0xb0] sm:$0xff]  ;;  %v4134_v11 = vld [vmem:[%s5276_s4 + $0xa8] sm:$0xff]  ;;  %v5326_v25 = vshrl.u32 %v726_v17, 7 }
 0x113   : > { %v4144_v4 = vld [vmem:[%s5276_s4 + $0xf8] sm:$0xff]  ;;  %1677 = vmatpush.bf16.msra.mxu2 %v4136_v3  ;;  %v4143_v8 = vld [vmem:[%s5276_s4 + $0xf0] sm:$0xff]  ;;  %v4142_v12 = vld [vmem:[%s5276_s4 + $0xe8] sm:$0xff] }
 0x114   : > { %1766 = vmatpush.bf16.msra.mxu3 %v4144_v4  ;;  %v4117_v13 = vld [vmem:[%s5276_s4 + $0x20] sm:$0xff]  ;;  %v4116_v18 = vld [vmem:[%s5276_s4 + $0x18] sm:$0xff]  ;;  %v4115_v26 = vld [vmem:[%s5276_s4 + $0x10] sm:$0xff]  ;;  %v728_v30 = vadd.s32 8, %v5326_v25  ;;  %v729_v44 = vadd.s32 16, %v5326_v25  ;;  %v730_v45 = vadd.s32 24, %v5326_v25 }
 0x115   : > { %1500 = vmatpush.bf16.msra.mxu0 %v4119_v5  ;;  %v4125_v14 = vld [vmem:[%s5276_s4 + $0x60] sm:$0xff]  ;;  %v4124_v19 = vld [vmem:[%s5276_s4 + $0x58] sm:$0xff]  ;;  %v4123_v27 = vld [vmem:[%s5276_s4 + $0x50] sm:$0xff]  ;;  %v731_v46 = vadd.s32 32, %v5326_v25  ;;  %v732_v47 = vadd.s32 40, %v5326_v25  ;;  %v733_v48 = vadd.s32 48, %v5326_v25 }
 0x116   : > { %1589 = vmatpush.bf16.msra.mxu1 %v4127_v6  ;;  %v4133_v15 = vld [vmem:[%s5276_s4 + $0xa0] sm:$0xff]  ;;  %v4132_v22 = vld [vmem:[%s5276_s4 + $0x98] sm:$0xff]  ;;  %v4131_v28 = vld [vmem:[%s5276_s4 + $0x90] sm:$0xff]  ;;  %v734_v49 = vadd.s32 56, %v5326_v25  ;;  %v735_v50 = vadd.s32 64, %v5326_v25  ;;  %v736_v51 = vadd.s32 72, %v5326_v25 }
 0x117   : > { %1678 = vmatpush.bf16.msra.mxu2 %v4135_v7  ;;  %v4141_v16 = vld [vmem:[%s5276_s4 + $0xe0] sm:$0xff]  ;;  %v4140_v23 = vld [vmem:[%s5276_s4 + $0xd8] sm:$0xff]  ;;  %v4139_v29 = vld [vmem:[%s5276_s4 + $0xd0] sm:$0xff]  ;;  %v737_v52 = vadd.s32 80, %v5326_v25  ;;  %v738_v53 = vadd.s32 88, %v5326_v25  ;;  %v739_v54 = vadd.s32 96, %v5326_v25 }
 0x118   : > { %1767 = vmatpush.bf16.msra.mxu3 %v4143_v8  ;;  %v722_v20 = vld [vmem:[%s587_s20] sm:$0xf]  ;;  %v4114_v32 = vld [vmem:[%s5276_s4 + $0x8] sm:$0xff]  ;;  %v740_v55 = vadd.s32 104, %v5326_v25  ;;  %v741_v56 = vadd.s32 112, %v5326_v25  ;;  %v742_v57 = vadd.s32 120, %v5326_v25 }
 0x119   : > { %1501 = vmatpush.bf16.msra.mxu0 %v4118_v9  ;;  %v725_v24 = vsub.s32 %v722_v20, %v724_v21  ;;  %v4122_v33 = vld [vmem:[%s5276_s4 + $0x48] sm:$0xff]  ;;  %v4113_v39 = vld [vmem:[%s5276_s4] sm:$0xff]  ;;  %v743_v58 = vadd.s32 128, %v5326_v25  ;;  %v744_v59 = vadd.s32 136, %v5326_v25  ;;  %v745_v1 = vadd.s32 144, %v5326_v25  ;;  %v1211_v6 = vld [vmem:[#allocation2 + $0xb0] sm:$0xff] }
 0x11a   : > { %1590 = vmatpush.bf16.msra.mxu1 %v4126_v10  ;;  %v4130_v35 = vld [vmem:[%s5276_s4 + $0x88] sm:$0xff]  ;;  %v4121_v40 = vld [vmem:[%s5276_s4 + $0x40] sm:$0xff]  ;;  %v746_v2 = vadd.s32 152, %v5326_v25  ;;  %v747_v21 = vadd.s32 160, %v5326_v25 }
 0x11b   : > { %1679 = vmatpush.bf16.msra.mxu2 %v4134_v11  ;;  %v5333_v31 = vperm.slane %v725_v24, 0  ;;  %v5337_v34 = vperm.slane %v725_v24, 1  ;;  %v4138_v36 = vld [vmem:[%s5276_s4 + $0xc8] sm:$0xff]  ;;  %v5341_v37 = vperm.slane %v725_v24, 2  ;;  %v5343_v38 = vperm.slane %v725_v24, 3  ;;  %v4129_v41 = vld [vmem:[%s5276_s4 + $0x80] sm:$0xff] }
 0x11c   : > { %1768 = vmatpush.bf16.msra.mxu3 %v4142_v12  ;;  %v4137_v42 = vld [vmem:[%s5276_s4 + $0xc0] sm:$0xff] }
 0x11d   : > { %1502 = vmatpush.bf16.msra.mxu0 %v4117_v13  ;;  %vm763_vm0 = vcmp.eq.s32.totalorder %v5326_v25, %v5333_v31  ;;  %vm767_vm1 = vcmp.eq.s32.totalorder %v728_v30, %v5333_v31  ;;  %vm764_vm2 = vcmp.eq.s32.totalorder %v5326_v25, %v5337_v34  ;;  %vm768_vm3 = vcmp.eq.s32.totalorder %v728_v30, %v5337_v34 }
 0x11e   : > { %1591 = vmatpush.bf16.msra.mxu1 %v4125_v14  ;;  %vm765_vm4 = vcmp.eq.s32.totalorder %v5326_v25, %v5341_v37  ;;  %vm769_vm5 = vcmp.eq.s32.totalorder %v728_v30, %v5341_v37  ;;  %vm3913_vm6 = vmpackc.low %vm767_vm1, %vm763_vm0  ;;  %vm766_vm7 = vcmp.eq.s32.totalorder %v5326_v25, %v5343_v38  ;;  %vm770_vm8 = vcmp.eq.s32.totalorder %v728_v30, %v5343_v38 }
 0x11f   : > { %1680 = vmatpush.bf16.msra.mxu2 %v4133_v15  ;;  %vm3945_vm9 = vmpackc.low %vm768_vm3, %vm764_vm2  ;;  %vm771_vm12 = vcmp.eq.s32.totalorder %v729_v44, %v5333_v31  ;;  %vm775_vm13 = vcmp.eq.s32.totalorder %v730_v45, %v5333_v31  ;;  %vm772_vm14 = vcmp.eq.s32.totalorder %v729_v44, %v5337_v34  ;;  %vm776_vm15 = vcmp.eq.s32.totalorder %v730_v45, %v5337_v34  ;;  %v1212_v15 = vld [vmem:[#allocation2] sm:$0xff] }
 0x120   : > { %1769 = vmatpush.bf16.msra.mxu3 %v4141_v16  ;;  %vm3977_vm10 = vmpackc.low %vm769_vm5, %vm765_vm4  ;;  %vm773_vm0 = vcmp.eq.s32.totalorder %v729_v44, %v5341_v37  ;;  %vm777_vm1 = vcmp.eq.s32.totalorder %v730_v45, %v5341_v37  ;;  %vm774_vm3 = vcmp.eq.s32.totalorder %v729_v44, %v5343_v38  ;;  %vm778_vm4 = vcmp.eq.s32.totalorder %v730_v45, %v5343_v38 }
 0x121   : > { %1503 = vmatpush.bf16.msra.mxu0 %v4116_v18  ;;  %vm4009_vm11 = vmpackc.low %vm770_vm8, %vm766_vm7  ;;  %vm779_vm8 = vcmp.eq.s32.totalorder %v731_v46, %v5333_v31 }
 0x122   : > { %1592 = vmatpush.bf16.msra.mxu1 %v4124_v19  ;;  %vm3915_vm2 = vmpackc.low %vm775_vm13, %vm771_vm12  ;;  %vm781_vm12 = vcmp.eq.s32.totalorder %v731_v46, %v5341_v37  ;;  %vm785_vm13 = vcmp.eq.s32.totalorder %v732_v47, %v5341_v37 }
 0x123   : > { %1681 = vmatpush.bf16.msra.mxu2 %v4132_v22  ;;  %vm3947_vm5 = vmpackc.low %vm776_vm15, %vm772_vm14  ;;  %vm782_vm15 = vcmp.eq.s32.totalorder %v731_v46, %v5343_v38  ;;  %v748_v22 = vadd.s32 168, %v5326_v25 }
 0x124   : > { %1770 = vmatpush.bf16.msra.mxu3 %v4140_v23  ;;  %vm4011_vm7 = vmpackc.low %vm778_vm4, %vm774_vm3  ;;  %vm787_vm4 = vcmp.eq.s32.totalorder %v733_v48, %v5333_v31 }
 0x125   : > { %1504 = vmatpush.bf16.msra.mxu0 %v4115_v26 }
 0x126   : > { %1593 = vmatpush.bf16.msra.mxu1 %v4123_v27  ;;  %v1213_v27 = vld [vmem:[#allocation2 + $0xd8] sm:$0xff] }
 0x127   : > { %1682 = vmatpush.bf16.msra.mxu2 %v4131_v28 }
 0x128   : > { %1771 = vmatpush.bf16.msra.mxu3 %v4139_v29 }
 0x129   : > { %1505 = vmatpush.bf16.msra.mxu0 %v4114_v32 }
 0x12a   : > { %1594 = vmatpush.bf16.msra.mxu1 %v4122_v33 }
 0x12b   : > { %1683 = vmatpush.bf16.msra.mxu2 %v4130_v35 }
 0x12c   : > { %1772 = vmatpush.bf16.msra.mxu3 %v4138_v36 }
 0x12d   : > { %1506 = vmatpush.bf16.msra.mxu0 %v4113_v39 }
 0x12e   : > { %1595 = vmatpush.bf16.msra.mxu1 %v4121_v40  ;;  %v1214_v40 = vld [vmem:[#allocation2 + $0x18] sm:$0xff] }
 0x12f   : > { %1684 = vmatpush.bf16.msra.mxu2 %v4129_v41 }
 0x130   : > { %1773 = vmatpush.bf16.msra.mxu3 %v4137_v42  ;;  %3914 = vmatmul.msk.bf16.vlgmr.msra.gmra.mxu0 %vm3913_vm6, %v4850_v43  ;;  %vm3979_vm6 = vmpackc.low %vm777_vm1, %vm773_vm0  ;;  %vm786_vm0 = vcmp.eq.s32.totalorder %v732_v47, %v5343_v38 }
 0x131   : > { %3946 = vmatmul.msk.bf16.vlgmr.msra.gmra.mxu1 %vm3945_vm9, %v4850_v43  ;;  %vm783_vm9 = vcmp.eq.s32.totalorder %v732_v47, %v5333_v31  ;;  %vm4013_vm3 = vmpackc.low %vm786_vm0, %vm782_vm15  ;;  %vm795_vm0 = vcmp.eq.s32.totalorder %v735_v50, %v5333_v31 }
 0x132   : > { %3978 = vmatmul.msk.bf16.vlgmr.msra.gmra.mxu2 %vm3977_vm10, %v4850_v43  ;;  %vm780_vm10 = vcmp.eq.s32.totalorder %v731_v46, %v5337_v34  ;;  %vm3917_vm14 = vmpackc.low %vm783_vm9, %vm779_vm8  ;;  %vm789_vm8 = vcmp.eq.s32.totalorder %v733_v48, %v5341_v37  ;;  %vm793_vm9 = vcmp.eq.s32.totalorder %v734_v49, %v5341_v37 }
 0x133   : > { %4010 = vmatmul.msk.bf16.vlgmr.msra.gmra.mxu3 %vm4009_vm11, %v4850_v43  ;;  %vm784_vm11 = vcmp.eq.s32.totalorder %v732_v47, %v5337_v34  ;;  %v749_v47 = vadd.s32 176, %v5326_v25 }
 0x134   : > { %vm3949_vm1 = vmpackc.low %vm784_vm11, %vm780_vm10  ;;  %vm790_vm11 = vcmp.eq.s32.totalorder %v733_v48, %v5343_v38 }
 0x140   : > { %3916 = vmatmul.msk.bf16.gmra.mxu0 %vm3915_vm2, %v4850_v43  ;;  %vm3981_vm2 = vmpackc.low %vm785_vm13, %vm781_vm12  ;;  %vm794_vm12 = vcmp.eq.s32.totalorder %v734_v49, %v5343_v38 }
 0x141   : > { %3948 = vmatmul.msk.bf16.gmra.mxu1 %vm3947_vm5, %v4850_v43  ;;  %vm791_vm5 = vcmp.eq.s32.totalorder %v734_v49, %v5333_v31  ;;  %vm4015_vm15 = vmpackc.low %vm794_vm12, %vm790_vm11  ;;  %vm803_vm12 = vcmp.eq.s32.totalorder %v737_v52, %v5333_v31 }
 0x142   : > { %3980 = vmatmul.msk.bf16.gmra.mxu2 %vm3979_vm6, %v4850_v43  ;;  %vm788_vm6 = vcmp.eq.s32.totalorder %v733_v48, %v5337_v34  ;;  %vm3919_vm10 = vmpackc.low %vm791_vm5, %vm787_vm4  ;;  %vm797_vm4 = vcmp.eq.s32.totalorder %v735_v50, %v5341_v37  ;;  %vm801_vm5 = vcmp.eq.s32.totalorder %v736_v51, %v5341_v37  ;;  %v750_v48 = vadd.s32 184, %v5326_v25 }
 0x143   : > { %4012 = vmatmul.msk.bf16.gmra.mxu3 %vm4011_vm7, %v4850_v43  ;;  %vm792_vm7 = vcmp.eq.s32.totalorder %v734_v49, %v5337_v34 }
 0x144   : > { %vm3951_vm13 = vmpackc.low %vm792_vm7, %vm788_vm6  ;;  %vm798_vm7 = vcmp.eq.s32.totalorder %v735_v50, %v5343_v38 }
 0x150   : > { %3918 = vmatmul.msk.bf16.gmra.mxu0 %vm3917_vm14, %v4850_v43  ;;  %vm3983_vm14 = vmpackc.low %vm793_vm9, %vm789_vm8  ;;  %vm802_vm8 = vcmp.eq.s32.totalorder %v736_v51, %v5343_v38 }
 0x151   : > { %3950 = vmatmul.msk.bf16.gmra.mxu1 %vm3949_vm1, %v4850_v43  ;;  %vm799_vm1 = vcmp.eq.s32.totalorder %v736_v51, %v5333_v31  ;;  %vm4017_vm11 = vmpackc.low %vm802_vm8, %vm798_vm7  ;;  %vm811_vm8 = vcmp.eq.s32.totalorder %v739_v54, %v5333_v31 }
 0x152   : > { %3982 = vmatmul.msk.bf16.gmra.mxu2 %vm3981_vm2, %v4850_v43  ;;  %vm796_vm2 = vcmp.eq.s32.totalorder %v735_v50, %v5337_v34  ;;  %vm3921_vm6 = vmpackc.low %vm799_vm1, %vm795_vm0  ;;  %vm805_vm0 = vcmp.eq.s32.totalorder %v737_v52, %v5341_v37  ;;  %vm809_vm1 = vcmp.eq.s32.totalorder %v738_v53, %v5341_v37 }
 0x153   : > { %4014 = vmatmul.msk.bf16.gmra.mxu3 %vm4013_vm3, %v4850_v43  ;;  %vm800_vm3 = vcmp.eq.s32.totalorder %v736_v51, %v5337_v34 }
 0x154   : > { %vm3953_vm9 = vmpackc.low %vm800_vm3, %vm796_vm2  ;;  %vm806_vm3 = vcmp.eq.s32.totalorder %v737_v52, %v5343_v38 }
 0x160   : > { %3920 = vmatmul.msk.bf16.gmra.mxu0 %vm3919_vm10, %v4850_v43  ;;  %vm3985_vm10 = vmpackc.low %vm801_vm5, %vm797_vm4  ;;  %vm810_vm4 = vcmp.eq.s32.totalorder %v738_v53, %v5343_v38 }
 0x161   : > { %3952 = vmatmul.msk.bf16.gmra.mxu1 %vm3951_vm13, %v4850_v43  ;;  %vm807_vm13 = vcmp.eq.s32.totalorder %v738_v53, %v5333_v31  ;;  %vm4019_vm7 = vmpackc.low %vm810_vm4, %vm806_vm3  ;;  %vm819_vm4 = vcmp.eq.s32.totalorder %v741_v56, %v5333_v31 }
 0x162   : > { %3984 = vmatmul.msk.bf16.gmra.mxu2 %vm3983_vm14, %v4850_v43  ;;  %vm804_vm14 = vcmp.eq.s32.totalorder %v737_v52, %v5337_v34  ;;  %vm3923_vm2 = vmpackc.low %vm807_vm13, %vm803_vm12  ;;  %vm813_vm12 = vcmp.eq.s32.totalorder %v739_v54, %v5341_v37  ;;  %vm817_vm13 = vcmp.eq.s32.totalorder %v740_v55, %v5341_v37  ;;  %v1215_v52 = vld [vmem:[#allocation2 + $0x50] sm:$0xff] }
 0x163   : > { %4016 = vmatmul.msk.bf16.gmra.mxu3 %vm4015_vm15, %v4850_v43  ;;  %vm808_vm15 = vcmp.eq.s32.totalorder %v738_v53, %v5337_v34 }
 0x164   : > { %vm3955_vm5 = vmpackc.low %vm808_vm15, %vm804_vm14  ;;  %vm814_vm15 = vcmp.eq.s32.totalorder %v739_v54, %v5343_v38 }
 0x170   : > { %3922 = vmatmul.msk.bf16.gmra.mxu0 %vm3921_vm6, %v4850_v43  ;;  %vm3987_vm6 = vmpackc.low %vm809_vm1, %vm805_vm0  ;;  %vm818_vm0 = vcmp.eq.s32.totalorder %v740_v55, %v5343_v38 }
 0x171   : > { %3954 = vmatmul.msk.bf16.gmra.mxu1 %vm3953_vm9, %v4850_v43  ;;  %vm815_vm9 = vcmp.eq.s32.totalorder %v740_v55, %v5333_v31  ;;  %vm4021_vm3 = vmpackc.low %vm818_vm0, %vm814_vm15  ;;  %vm827_vm0 = vcmp.eq.s32.totalorder %v743_v58, %v5333_v31 }
 0x172   : > { %3986 = vmatmul.msk.bf16.gmra.mxu2 %vm3985_vm10, %v4850_v43  ;;  %vm812_vm10 = vcmp.eq.s32.totalorder %v739_v54, %v5337_v34  ;;  %vm3925_vm14 = vmpackc.low %vm815_vm9, %vm811_vm8  ;;  %vm821_vm8 = vcmp.eq.s32.totalorder %v741_v56, %v5341_v37  ;;  %vm825_vm9 = vcmp.eq.s32.totalorder %v742_v57, %v5341_v37 }
 0x173   : > { %4018 = vmatmul.msk.bf16.gmra.mxu3 %vm4017_vm11, %v4850_v43  ;;  %vm816_vm11 = vcmp.eq.s32.totalorder %v740_v55, %v5337_v34 }
 0x174   : > { %vm3957_vm1 = vmpackc.low %vm816_vm11, %vm812_vm10  ;;  %vm822_vm11 = vcmp.eq.s32.totalorder %v741_v56, %v5343_v38 }
 0x180   : > { %3924 = vmatmul.msk.bf16.gmra.mxu0 %vm3923_vm2, %v4850_v43  ;;  %vm3989_vm2 = vmpackc.low %vm817_vm13, %vm813_vm12  ;;  %vm826_vm12 = vcmp.eq.s32.totalorder %v742_v57, %v5343_v38 }
 0x181   : > { %3956 = vmatmul.msk.bf16.gmra.mxu1 %vm3955_vm5, %v4850_v43  ;;  %vm823_vm5 = vcmp.eq.s32.totalorder %v742_v57, %v5333_v31  ;;  %vm4023_vm15 = vmpackc.low %vm826_vm12, %vm822_vm11  ;;  %vm835_vm12 = vcmp.eq.s32.totalorder %v745_v1, %v5333_v31 }
 0x182   : > { %3988 = vmatmul.msk.bf16.gmra.mxu2 %vm3987_vm6, %v4850_v43  ;;  %vm820_vm6 = vcmp.eq.s32.totalorder %v741_v56, %v5337_v34  ;;  %vm3927_vm10 = vmpackc.low %vm823_vm5, %vm819_vm4  ;;  %vm829_vm4 = vcmp.eq.s32.totalorder %v743_v58, %v5341_v37  ;;  %vm833_vm5 = vcmp.eq.s32.totalorder %v744_v59, %v5341_v37 }
 0x183   : > { %4020 = vmatmul.msk.bf16.gmra.mxu3 %vm4019_vm7, %v4850_v43  ;;  %vm824_vm7 = vcmp.eq.s32.totalorder %v742_v57, %v5337_v34 }
 0x184   : > { %vm3959_vm13 = vmpackc.low %vm824_vm7, %vm820_vm6  ;;  %vm830_vm7 = vcmp.eq.s32.totalorder %v743_v58, %v5343_v38 }
 0x190   : > { %3926 = vmatmul.msk.bf16.gmra.mxu0 %vm3925_vm14, %v4850_v43  ;;  %vm3991_vm14 = vmpackc.low %vm825_vm9, %vm821_vm8  ;;  %vm834_vm8 = vcmp.eq.s32.totalorder %v744_v59, %v5343_v38 }
 0x191   : > { %3958 = vmatmul.msk.bf16.gmra.mxu1 %vm3957_vm1, %v4850_v43  ;;  %vm831_vm1 = vcmp.eq.s32.totalorder %v744_v59, %v5333_v31  ;;  %vm4025_vm11 = vmpackc.low %vm834_vm8, %vm830_vm7  ;;  %vm843_vm8 = vcmp.eq.s32.totalorder %v747_v21, %v5333_v31 }
 0x192   : > { %3990 = vmatmul.msk.bf16.gmra.mxu2 %vm3989_vm2, %v4850_v43  ;;  %vm828_vm2 = vcmp.eq.s32.totalorder %v743_v58, %v5337_v34  ;;  %vm3929_vm6 = vmpackc.low %vm831_vm1, %vm827_vm0  ;;  %vm837_vm0 = vcmp.eq.s32.totalorder %v745_v1, %v5341_v37  ;;  %vm841_vm1 = vcmp.eq.s32.totalorder %v746_v2, %v5341_v37 }
 0x193   : > { %4022 = vmatmul.msk.bf16.gmra.mxu3 %vm4021_vm3, %v4850_v43  ;;  %vm832_vm3 = vcmp.eq.s32.totalorder %v744_v59, %v5337_v34 }
 0x194   : > { %vm3961_vm9 = vmpackc.low %vm832_vm3, %vm828_vm2  ;;  %vm838_vm3 = vcmp.eq.s32.totalorder %v745_v1, %v5343_v38 }
 0x1a0   : > { %3928 = vmatmul.msk.bf16.gmra.mxu0 %vm3927_vm10, %v4850_v43  ;;  %vm3993_vm10 = vmpackc.low %vm833_vm5, %vm829_vm4  ;;  %vm842_vm4 = vcmp.eq.s32.totalorder %v746_v2, %v5343_v38 }
 0x1a1   : > { %3960 = vmatmul.msk.bf16.gmra.mxu1 %vm3959_vm13, %v4850_v43  ;;  %vm839_vm13 = vcmp.eq.s32.totalorder %v746_v2, %v5333_v31  ;;  %vm4027_vm7 = vmpackc.low %vm842_vm4, %vm838_vm3  ;;  %vm851_vm4 = vcmp.eq.s32.totalorder %v749_v47, %v5333_v31 }
 0x1a2   : > { %3992 = vmatmul.msk.bf16.gmra.mxu2 %vm3991_vm14, %v4850_v43  ;;  %vm836_vm14 = vcmp.eq.s32.totalorder %v745_v1, %v5337_v34  ;;  %vm3931_vm2 = vmpackc.low %vm839_vm13, %vm835_vm12  ;;  %vm845_vm12 = vcmp.eq.s32.totalorder %v747_v21, %v5341_v37  ;;  %vm849_vm13 = vcmp.eq.s32.totalorder %v748_v22, %v5341_v37 }
 0x1a3   : > { %4024 = vmatmul.msk.bf16.gmra.mxu3 %vm4023_vm15, %v4850_v43  ;;  %vm840_vm15 = vcmp.eq.s32.totalorder %v746_v2, %v5337_v34 }
 0x1a4   : > { %vm3963_vm5 = vmpackc.low %vm840_vm15, %vm836_vm14  ;;  %vm846_vm15 = vcmp.eq.s32.totalorder %v747_v21, %v5343_v38 }
 0x1ad   : > { %v1508_v60 = vpop.f32.mrf.mxu0 }
 0x1ae   : > { %v1597_v61 = vpop.f32.mrf.mxu1 }
 0x1af   : > { %v1598_v62 = vadd.f32 %v1597_v61, %v1508_v60  ;;  %v1216_v61 = vld [vmem:[#allocation2 + $0x68] sm:$0xff] }
 0x1b0   : > { %3930 = vmatmul.msk.bf16.gmra.mxu0 %vm3929_vm6, %v4850_v43  ;;  %vm3995_vm6 = vmpackc.low %vm841_vm1, %vm837_vm0  ;;  %vm850_vm0 = vcmp.eq.s32.totalorder %v748_v22, %v5343_v38 }
 0x1b1   : > { %3962 = vmatmul.msk.bf16.gmra.mxu1 %vm3961_vm9, %v4850_v43  ;;  %vm847_vm9 = vcmp.eq.s32.totalorder %v748_v22, %v5333_v31  ;;  %vm4029_vm3 = vmpackc.low %vm850_vm0, %vm846_vm15 }
 0x1b2   : > { %3994 = vmatmul.msk.bf16.gmra.mxu2 %vm3993_vm10, %v4850_v43  ;;  %vm844_vm10 = vcmp.eq.s32.totalorder %v747_v21, %v5337_v34  ;;  %vm3933_vm14 = vmpackc.low %vm847_vm9, %vm843_vm8  ;;  %vm853_vm8 = vcmp.eq.s32.totalorder %v749_v47, %v5341_v37  ;;  %vm857_vm9 = vcmp.eq.s32.totalorder %v750_v48, %v5341_v37 }
 0x1b3   : > { %4026 = vmatmul.msk.bf16.gmra.mxu3 %vm4025_vm11, %v4850_v43  ;;  %vm848_vm11 = vcmp.eq.s32.totalorder %v748_v22, %v5337_v34 }
 0x1b4   : > { %vm3965_vm1 = vmpackc.low %vm848_vm11, %vm844_vm10  ;;  %vm854_vm11 = vcmp.eq.s32.totalorder %v749_v47, %v5343_v38 }
 0x1b5   : > { %v1686_v63 = vpop.f32.mrf.mxu2  ;;  %v1510_v4 = vpop.f32.mrf.mxu0 }
 0x1b6   : > { %v1775_v0 = vpop.f32.mrf.mxu3  ;;  %v1687_v3 = vadd.f32 %v1686_v63, %v1598_v62  ;;  %v1599_v5 = vpop.f32.mrf.mxu1 }
 0x1b7   : > { %v1600_v9 = vadd.f32 %v1599_v5, %v1510_v4  ;;  %v752_v4 = vadd.s32 200, %v5326_v25 }
 0x1b8   : > { %v1776_v7 = vadd.f32 %v1775_v0, %v1687_v3  ;;  %v751_v3 = vadd.s32 192, %v5326_v25 }
 0x1ba   : > { %v1855_v8 = vadd.f32 %v1776_v7, %v1211_v6  ;;  %vm859_vm0 = vcmp.eq.s32.totalorder %v751_v3, %v5333_v31 }
 0x1bc   : > { %1887 = vst [vmem:[#allocation2 + $0xb0] sm:$0xff] %v1855_v8  ;;  %v1217_v8 = vld [vmem:[#allocation2 + $0x30] sm:$0xff] }
 0x1bd   : > { %v1688_v10 = vpop.f32.mrf.mxu2  ;;  %v1513_v13 = vpop.f32.mrf.mxu0 }
 0x1be   : > { %v1777_v11 = vpop.f32.mrf.mxu3  ;;  %v1689_v12 = vadd.f32 %v1688_v10, %v1600_v9  ;;  %v1602_v14 = vpop.f32.mrf.mxu1 }
 0x1bf   : > { %v1603_v18 = vadd.f32 %v1602_v14, %v1513_v13 }
 0x1c0   : > { %v1778_v16 = vadd.f32 %v1777_v11, %v1689_v12  ;;  %3932 = vmatmul.msk.bf16.gmra.mxu0 %vm3931_vm2, %v4850_v43  ;;  %vm3997_vm2 = vmpackc.low %vm849_vm13, %vm845_vm12  ;;  %vm858_vm12 = vcmp.eq.s32.totalorder %v750_v48, %v5343_v38 }
 0x1c1   : > { %3964 = vmatmul.msk.bf16.gmra.mxu1 %vm3963_vm5, %v4850_v43  ;;  %vm855_vm5 = vcmp.eq.s32.totalorder %v750_v48, %v5333_v31  ;;  %vm4031_vm15 = vmpackc.low %vm858_vm12, %vm854_vm11 }
 0x1c2   : > { %v1856_v17 = vadd.f32 %v1778_v16, %v1212_v15  ;;  %3996 = vmatmul.msk.bf16.gmra.mxu2 %vm3995_vm6, %v4850_v43  ;;  %vm852_vm6 = vcmp.eq.s32.totalorder %v749_v47, %v5337_v34  ;;  %vm3935_vm10 = vmpackc.low %vm855_vm5, %vm851_vm4  ;;  %vm861_vm4 = vcmp.eq.s32.totalorder %v751_v3, %v5341_v37  ;;  %vm865_vm5 = vcmp.eq.s32.totalorder %v752_v4, %v5341_v37 }
 0x1c3   : > { %4028 = vmatmul.msk.bf16.gmra.mxu3 %vm4027_vm7, %v4850_v43  ;;  %vm856_vm7 = vcmp.eq.s32.totalorder %v750_v48, %v5337_v34 }
 0x1c4   : > { %1888 = vst [vmem:[#allocation2] sm:$0xff] %v1856_v17  ;;  %vm3967_vm13 = vmpackc.low %vm856_vm7, %vm852_vm6  ;;  %vm862_vm7 = vcmp.eq.s32.totalorder %v751_v3, %v5343_v38  ;;  %v1218_v17 = vld [vmem:[#allocation2 + $0x48] sm:$0xff] }
 0x1c5   : > { %v1691_v19 = vpop.f32.mrf.mxu2  ;;  %v1515_v24 = vpop.f32.mrf.mxu0 }
 0x1c6   : > { %v1780_v20 = vpop.f32.mrf.mxu3  ;;  %v1692_v23 = vadd.f32 %v1691_v19, %v1603_v18  ;;  %v1604_v26 = vpop.f32.mrf.mxu1 }
 0x1c7   : > { %v1605_v30 = vadd.f32 %v1604_v26, %v1515_v24  ;;  %v754_v24 = vadd.s32 216, %v5326_v25 }
 0x1c8   : > { %v1781_v28 = vadd.f32 %v1780_v20, %v1692_v23  ;;  %v753_v23 = vadd.s32 208, %v5326_v25 }
 0x1ca   : > { %v1857_v29 = vadd.f32 %v1781_v28, %v1213_v27  ;;  %vm867_vm12 = vcmp.eq.s32.totalorder %v753_v23, %v5333_v31 }
 0x1cc   : > { %1889 = vst [vmem:[#allocation2 + $0xd8] sm:$0xff] %v1857_v29  ;;  %v1219_v29 = vld [vmem:[#allocation2 + $0x80] sm:$0xff] }
 0x1cd   : > { %v1693_v32 = vpop.f32.mrf.mxu2  ;;  %v1518_v36 = vpop.f32.mrf.mxu0 }
 0x1ce   : > { %v1782_v33 = vpop.f32.mrf.mxu3  ;;  %v1694_v35 = vadd.f32 %v1693_v32, %v1605_v30  ;;  %v1607_v39 = vpop.f32.mrf.mxu1 }
 0x1cf   : > { %v1608_v44 = vadd.f32 %v1607_v39, %v1518_v36 }
 0x1d0   : > { %v1783_v41 = vadd.f32 %v1782_v33, %v1694_v35  ;;  %3934 = vmatmul.msk.bf16.gmra.mxu0 %vm3933_vm14, %v4850_v43  ;;  %vm3999_vm14 = vmpackc.low %vm857_vm9, %vm853_vm8  ;;  %vm866_vm8 = vcmp.eq.s32.totalorder %v752_v4, %v5343_v38 }
 0x1d1   : > { %3966 = vmatmul.msk.bf16.gmra.mxu1 %vm3965_vm1, %v4850_v43  ;;  %vm863_vm1 = vcmp.eq.s32.totalorder %v752_v4, %v5333_v31  ;;  %vm4033_vm11 = vmpackc.low %vm866_vm8, %vm862_vm7 }
 0x1d2   : > { %v1858_v42 = vadd.f32 %v1783_v41, %v1214_v40  ;;  %3998 = vmatmul.msk.bf16.gmra.mxu2 %vm3997_vm2, %v4850_v43  ;;  %vm860_vm2 = vcmp.eq.s32.totalorder %v751_v3, %v5337_v34  ;;  %vm3937_vm6 = vmpackc.low %vm863_vm1, %vm859_vm0  ;;  %vm869_vm0 = vcmp.eq.s32.totalorder %v753_v23, %v5341_v37  ;;  %vm873_vm1 = vcmp.eq.s32.totalorder %v754_v24, %v5341_v37 }
 0x1d3   : > { %4030 = vmatmul.msk.bf16.gmra.mxu3 %vm4029_vm3, %v4850_v43  ;;  %vm864_vm3 = vcmp.eq.s32.totalorder %v752_v4, %v5337_v34 }
 0x1d4   : > { %1890 = vst [vmem:[#allocation2 + $0x18] sm:$0xff] %v1858_v42  ;;  %vm3969_vm9 = vmpackc.low %vm864_vm3, %vm860_vm2  ;;  %vm870_vm3 = vcmp.eq.s32.totalorder %v753_v23, %v5343_v38  ;;  %v1220_v42 = vld [vmem:[#allocation2 + $0x88] sm:$0xff] }
 0x1d5   : > { %v1696_v45 = vpop.f32.mrf.mxu2  ;;  %v1520_v50 = vpop.f32.mrf.mxu0 }
 0x1d6   : > { %v1785_v46 = vpop.f32.mrf.mxu3  ;;  %v1697_v49 = vadd.f32 %v1696_v45, %v1608_v44  ;;  %v1609_v51 = vpop.f32.mrf.mxu1 }
 0x1d7   : > { %v1610_v55 = vadd.f32 %v1609_v51, %v1520_v50  ;;  %v756_v50 = vadd.s32 232, %v5326_v25 }
 0x1d8   : > { %v1786_v53 = vadd.f32 %v1785_v46, %v1697_v49  ;;  %v755_v49 = vadd.s32 224, %v5326_v25 }
 0x1da   : > { %v1859_v54 = vadd.f32 %v1786_v53, %v1215_v52  ;;  %vm875_vm8 = vcmp.eq.s32.totalorder %v755_v49, %v5333_v31 }
 0x1dc   : > { %1891 = vst [vmem:[#allocation2 + $0x50] sm:$0xff] %v1859_v54  ;;  %v1221_v54 = vld [vmem:[#allocation2 + $0xe8] sm:$0xff] }
 0x1dd   : > { %v1698_v56 = vpop.f32.mrf.mxu2  ;;  %v1523_v59 = vpop.f32.mrf.mxu0 }
 0x1de   : > { %v1787_v57 = vpop.f32.mrf.mxu3  ;;  %v1699_v58 = vadd.f32 %v1698_v56, %v1610_v55  ;;  %v1612_v60 = vpop.f32.mrf.mxu1 }
 0x1df   : > { %v1613_v0 = vadd.f32 %v1612_v60, %v1523_v59 }
 0x1e0   : > { %v1788_v62 = vadd.f32 %v1787_v57, %v1699_v58  ;;  %3936 = vmatmul.msk.bf16.gmra.mxu0 %vm3935_vm10, %v4850_v43  ;;  %vm4001_vm10 = vmpackc.low %vm865_vm5, %vm861_vm4  ;;  %vm874_vm4 = vcmp.eq.s32.totalorder %v754_v24, %v5343_v38 }
 0x1e1   : > { %3968 = vmatmul.msk.bf16.gmra.mxu1 %vm3967_vm13, %v4850_v43  ;;  %vm871_vm13 = vcmp.eq.s32.totalorder %v754_v24, %v5333_v31  ;;  %vm4035_vm7 = vmpackc.low %vm874_vm4, %vm870_vm3 }
 0x1e2   : > { %v1860_v63 = vadd.f32 %v1788_v62, %v1216_v61  ;;  %4000 = vmatmul.msk.bf16.gmra.mxu2 %vm3999_vm14, %v4850_v43  ;;  %vm868_vm14 = vcmp.eq.s32.totalorder %v753_v23, %v5337_v34  ;;  %vm3939_vm2 = vmpackc.low %vm871_vm13, %vm867_vm12  ;;  %vm877_vm12 = vcmp.eq.s32.totalorder %v755_v49, %v5341_v37  ;;  %vm881_vm13 = vcmp.eq.s32.totalorder %v756_v50, %v5341_v37  ;;  %v1225_v23 = vld [vmem:[#allocation2 + $0x8] sm:$0xff] }
 0x1e3   : > { %4032 = vmatmul.msk.bf16.gmra.mxu3 %vm4031_vm15, %v4850_v43  ;;  %vm872_vm15 = vcmp.eq.s32.totalorder %v754_v24, %v5337_v34 }
 0x1e4   : > { %1892 = vst [vmem:[#allocation2 + $0x68] sm:$0xff] %v1860_v63  ;;  %vm3971_vm5 = vmpackc.low %vm872_vm15, %vm868_vm14  ;;  %vm878_vm15 = vcmp.eq.s32.totalorder %v755_v49, %v5343_v38  ;;  %v1222_v63 = vld [vmem:[#allocation2 + $0xb8] sm:$0xff] }
 0x1e5   : > { %v1701_v1 = vpop.f32.mrf.mxu2  ;;  %v1525_v6 = vpop.f32.mrf.mxu0 }
 0x1e6   : > { %v1790_v2 = vpop.f32.mrf.mxu3  ;;  %v1702_v5 = vadd.f32 %v1701_v1, %v1613_v0  ;;  %v1614_v7 = vpop.f32.mrf.mxu1 }
 0x1e7   : > { %v1615_v11 = vadd.f32 %v1614_v7, %v1525_v6  ;;  %v758_v6 = vadd.s32 248, %v5326_v25 }
 0x1e8   : > { %v1791_v9 = vadd.f32 %v1790_v2, %v1702_v5  ;;  %v757_v5 = vadd.s32 240, %v5326_v25 }
 0x1ea   : > { %v1861_v10 = vadd.f32 %v1791_v9, %v1217_v8  ;;  %vm883_vm4 = vcmp.eq.s32.totalorder %v757_v5, %v5333_v31 }
 0x1ec   : > { %1893 = vst [vmem:[#allocation2 + $0x30] sm:$0xff] %v1861_v10  ;;  %v1223_v10 = vld [vmem:[#allocation2 + $0x60] sm:$0xff] }
 0x1ed   : > { %v1703_v12 = vpop.f32.mrf.mxu2  ;;  %v1528_v15 = vpop.f32.mrf.mxu0 }
 0x1ee   : > { %v1792_v13 = vpop.f32.mrf.mxu3  ;;  %v1704_v14 = vadd.f32 %v1703_v12, %v1615_v11  ;;  %v1617_v16 = vpop.f32.mrf.mxu1 }
 0x1ef   : > { %v1618_v20 = vadd.f32 %v1617_v16, %v1528_v15 }
 0x1f0   : > { %v1793_v18 = vadd.f32 %v1792_v13, %v1704_v14  ;;  %3938 = vmatmul.msk.bf16.gmra.mxu0 %vm3937_vm6, %v4850_v43  ;;  %vm4003_vm6 = vmpackc.low %vm873_vm1, %vm869_vm0  ;;  %vm882_vm0 = vcmp.eq.s32.totalorder %v756_v50, %v5343_v38 }
 0x1f1   : > { %3970 = vmatmul.msk.bf16.gmra.mxu1 %vm3969_vm9, %v4850_v43  ;;  %vm879_vm9 = vcmp.eq.s32.totalorder %v756_v50, %v5333_v31  ;;  %vm4037_vm3 = vmpackc.low %vm882_vm0, %vm878_vm15 }
 0x1f2   : > { %v1862_v19 = vadd.f32 %v1793_v18, %v1218_v17  ;;  %4002 = vmatmul.msk.bf16.gmra.mxu2 %vm4001_vm10, %v4850_v43  ;;  %vm876_vm10 = vcmp.eq.s32.totalorder %v755_v49, %v5337_v34  ;;  %vm3941_vm14 = vmpackc.low %vm879_vm9, %vm875_vm8  ;;  %vm885_vm8 = vcmp.eq.s32.totalorder %v757_v5, %v5341_v37  ;;  %vm889_vm9 = vcmp.eq.s32.totalorder %v758_v6, %v5341_v37  ;;  %v1224_v17 = vld [vmem:[#allocation2 + $0xf0] sm:$0xff] }
 0x1f3   : > { %4034 = vmatmul.msk.bf16.gmra.mxu3 %vm4033_vm11, %v4850_v43  ;;  %vm880_vm11 = vcmp.eq.s32.totalorder %v756_v50, %v5337_v34 }
 0x1f4   : > { %1894 = vst [vmem:[#allocation2 + $0x48] sm:$0xff] %v1862_v19  ;;  %vm3973_vm1 = vmpackc.low %vm880_vm11, %vm876_vm10  ;;  %vm886_vm11 = vcmp.eq.s32.totalorder %v757_v5, %v5343_v38 }
 0x1f5   : > { %v1706_v21 = vpop.f32.mrf.mxu2  ;;  %v1530_v27 = vpop.f32.mrf.mxu0 }
 0x1f6   : > { %v1795_v22 = vpop.f32.mrf.mxu3  ;;  %v1707_v26 = vadd.f32 %v1706_v21, %v1618_v20  ;;  %v1619_v28 = vpop.f32.mrf.mxu1 }
 0x1f7   : > { %v1620_v33 = vadd.f32 %v1619_v28, %v1530_v27 }
 0x1f8   : > { %v1796_v30 = vadd.f32 %v1795_v22, %v1707_v26 }
 0x1fa   : > { %v1863_v32 = vadd.f32 %v1796_v30, %v1219_v29 }
 0x1fc   : > { %1895 = vst [vmem:[#allocation2 + $0x80] sm:$0xff] %v1863_v32 }
 0x1fd   : > { %v1708_v35 = vpop.f32.mrf.mxu2  ;;  %v1533_v40 = vpop.f32.mrf.mxu0 }
 0x1fe   : > { %v1797_v36 = vpop.f32.mrf.mxu3  ;;  %v1709_v39 = vadd.f32 %v1708_v35, %v1620_v33  ;;  %v1622_v41 = vpop.f32.mrf.mxu1  ;;  %v1226_v35 = vld [vmem:[#allocation2 + $0x78] sm:$0xff] }
 0x1ff   : > { %v1623_v46 = vadd.f32 %v1622_v41, %v1533_v40 }
 0x200   : > { %v1798_v44 = vadd.f32 %v1797_v36, %v1709_v39  ;;  %3940 = vmatmul.msk.bf16.gmra.mxu0 %vm3939_vm2, %v4850_v43  ;;  %vm4005_vm2 = vmpackc.low %vm881_vm13, %vm877_vm12  ;;  %vm890_vm12 = vcmp.eq.s32.totalorder %v758_v6, %v5343_v38 }
 0x201   : > { %3972 = vmatmul.msk.bf16.gmra.mxu1 %vm3971_vm5, %v4850_v43  ;;  %vm887_vm5 = vcmp.eq.s32.totalorder %v758_v6, %v5333_v31  ;;  %vm4039_vm15 = vmpackc.low %vm890_vm12, %vm886_vm11 }
 0x202   : > { %v1864_v45 = vadd.f32 %v1798_v44, %v1220_v42  ;;  %4004 = vmatmul.msk.bf16.gmra.mxu2 %vm4003_vm6, %v4850_v43  ;;  %vm884_vm6 = vcmp.eq.s32.totalorder %v757_v5, %v5337_v34  ;;  %vm3943_vm10 = vmpackc.low %vm887_vm5, %vm883_vm4 }
 0x203   : > { %4036 = vmatmul.msk.bf16.gmra.mxu3 %vm4035_vm7, %v4850_v43  ;;  %vm888_vm7 = vcmp.eq.s32.totalorder %v758_v6, %v5337_v34 }
 0x204   : > { %1896 = vst [vmem:[#allocation2 + $0x88] sm:$0xff] %v1864_v45  ;;  %vm3975_vm13 = vmpackc.low %vm888_vm7, %vm884_vm6 }
 0x205   : > { %v1711_v47 = vpop.f32.mrf.mxu2  ;;  %v1535_v52 = vpop.f32.mrf.mxu0 }
 0x206   : > { %v1800_v48 = vpop.f32.mrf.mxu3  ;;  %v1712_v51 = vadd.f32 %v1711_v47, %v1623_v46  ;;  %v1624_v53 = vpop.f32.mrf.mxu1  ;;  %v1227_v46 = vld [vmem:[#allocation2 + $0x38] sm:$0xff] }
 0x207   : > { %v1625_v57 = vadd.f32 %v1624_v53, %v1535_v52 }
 0x208   : > { %v1801_v55 = vadd.f32 %v1800_v48, %v1712_v51 }
 0x20a   : > { %v1865_v56 = vadd.f32 %v1801_v55, %v1221_v54  ;;  %v1228_v55 = vld [vmem:[#allocation2 + $0x58] sm:$0xff] }
 0x20c   : > { %1897 = vst [vmem:[#allocation2 + $0xe8] sm:$0xff] %v1865_v56 }
 0x20d   : > { %v1713_v58 = vpop.f32.mrf.mxu2  ;;  %v1538_v61 = vpop.f32.mrf.mxu0 }
 0x20e   : > { %v1802_v59 = vpop.f32.mrf.mxu3  ;;  %v1714_v60 = vadd.f32 %v1713_v58, %v1625_v57  ;;  %v1627_v62 = vpop.f32.mrf.mxu1 }
 0x20f   : > { %v1628_v2 = vadd.f32 %v1627_v62, %v1538_v61 }
 0x210   : > { %v1803_v0 = vadd.f32 %v1802_v59, %v1714_v60  ;;  %3942 = vmatmul.msk.bf16.gmra.mxu0 %vm3941_vm14, %v4850_v43  ;;  %vm4007_vm14 = vmpackc.low %vm889_vm9, %vm885_vm8 }
 0x211   : > { %3974 = vmatmul.msk.bf16.gmra.mxu1 %vm3973_vm1, %v4850_v43 }
 0x212   : > { %v1866_v1 = vadd.f32 %v1803_v0, %v1222_v63  ;;  %4006 = vmatmul.msk.bf16.gmra.mxu2 %vm4005_vm2, %v4850_v43  ;;  %v1229_v0 = vld [vmem:[#allocation2 + $0x40] sm:$0xff] }
 0x213   : > { %4038 = vmatmul.msk.bf16.gmra.mxu3 %vm4037_vm3, %v4850_v43 }
 0x214   : > { %1898 = vst [vmem:[#allocation2 + $0xb8] sm:$0xff] %v1866_v1 }
 0x215   : > { %v1716_v3 = vpop.f32.mrf.mxu2  ;;  %v1540_v8 = vpop.f32.mrf.mxu0 }
 0x216   : > { %v1805_v4 = vpop.f32.mrf.mxu3  ;;  %v1717_v7 = vadd.f32 %v1716_v3, %v1628_v2  ;;  %v1629_v9 = vpop.f32.mrf.mxu1 }
 0x217   : > { %v1630_v25 = vadd.f32 %v1629_v9, %v1540_v8  ;;  %v1230_v9 = vld [vmem:[#allocation2 + $0xc8] sm:$0xff] }
 0x218   : > { %v1806_v11 = vadd.f32 %v1805_v4, %v1717_v7 }
 0x21a   : > { %v1867_v12 = vadd.f32 %v1806_v11, %v1223_v10 }
 0x21c   : > { %1899 = vst [vmem:[#allocation2 + $0x60] sm:$0xff] %v1867_v12 }
 0x21d   : > { %v1718_v13 = vpop.f32.mrf.mxu2  ;;  %v1543_v15 = vpop.f32.mrf.mxu0 }
 0x21e   : > { %v1807_v14 = vpop.f32.mrf.mxu3  ;;  %v1719_v31 = vadd.f32 %v1718_v13, %v1630_v25  ;;  %v1632_v16 = vpop.f32.mrf.mxu1 }
 0x21f   : > { %v1633_v18 = vadd.f32 %v1632_v16, %v1543_v15  ;;  %v1231_v16 = vld [vmem:[#allocation2 + $0xe0] sm:$0xff] }
 0x220   : > { %v1808_v34 = vadd.f32 %v1807_v14, %v1719_v31  ;;  %3944 = vmatmul.msk.bf16.gmra.mxu0 %vm3943_vm10, %v4850_v43 }
 0x221   : > { %3976 = vmatmul.msk.bf16.gmra.mxu1 %vm3975_vm13, %v4850_v43 }
 0x222   : > { %v1868_v37 = vadd.f32 %v1808_v34, %v1224_v17  ;;  %4008 = vmatmul.msk.bf16.gmra.mxu2 %vm4007_vm14, %v4850_v43 }
 0x223   : > { %4040 = vmatmul.msk.bf16.gmra.mxu3 %vm4039_vm15, %v4850_v43 }
 0x224   : > { %1900 = vst [vmem:[#allocation2 + $0xf0] sm:$0xff] %v1868_v37 }
 0x225   : > { %v1721_v38 = vpop.f32.mrf.mxu2  ;;  %v1545_v21 = vpop.f32.mrf.mxu0 }
 0x226   : > { %v1810_v19 = vpop.f32.mrf.mxu3  ;;  %v1722_v20 = vadd.f32 %v1721_v38, %v1633_v18  ;;  %v1634_v22 = vpop.f32.mrf.mxu1 }
 0x227   : > { %v1635_v27 = vadd.f32 %v1634_v22, %v1545_v21  ;;  %v1232_v22 = vld [vmem:[#allocation2 + $0x90] sm:$0xff] }
 0x228   : > { %v1811_v24 = vadd.f32 %v1810_v19, %v1722_v20 }
 0x22a   : > { %v1869_v26 = vadd.f32 %v1811_v24, %v1225_v23 }
 0x22c   : > { %1901 = vst [vmem:[#allocation2 + $0x8] sm:$0xff] %v1869_v26 }
 0x22d   : > { %v1723_v28 = vpop.f32.mrf.mxu2  ;;  %v1548_v32 = vpop.f32.mrf.mxu0 }
 0x22e   : > { %v1812_v29 = vpop.f32.mrf.mxu3  ;;  %v1724_v30 = vadd.f32 %v1723_v28, %v1635_v27  ;;  %v1637_v33 = vpop.f32.mrf.mxu1 }
 0x22f   : > { %v1638_v43 = vadd.f32 %v1637_v33, %v1548_v32  ;;  %v1233_v33 = vld [vmem:[#allocation2 + $0x70] sm:$0xff] }
 0x230   : > { %v1813_v36 = vadd.f32 %v1812_v29, %v1724_v30 }
 0x232   : > { %v1870_v39 = vadd.f32 %v1813_v36, %v1226_v35 }
 0x234   : > { %1902 = vst [vmem:[#allocation2 + $0x78] sm:$0xff] %v1870_v39 }
 0x235   : > { %v1726_v40 = vpop.f32.mrf.mxu2  ;;  %v1550_v44 = vpop.f32.mrf.mxu0 }
 0x236   : > { %v1815_v41 = vpop.f32.mrf.mxu3  ;;  %v1727_v42 = vadd.f32 %v1726_v40, %v1638_v43  ;;  %v1639_v45 = vpop.f32.mrf.mxu1 }
 0x237   : > { %v1640_v49 = vadd.f32 %v1639_v45, %v1550_v44  ;;  %v1234_v45 = vld [vmem:[#allocation2 + $0xc0] sm:$0xff] }
 0x238   : > { %v1816_v47 = vadd.f32 %v1815_v41, %v1727_v42 }
 0x23a   : > { %v1871_v48 = vadd.f32 %v1816_v47, %v1227_v46 }
 0x23c   : > { %1903 = vst [vmem:[#allocation2 + $0x38] sm:$0xff] %v1871_v48 }
 0x23d   : > { %v1728_v50 = vpop.f32.mrf.mxu2  ;;  %v1553_v53 = vpop.f32.mrf.mxu0 }
 0x23e   : > { %v1817_v51 = vpop.f32.mrf.mxu3  ;;  %v1729_v52 = vadd.f32 %v1728_v50, %v1640_v49  ;;  %v1642_v54 = vpop.f32.mrf.mxu1 }
 0x23f   : > { %v1643_v58 = vadd.f32 %v1642_v54, %v1553_v53  ;;  %v1235_v54 = vld [vmem:[#allocation2 + $0xa8] sm:$0xff] }
 0x240   : > { %v1818_v56 = vadd.f32 %v1817_v51, %v1729_v52 }
 0x242   : > { %v1872_v57 = vadd.f32 %v1818_v56, %v1228_v55 }
 0x244   : > { %1904 = vst [vmem:[#allocation2 + $0x58] sm:$0xff] %v1872_v57 }
 0x245   : > { %v1731_v59 = vpop.f32.mrf.mxu2  ;;  %v1555_v62 = vpop.f32.mrf.mxu0 }
 0x246   : > { %v1820_v60 = vpop.f32.mrf.mxu3  ;;  %v1732_v61 = vadd.f32 %v1731_v59, %v1643_v58  ;;  %v1644_v63 = vpop.f32.mrf.mxu1 }
 0x247   : > { %v1645_v3 = vadd.f32 %v1644_v63, %v1555_v62  ;;  %v1236_v63 = vld [vmem:[#allocation2 + $0xd0] sm:$0xff] }
 0x248   : > { %v1821_v1 = vadd.f32 %v1820_v60, %v1732_v61 }
 0x24a   : > { %v1873_v2 = vadd.f32 %v1821_v1, %v1229_v0 }
 0x24c   : > { %1905 = vst [vmem:[#allocation2 + $0x40] sm:$0xff] %v1873_v2 }
 0x24d   : > { %v1733_v4 = vpop.f32.mrf.mxu2  ;;  %v1558_v7 = vpop.f32.mrf.mxu0 }
 0x24e   : > { %v1822_v5 = vpop.f32.mrf.mxu3  ;;  %v1734_v6 = vadd.f32 %v1733_v4, %v1645_v3  ;;  %v1647_v8 = vpop.f32.mrf.mxu1 }
 0x24f   : > { %v1648_v12 = vadd.f32 %v1647_v8, %v1558_v7  ;;  %v1237_v8 = vld [vmem:[#allocation2 + $0x10] sm:$0xff] }
 0x250   : > { %v1823_v10 = vadd.f32 %v1822_v5, %v1734_v6 }
 0x252   : > { %v1874_v11 = vadd.f32 %v1823_v10, %v1230_v9 }
 0x254   : > { %1906 = vst [vmem:[#allocation2 + $0xc8] sm:$0xff] %v1874_v11 }
 0x255   : > { %v1736_v25 = vpop.f32.mrf.mxu2  ;;  %v1560_v31 = vpop.f32.mrf.mxu0 }
 0x256   : > { %v1825_v13 = vpop.f32.mrf.mxu3  ;;  %v1737_v14 = vadd.f32 %v1736_v25, %v1648_v12  ;;  %v1649_v15 = vpop.f32.mrf.mxu1 }
 0x257   : > { %v1650_v37 = vadd.f32 %v1649_v15, %v1560_v31  ;;  %v1238_v15 = vld [vmem:[#allocation2 + $0x28] sm:$0xff] }
 0x258   : > { %v1826_v17 = vadd.f32 %v1825_v13, %v1737_v14 }
 0x25a   : > { %v1875_v34 = vadd.f32 %v1826_v17, %v1231_v16 }
 0x25c   : > { %1907 = vst [vmem:[#allocation2 + $0xe0] sm:$0xff] %v1875_v34 }
 0x25d   : > { %v1738_v18 = vpop.f32.mrf.mxu2  ;;  %v1563_v20 = vpop.f32.mrf.mxu0 }
 0x25e   : > { %v1827_v38 = vpop.f32.mrf.mxu3  ;;  %v1739_v19 = vadd.f32 %v1738_v18, %v1650_v37  ;;  %v1652_v21 = vpop.f32.mrf.mxu1 }
 0x25f   : > { %v1653_v26 = vadd.f32 %v1652_v21, %v1563_v20  ;;  %v1239_v21 = vld [vmem:[#allocation2 + $0xa0] sm:$0xff] }
 0x260   : > { %v1828_v23 = vadd.f32 %v1827_v38, %v1739_v19 }
 0x262   : > { %v1876_v24 = vadd.f32 %v1828_v23, %v1232_v22 }
 0x264   : > { %1908 = vst [vmem:[#allocation2 + $0x90] sm:$0xff] %v1876_v24 }
 0x265   : > { %v1741_v27 = vpop.f32.mrf.mxu2  ;;  %v1565_v30 = vpop.f32.mrf.mxu0 }
 0x266   : > { %v1830_v28 = vpop.f32.mrf.mxu3  ;;  %v1742_v29 = vadd.f32 %v1741_v27, %v1653_v26  ;;  %v1654_v32 = vpop.f32.mrf.mxu1 }
 0x267   : > { %v1655_v39 = vadd.f32 %v1654_v32, %v1565_v30 }
 0x268   : > { %v1831_v35 = vadd.f32 %v1830_v28, %v1742_v29  ;;  %v1240_v29 = vld [vmem:[#allocation2 + $0xf8] sm:$0xff] }
 0x26a   : > { %v1877_v36 = vadd.f32 %v1831_v35, %v1233_v33 }
 0x26c   : > { %1909 = vst [vmem:[#allocation2 + $0x70] sm:$0xff] %v1877_v36 }
 0x26d   : > { %v1743_v43 = vpop.f32.mrf.mxu2  ;;  %v1568_v42 = vpop.f32.mrf.mxu0 }
 0x26e   : > { %v1832_v40 = vpop.f32.mrf.mxu3  ;;  %v1744_v41 = vadd.f32 %v1743_v43, %v1655_v39  ;;  %v1657_v44 = vpop.f32.mrf.mxu1 }
 0x26f   : > { %v1658_v48 = vadd.f32 %v1657_v44, %v1568_v42 }
 0x270   : > { %v1833_v46 = vadd.f32 %v1832_v40, %v1744_v41  ;;  %v1241_v41 = vld [vmem:[#allocation2 + $0x20] sm:$0xff] }
 0x272   : > { %v1878_v47 = vadd.f32 %v1833_v46, %v1234_v45 }
 0x274   : > { %1910 = vst [vmem:[#allocation2 + $0xc0] sm:$0xff] %v1878_v47 }
 0x275   : > { %v1746_v49 = vpop.f32.mrf.mxu2  ;;  %v1570_v52 = vpop.f32.mrf.mxu0 }
 0x276   : > { %v1835_v50 = vpop.f32.mrf.mxu3  ;;  %v1747_v51 = vadd.f32 %v1746_v49, %v1658_v48  ;;  %v1659_v53 = vpop.f32.mrf.mxu1 }
 0x277   : > { %v1660_v57 = vadd.f32 %v1659_v53, %v1570_v52 }
 0x278   : > { %v1836_v55 = vadd.f32 %v1835_v50, %v1747_v51  ;;  %v1242_v50 = vld [vmem:[#allocation2 + $0x98] sm:$0xff] }
 0x27a   : > { %v1879_v56 = vadd.f32 %v1836_v55, %v1235_v54 }
 0x27c   : > { %1911 = vst [vmem:[#allocation2 + $0xa8] sm:$0xff] %v1879_v56 }
 0x27d   : > { %v1748_v58 = vpop.f32.mrf.mxu2  ;;  %v1573_v61 = vpop.f32.mrf.mxu0 }
 0x27e   : > { %v1837_v59 = vpop.f32.mrf.mxu3  ;;  %v1749_v60 = vadd.f32 %v1748_v58, %v1660_v57  ;;  %v1662_v62 = vpop.f32.mrf.mxu1 }
 0x27f   : > { %v1663_v2 = vadd.f32 %v1662_v62, %v1573_v61 }
 0x280   : > { %v1838_v0 = vadd.f32 %v1837_v59, %v1749_v60 }
 0x282   : > { %v1880_v1 = vadd.f32 %v1838_v0, %v1236_v63 }
 0x284   : > { %1912 = vst [vmem:[#allocation2 + $0xd0] sm:$0xff] %v1880_v1 }
 0x285   : > { %v1751_v3 = vpop.f32.mrf.mxu2  ;;  %v1575_v6 = vpop.f32.mrf.mxu0 }
 0x286   : > { %v1840_v4 = vpop.f32.mrf.mxu3  ;;  %v1752_v5 = vadd.f32 %v1751_v3, %v1663_v2  ;;  %v1664_v7 = vpop.f32.mrf.mxu1 }
 0x287   : > { %v1665_v11 = vadd.f32 %v1664_v7, %v1575_v6 }
 0x288   : > { %v1841_v9 = vadd.f32 %v1840_v4, %v1752_v5 }
 0x28a   : > { %v1881_v10 = vadd.f32 %v1841_v9, %v1237_v8 }
 0x28c   : > { %1913 = vst [vmem:[#allocation2 + $0x10] sm:$0xff] %v1881_v10 }
 0x28d   : > { %v1753_v12 = vpop.f32.mrf.mxu2  ;;  %v1578_v14 = vpop.f32.mrf.mxu0 }
 0x28e   : > { %v1842_v25 = vpop.f32.mrf.mxu3  ;;  %v1754_v13 = vadd.f32 %v1753_v12, %v1665_v11  ;;  %v1667_v31 = vpop.f32.mrf.mxu1 }
 0x28f   : > { %v1668_v34 = vadd.f32 %v1667_v31, %v1578_v14 }
 0x290   : > { %v1843_v16 = vadd.f32 %v1842_v25, %v1754_v13 }
 0x292   : > { %v1882_v17 = vadd.f32 %v1843_v16, %v1238_v15 }
 0x294   : > { %1914 = vst [vmem:[#allocation2 + $0x28] sm:$0xff] %v1882_v17 }
 0x295   : > { %v1756_v37 = vpop.f32.mrf.mxu2  ;;  %v1580_v19 = vpop.f32.mrf.mxu0 }
 0x296   : > { %v1845_v18 = vpop.f32.mrf.mxu3  ;;  %v1757_v38 = vadd.f32 %v1756_v37, %v1668_v34  ;;  %v1669_v20 = vpop.f32.mrf.mxu1 }
 0x297   : > { %v1670_v24 = vadd.f32 %v1669_v20, %v1580_v19 }
 0x298   : > { %v1846_v22 = vadd.f32 %v1845_v18, %v1757_v38 }
 0x29a   : > { %v1883_v23 = vadd.f32 %v1846_v22, %v1239_v21 }
 0x29c   : > { %1915 = vst [vmem:[#allocation2 + $0xa0] sm:$0xff] %v1883_v23 }
 0x29d   : > { %v1758_v26 = vpop.f32.mrf.mxu2  ;;  %v1583_v30 = vpop.f32.mrf.mxu0 }
 0x29e   : > { %v1847_v27 = vpop.f32.mrf.mxu3  ;;  %v1759_v28 = vadd.f32 %v1758_v26, %v1670_v24  ;;  %v1672_v32 = vpop.f32.mrf.mxu1 }
 0x29f   : > { %v1673_v36 = vadd.f32 %v1672_v32, %v1583_v30 }
 0x2a0   : > { %v1848_v33 = vadd.f32 %v1847_v27, %v1759_v28 }
 0x2a2   : > { %v1884_v35 = vadd.f32 %v1848_v33, %v1240_v29 }
 0x2a4   : > { %1916 = vst [vmem:[#allocation2 + $0xf8] sm:$0xff] %v1884_v35 }
 0x2a5   : > { %v1761_v39 = vpop.f32.mrf.mxu2  ;;  %v1585_v44 = vpop.f32.mrf.mxu0 }
 0x2a6   : > { %v1850_v43 = vpop.f32.mrf.mxu3  ;;  %v1762_v40 = vadd.f32 %v1761_v39, %v1673_v36  ;;  %v1674_v45 = vpop.f32.mrf.mxu1 }
 0x2a7   : > { %v1675_v47 = vadd.f32 %v1674_v45, %v1585_v44 }
 0x2a8   : > { %v1851_v42 = vadd.f32 %v1850_v43, %v1762_v40 }
 0x2aa   : > { %v1885_v46 = vadd.f32 %v1851_v42, %v1241_v41 }
 0x2ac   : > { %1917 = vst [vmem:[#allocation2 + $0x20] sm:$0xff] %v1885_v46 }
 0x2ad   : > { %v1763_v48 = vpop.f32.mrf.mxu2 }
 0x2ae   : > { %v1764_v49 = vadd.f32 %v1763_v48, %v1675_v47  ;;  %v1852_v51 = vpop.f32.mrf.mxu3 }
 0x2b0   : > { %v1853_v52 = vadd.f32 %v1852_v51, %v1764_v49 }
 0x2b2   : > { %v1886_v53 = vadd.f32 %v1853_v52, %v1242_v50 }
 0x2b4   : > { %1918 = vst [vmem:[#allocation2 + $0x98] sm:$0xff] %v1886_v53 }
 0x2b5 PF: > { %s6376_s21 = sld [smem:[#allocation38_spill]] }
 0x2bb   : > { %p4041_p11 = scmp.ne.s32.totalorder %s6376_s21, 2 }
 0x2bc   : > { %s6377_s19 = sld [smem:[#allocation53_spill]] (!%p4041_p11) }
 0x2bd   : > { %1922 = sbr.rel (%p4041_p11) target bundleno = 1676 (0x68c), region = 108  ;;  %s6378_s6 = sld [smem:[#allocation55_spill]] (!%p4041_p11) }
 0x2be   : > { %s6379_s4 = sld [smem:[#allocation57_spill]] (!%p4041_p11) }
 0x2bf   : > { %s6380_s23 = sld [smem:[#allocation58_spill]] (!%p4041_p11) }
 0x2c0   : > { %s6382_s18 = sld [smem:[#allocation59_spill]] (!%p4041_p11) }
 0x2c2   : > { %v2018_v54 = vld [vmem:[#allocation14 + $0x78] sm:$0xff]  ;;  %v2017_v56 = vld [vmem:[#allocation14 + $0x70] sm:$0xff]  ;;  %v2016_v58 = vld [vmem:[#allocation14 + $0x68] sm:$0xff] }
 0x2c3   : > { %v1970_v55 = vld [vmem:[#allocation12 + $0x78] sm:$0xff]  ;;  %2019 = vmatpush.msra.mxu0 %v2018_v54  ;;  %v1969_v57 = vld [vmem:[#allocation12 + $0x70] sm:$0xff]  ;;  %v1968_v59 = vld [vmem:[#allocation12 + $0x68] sm:$0xff] }
 0x2c4   : > { %2132 = vmatpush.msra.mxu1 %v1970_v55  ;;  %v2015_v60 = vld [vmem:[#allocation14 + $0x60] sm:$0xff]  ;;  %v2014_v62 = vld [vmem:[#allocation14 + $0x58] sm:$0xff]  ;;  %v2013_v0 = vld [vmem:[#allocation14 + $0x50] sm:$0xff] }
 0x2c5   : > { %2020 = vmatpush.msra.mxu0 %v2017_v56  ;;  %v1967_v61 = vld [vmem:[#allocation12 + $0x60] sm:$0xff]  ;;  %v1966_v63 = vld [vmem:[#allocation12 + $0x58] sm:$0xff]  ;;  %v1965_v1 = vld [vmem:[#allocation12 + $0x50] sm:$0xff]  ;;  %s6381_s20 = smov %s6380_s23 }
 0x2c6   : > { %2133 = vmatpush.msra.mxu1 %v1969_v57  ;;  %v2012_v2 = vld [vmem:[#allocation14 + $0x48] sm:$0xff]  ;;  %v2011_v4 = vld [vmem:[#allocation14 + $0x40] sm:$0xff]  ;;  %v2010_v6 = vld [vmem:[#allocation14 + $0x38] sm:$0xff] }
 0x2c7   : > { %2021 = vmatpush.msra.mxu0 %v2016_v58  ;;  %v1964_v3 = vld [vmem:[#allocation12 + $0x48] sm:$0xff]  ;;  %v1963_v5 = vld [vmem:[#allocation12 + $0x40] sm:$0xff]  ;;  %v1962_v7 = vld [vmem:[#allocation12 + $0x38] sm:$0xff] }
 0x2c8   : > { %2134 = vmatpush.msra.mxu1 %v1968_v59  ;;  %v2009_v8 = vld [vmem:[#allocation14 + $0x30] sm:$0xff]  ;;  %v2008_v10 = vld [vmem:[#allocation14 + $0x28] sm:$0xff]  ;;  %v2007_v12 = vld [vmem:[#allocation14 + $0x20] sm:$0xff] }
 0x2c9   : > { %2022 = vmatpush.msra.mxu0 %v2015_v60  ;;  %v1961_v9 = vld [vmem:[#allocation12 + $0x30] sm:$0xff]  ;;  %v1960_v11 = vld [vmem:[#allocation12 + $0x28] sm:$0xff]  ;;  %v1959_v25 = vld [vmem:[#allocation12 + $0x20] sm:$0xff] }
 0x2ca   : > { %2135 = vmatpush.msra.mxu1 %v1967_v61  ;;  %v2006_v13 = vld [vmem:[#allocation14 + $0x18] sm:$0xff]  ;;  %v2005_v31 = vld [vmem:[#allocation14 + $0x10] sm:$0xff]  ;;  %v2004_v16 = vld [vmem:[#allocation14 + $0x8] sm:$0xff] }
 0x2cb   : > { %2023 = vmatpush.msra.mxu0 %v2014_v62  ;;  %v1958_v14 = vld [vmem:[#allocation12 + $0x18] sm:$0xff]  ;;  %v1957_v15 = vld [vmem:[#allocation12 + $0x10] sm:$0xff]  ;;  %v1956_v17 = vld [vmem:[#allocation12 + $0x8] sm:$0xff] }
 0x2cc   : > { %2136 = vmatpush.msra.mxu1 %v1966_v63  ;;  %v2003_v34 = vld [vmem:[#allocation14] sm:$0xff]  ;;  %v1971_v18 = vld [vmem:[#allocation2 + $0xb0] sm:$0xff]  ;;  %v1923_v38 = vld [vmem:[%s5268_s2] sm:$0xff] }
 0x2cd   : > { %2024 = vmatpush.msra.mxu0 %v2013_v0  ;;  %v1955_v37 = vld [vmem:[#allocation12] sm:$0xff]  ;;  %v1972_v19 = vld [vmem:[#allocation2] sm:$0xff]  ;;  %v1973_v21 = vld [vmem:[#allocation2 + $0xd8] sm:$0xff] }
 0x2ce   : > { %2137 = vmatpush.msra.mxu1 %v1965_v1  ;;  %v1924_v20 = vld [vmem:[%s5268_s2 + $0x8] sm:$0xff]  ;;  %v1925_v22 = vld [vmem:[%s5268_s2 + $0x10] sm:$0xff]  ;;  %v1974_v23 = vld [vmem:[#allocation2 + $0x18] sm:$0xff] }
 0x2cf   : > { %2025 = vmatpush.msra.mxu0 %v2012_v2  ;;  %v1926_v24 = vld [vmem:[%s5268_s2 + $0x18] sm:$0xff]  ;;  %v1975_v26 = vld [vmem:[#allocation2 + $0x50] sm:$0xff]  ;;  %v1927_v27 = vld [vmem:[%s5268_s2 + $0x20] sm:$0xff] }
 0x2d0   : > { %2138 = vmatpush.msra.mxu1 %v1964_v3  ;;  %v1976_v28 = vld [vmem:[#allocation2 + $0x68] sm:$0xff]  ;;  %v1977_v30 = vld [vmem:[#allocation2 + $0x30] sm:$0xff]  ;;  %v1930_v35 = vld [vmem:[%s5268_s2 + $0x38] sm:$0xff] }
 0x2d1   : > { %2026 = vmatpush.msra.mxu0 %v2011_v4  ;;  %v1928_v29 = vld [vmem:[%s5268_s2 + $0x28] sm:$0xff]  ;;  %v1929_v32 = vld [vmem:[%s5268_s2 + $0x30] sm:$0xff]  ;;  %v1979_v36 = vld [vmem:[#allocation2 + $0x80] sm:$0xff] }
 0x2d2   : > { %2139 = vmatpush.msra.mxu1 %v1963_v5  ;;  %v1978_v33 = vld [vmem:[#allocation2 + $0x48] sm:$0xff]  ;;  %v1931_v39 = vld [vmem:[%s5268_s2 + $0x40] sm:$0xff]  ;;  %v1933_v44 = vld [vmem:[%s5268_s2 + $0x50] sm:$0xff] }
 0x2d3   : > { %2027 = vmatpush.msra.mxu0 %v2010_v6  ;;  %v1980_v43 = vld [vmem:[#allocation2 + $0x88] sm:$0xff]  ;;  %v4152_v41 = vld [vmem:[#allocation15 + $0x38] sm:$0xff]  ;;  %v4151_v45 = vld [vmem:[#allocation15 + $0x30] sm:$0xff] }
 0x2d4   : > { %2140 = vmatpush.msra.mxu1 %v1962_v7  ;;  %v1932_v40 = vld [vmem:[%s5268_s2 + $0x48] sm:$0xff]  ;;  %2397 = vmatpush.bf16.msra.mxu2 %v4152_v41  ;;  %v4150_v46 = vld [vmem:[#allocation15 + $0x28] sm:$0xff]  ;;  %v1982_v47 = vld [vmem:[#allocation2 + $0xb8] sm:$0xff] }
 0x2d5   : > { %2028 = vmatpush.msra.mxu0 %v2009_v8  ;;  %v1981_v42 = vld [vmem:[#allocation2 + $0xe8] sm:$0xff]  ;;  %v1934_v48 = vld [vmem:[%s5268_s2 + $0x58] sm:$0xff]  ;;  %v1983_v50 = vld [vmem:[#allocation2 + $0x60] sm:$0xff] }
 0x2d6   : > { %2141 = vmatpush.msra.mxu1 %v1961_v9  ;;  %v4149_v49 = vld [vmem:[#allocation15 + $0x20] sm:$0xff]  ;;  %v1935_v51 = vld [vmem:[%s5268_s2 + $0x60] sm:$0xff]  ;;  %v4147_v53 = vld [vmem:[#allocation15 + $0x10] sm:$0xff] }
 0x2d7   : > { %2029 = vmatpush.msra.mxu0 %v2008_v10  ;;  %v4148_v52 = vld [vmem:[#allocation15 + $0x18] sm:$0xff]  ;;  %v1984_v54 = vld [vmem:[#allocation2 + $0xf0] sm:$0xff]  ;;  %v1936_v55 = vld [vmem:[%s5268_s2 + $0x68] sm:$0xff] }
 0x2d8   : > { %2142 = vmatpush.msra.mxu1 %v1960_v11  ;;  %2398 = vmatpush.bf16.msra.mxu2 %v4151_v45  ;;  %v4146_v56 = vld [vmem:[#allocation15 + $0x8] sm:$0xff]  ;;  %v4145_v57 = vld [vmem:[#allocation15] sm:$0xff]  ;;  %v1986_v60 = vld [vmem:[#allocation2 + $0x78] sm:$0xff] }
 0x2d9   : > { %2030 = vmatpush.msra.mxu0 %v2007_v12  ;;  %v1985_v58 = vld [vmem:[#allocation2 + $0x8] sm:$0xff]  ;;  %v1937_v59 = vld [vmem:[%s5268_s2 + $0x70] sm:$0xff]  ;;  %v1938_v61 = vld [vmem:[%s5268_s2 + $0x78] sm:$0xff] }
 0x2da   : > { %2143 = vmatpush.msra.mxu1 %v1959_v25  ;;  %v1987_v0 = vld [vmem:[#allocation2 + $0x38] sm:$0xff]  ;;  %v1939_v1 = vld [vmem:[%s5268_s2 + $0x80] sm:$0xff]  ;;  %v1940_v7 = vld [vmem:[%s5268_s2 + $0x88] sm:$0xff] }
 0x2db   : > { %2031 = vmatpush.msra.mxu0 %v2006_v13  ;;  %v5596_v3 = vld [vmem:[%s6377_s19] ss:$0 sm:$0xff]  ;;  %v1988_v6 = vld [vmem:[#allocation2 + $0x58] sm:$0xff] }
 0x2dc   : > { %2144 = vmatpush.msra.mxu1 %v1958_v14  ;;  %2399 = vmatpush.bf16.msra.mxu2 %v4150_v46  ;;  %v1993_v46 = vld [vmem:[#allocation2 + $0x70] sm:$0xff] }
 0x2dd   : > { %2032 = vmatpush.msra.mxu0 %v2005_v31  ;;  %v1989_v31 = vld [vmem:[#allocation2 + $0x40] sm:$0xff] }
 0x2de   : > { %2145 = vmatpush.msra.mxu1 %v1957_v15  ;;  %v1941_v15 = vld [vmem:[%s5268_s2 + $0x90] sm:$0xff] }
 0x2df   : > { %2033 = vmatpush.msra.mxu0 %v2004_v16 }
 0x2e0   : > { %2146 = vmatpush.msra.mxu1 %v1956_v17  ;;  %2400 = vmatpush.bf16.msra.mxu2 %v4149_v49 }
 0x2e1   : > { %2034 = vmatpush.msra.mxu0 %v2003_v34 }
 0x2e2   : > { %2147 = vmatpush.msra.mxu1 %v1955_v37  ;;  %2035 = vmatmul.f32.vlgmr.msra.gmra.mxu0 %v1971_v18  ;;  %v1990_v37 = vld [vmem:[#allocation2 + $0xc8] sm:$0xff]  ;;  %v1942_v18 = vld [vmem:[%s5268_s2 + $0x98] sm:$0xff] }
 0x2e3   : > { %2148 = vmatmul.f32.vlgmr.msra.gmra.mxu1 %v1923_v38 }
 0x2e4   : > { %2401 = vmatpush.bf16.msra.mxu2 %v4148_v52  ;;  %v1946_v52 = vld [vmem:[%s5268_s2 + $0xb8] sm:$0xff] }
 0x2e8   : > { %2402 = vmatpush.bf16.msra.mxu2 %v4147_v53 }
 0x2ea   : > { %2038 = vmatmul.f32.gmra.mxu0 %v1972_v19 }
 0x2eb   : > { %2151 = vmatmul.f32.gmra.mxu1 %v1924_v20 }
 0x2ec   : > { %2403 = vmatpush.bf16.msra.mxu2 %v4146_v56 }
 0x2f0   : > { %2404 = vmatpush.bf16.msra.mxu2 %v4145_v57 }
 0x2f2   : > { %2041 = vmatmul.f32.gmra.mxu0 %v1973_v21 }
 0x2f3   : > { %2154 = vmatmul.f32.gmra.mxu1 %v1925_v22 }
 0x2fa   : > { %2044 = vmatmul.f32.gmra.mxu0 %v1974_v23 }
 0x2fb   : > { %2157 = vmatmul.f32.gmra.mxu1 %v1926_v24 }
 0x302   : > { %2047 = vmatmul.f32.gmra.mxu0 %v1975_v26 }
 0x303   : > { %2160 = vmatmul.f32.gmra.mxu1 %v1927_v27  ;;  %v1991_v27 = vld [vmem:[#allocation2 + $0xe0] sm:$0xff] }
 0x30a   : > { %2050 = vmatmul.f32.gmra.mxu0 %v1976_v28  ;;  %v1943_v28 = vld [vmem:[%s5268_s2 + $0xa0] sm:$0xff] }
 0x30b   : > { %2163 = vmatmul.f32.gmra.mxu1 %v1928_v29 }
 0x312   : > { %2053 = vmatmul.f32.gmra.mxu0 %v1977_v30 }
 0x313   : > { %2166 = vmatmul.f32.gmra.mxu1 %v1929_v32 }
 0x31a   : > { %2056 = vmatmul.f32.gmra.mxu0 %v1978_v33  ;;  %v1992_v33 = vld [vmem:[#allocation2 + $0x90] sm:$0xff] }
 0x31b   : > { %2169 = vmatmul.f32.gmra.mxu1 %v1930_v35  ;;  %v1944_v35 = vld [vmem:[%s5268_s2 + $0xa8] sm:$0xff] }
 0x322   : > { %2059 = vmatmul.f32.gmra.mxu0 %v1979_v36 }
 0x323   : > { %2172 = vmatmul.f32.gmra.mxu1 %v1931_v39 }
 0x32a   : > { %2062 = vmatmul.f32.gmra.mxu0 %v1980_v43 }
 0x32b   : > { %2175 = vmatmul.f32.gmra.mxu1 %v1932_v40 }
 0x332   : > { %2065 = vmatmul.f32.gmra.mxu0 %v1981_v42 }
 0x333   : > { %2178 = vmatmul.f32.gmra.mxu1 %v1933_v44 }
 0x33a   : > { %2068 = vmatmul.f32.gmra.mxu0 %v1982_v47  ;;  %v1945_v47 = vld [vmem:[%s5268_s2 + $0xb0] sm:$0xff] }
 0x33b   : > { %2181 = vmatmul.f32.gmra.mxu1 %v1934_v48 }
 0x342   : > { %2071 = vmatmul.f32.gmra.mxu0 %v1983_v50 }
 0x343   : > { %2184 = vmatmul.f32.gmra.mxu1 %v1935_v51  ;;  %v1994_v51 = vld [vmem:[#allocation2 + $0xc0] sm:$0xff] }
 0x34a   : > { %2074 = vmatmul.f32.gmra.mxu0 %v1984_v54 }
 0x34b   : > { %2187 = vmatmul.f32.gmra.mxu1 %v1936_v55 }
 0x352   : > { %2077 = vmatmul.f32.gmra.mxu0 %v1985_v58 }
 0x353   : > { %2190 = vmatmul.f32.gmra.mxu1 %v1937_v59 }
 0x35a   : > { %2080 = vmatmul.f32.gmra.mxu0 %v1986_v60 }
 0x35b   : > { %2193 = vmatmul.f32.gmra.mxu1 %v1938_v61  ;;  %v1995_v61 = vld [vmem:[#allocation2 + $0xa8] sm:$0xff] }
 0x35f   : > { %v2036_v62 = vpop.f32.mrf.mxu0 }
 0x360   : > { %v2149_v63 = vpop.f32.mrf.mxu1 }
 0x361   : > { %v2150_v2 = vadd.f32 %v2149_v63, %v2036_v62  ;;  %v1947_v62 = vld [vmem:[%s5268_s2 + $0xc0] sm:$0xff] }
 0x362   : > { %2083 = vmatmul.f32.gmra.mxu0 %v1987_v0 }
 0x363   : > { %2196 = vmatmul.f32.gmra.mxu1 %v1939_v1  ;;  %v2249_v8 = vadd.f32 %v5596_v3, %v2150_v2  ;;  %v1996_v2 = vld [vmem:[#allocation2 + $0xd0] sm:$0xff] }
 0x365   : > { %v2281_v11 = vmax.f32 %v2249_v8, 0.0 }
 0x367   : > { %v2039_v4 = vpop.f32.mrf.mxu0 }
 0x368   : > { %v2152_v5 = vpop.f32.mrf.mxu1 }
 0x369   : > { %v2153_v9 = vadd.f32 %v2152_v5, %v2039_v4  ;;  %v1948_v4 = vld [vmem:[%s5268_s2 + $0xc8] sm:$0xff] }
 0x36a   : > { %2086 = vmatmul.f32.gmra.mxu0 %v1988_v6 }
 0x36b   : > { %v2250_v10 = vadd.f32 %v5596_v3, %v2153_v9  ;;  %2199 = vmatmul.f32.gmra.mxu1 %v1940_v7 }
 0x36d   : > { %v2282_v12 = vmax.f32 %v2250_v10, 0.0 }
 0x36f   : > { %v2313_v25 = vpack.c.bf16 %v2282_v12, %v2281_v11  ;;  %v2042_v13 = vpop.f32.mrf.mxu0 }
 0x370   : > { %v2155_v14 = vpop.f32.mrf.mxu1 }
 0x371   : > { %2405 = vmatmul.bf16.vlgmr.msra.gmra.mxu2 %v2313_v25  ;;  %v2156_v16 = vadd.f32 %v2155_v14, %v2042_v13  ;;  %v1997_v25 = vld [vmem:[#allocation2 + $0x10] sm:$0xff] }
 0x372   : > { %2089 = vmatmul.f32.gmra.mxu0 %v1989_v31  ;;  %v1949_v13 = vld [vmem:[%s5268_s2 + $0xd0] sm:$0xff] }
 0x373   : > { %2202 = vmatmul.f32.gmra.mxu1 %v1941_v15  ;;  %v2251_v38 = vadd.f32 %v5596_v3, %v2156_v16  ;;  %v1998_v16 = vld [vmem:[#allocation2 + $0x28] sm:$0xff] }
 0x375   : > { %v2283_v21 = vmax.f32 %v2251_v38, 0.0 }
 0x377   : > { %v2045_v17 = vpop.f32.mrf.mxu0 }
 0x378   : > { %v2158_v34 = vpop.f32.mrf.mxu1 }
 0x379   : > { %v2159_v19 = vadd.f32 %v2158_v34, %v2045_v17  ;;  %v1950_v17 = vld [vmem:[%s5268_s2 + $0xd8] sm:$0xff] }
 0x37a   : > { %2092 = vmatmul.f32.gmra.mxu0 %v1990_v37 }
 0x37b   : > { %v2252_v20 = vadd.f32 %v5596_v3, %v2159_v19  ;;  %2205 = vmatmul.f32.gmra.mxu1 %v1942_v18 }
 0x37d   : > { %v2284_v22 = vmax.f32 %v2252_v20, 0.0 }
 0x37f   : > { %v2314_v23 = vpack.c.bf16 %v2284_v22, %v2283_v21  ;;  %v2048_v24 = vpop.f32.mrf.mxu0 }
 0x380   : > { %v2161_v26 = vpop.f32.mrf.mxu1 }
 0x381   : > { %2410 = vmatmul.bf16.gmra.mxu2 %v2314_v23  ;;  %v2162_v29 = vadd.f32 %v2161_v26, %v2048_v24  ;;  %v1999_v23 = vld [vmem:[#allocation2 + $0xa0] sm:$0xff] }
 0x382   : > { %2095 = vmatmul.f32.gmra.mxu0 %v1991_v27  ;;  %v1951_v24 = vld [vmem:[%s5268_s2 + $0xe0] sm:$0xff] }
 0x383   : > { %2208 = vmatmul.f32.gmra.mxu1 %v1943_v28  ;;  %v2253_v36 = vadd.f32 %v5596_v3, %v2162_v29  ;;  %v4160_v26 = vld [vmem:[#allocation17 + $0x38] sm:$0xff]  ;;  %v4159_v28 = vld [vmem:[#allocation17 + $0x30] sm:$0xff] }
 0x384   : > { %2602 = vmatpush.bf16.msra.mxu3 %v4160_v26 }
 0x385   : > { %v2285_v40 = vmax.f32 %v2253_v36, 0.0 }
 0x387   : > { %v2051_v30 = vpop.f32.mrf.mxu0 }
 0x388   : > { %v2164_v32 = vpop.f32.mrf.mxu1  ;;  %2603 = vmatpush.bf16.msra.mxu3 %v4159_v28 }
 0x389   : > { %v2165_v39 = vadd.f32 %v2164_v32, %v2051_v30  ;;  %v2000_v32 = vld [vmem:[#allocation2 + $0xf8] sm:$0xff] }
 0x38a   : > { %2098 = vmatmul.f32.gmra.mxu0 %v1992_v33  ;;  %v1952_v33 = vld [vmem:[%s5268_s2 + $0xe8] sm:$0xff] }
 0x38b   : > { %v2254_v43 = vadd.f32 %v5596_v3, %v2165_v39  ;;  %2211 = vmatmul.f32.gmra.mxu1 %v1944_v35  ;;  %v4158_v39 = vld [vmem:[#allocation17 + $0x28] sm:$0xff] }
 0x38c   : > { %2604 = vmatpush.bf16.msra.mxu3 %v4158_v39 }
 0x38d   : > { %v2286_v41 = vmax.f32 %v2254_v43, 0.0 }
 0x38f   : > { %v2315_v42 = vpack.c.bf16 %v2286_v41, %v2285_v40  ;;  %v2054_v44 = vpop.f32.mrf.mxu0 }
 0x390   : > { %v2167_v45 = vpop.f32.mrf.mxu1 }
 0x391   : > { %2415 = vmatmul.bf16.gmra.mxu2 %v2315_v42  ;;  %v2168_v48 = vadd.f32 %v2167_v45, %v2054_v44  ;;  %v4157_v42 = vld [vmem:[#allocation17 + $0x20] sm:$0xff] }
 0x392   : > { %2101 = vmatmul.f32.gmra.mxu0 %v1993_v46  ;;  %2605 = vmatpush.bf16.msra.mxu3 %v4157_v42 }
 0x393   : > { %2214 = vmatmul.f32.gmra.mxu1 %v1945_v47  ;;  %v2255_v53 = vadd.f32 %v5596_v3, %v2168_v48  ;;  %v2001_v47 = vld [vmem:[#allocation2 + $0x20] sm:$0xff]  ;;  %v1953_v48 = vld [vmem:[%s5268_s2 + $0xf0] sm:$0xff] }
 0x395   : > { %v2287_v56 = vmax.f32 %v2255_v53, 0.0 }
 0x397   : > { %v2057_v49 = vpop.f32.mrf.mxu0 }
 0x398   : > { %v2170_v50 = vpop.f32.mrf.mxu1 }
 0x399   : > { %v2171_v54 = vadd.f32 %v2170_v50, %v2057_v49  ;;  %v4156_v49 = vld [vmem:[#allocation17 + $0x18] sm:$0xff] }
 0x39a   : > { %2104 = vmatmul.f32.gmra.mxu0 %v1994_v51  ;;  %2606 = vmatpush.bf16.msra.mxu3 %v4156_v49  ;;  %v4155_v51 = vld [vmem:[#allocation17 + $0x10] sm:$0xff] }
 0x39b   : > { %v2256_v55 = vadd.f32 %v5596_v3, %v2171_v54  ;;  %2217 = vmatmul.f32.gmra.mxu1 %v1946_v52  ;;  %v2002_v54 = vld [vmem:[#allocation2 + $0x98] sm:$0xff] }
 0x39d   : > { %v2288_v57 = vmax.f32 %v2256_v55, 0.0  ;;  %v1954_v55 = vld [vmem:[%s5268_s2 + $0xf8] sm:$0xff] }
 0x39e   : > { %2607 = vmatpush.bf16.msra.mxu3 %v4155_v51 }
 0x39f   : > { %v2316_v58 = vpack.c.bf16 %v2288_v57, %v2287_v56  ;;  %v2060_v59 = vpop.f32.mrf.mxu0 }
 0x3a0   : > { %v2173_v60 = vpop.f32.mrf.mxu1 }
 0x3a1   : > { %2420 = vmatmul.bf16.gmra.mxu2 %v2316_v58  ;;  %v2174_v63 = vadd.f32 %v2173_v60, %v2060_v59  ;;  %v4154_v58 = vld [vmem:[#allocation17 + $0x8] sm:$0xff] }
 0x3a2   : > { %2107 = vmatmul.f32.gmra.mxu0 %v1995_v61  ;;  %2608 = vmatpush.bf16.msra.mxu3 %v4154_v58 }
 0x3a3   : > { %2220 = vmatmul.f32.gmra.mxu1 %v1947_v62  ;;  %v2257_v5 = vadd.f32 %v5596_v3, %v2174_v63  ;;  %v4153_v62 = vld [vmem:[#allocation17] sm:$0xff] }
 0x3a5   : > { %v2289_v8 = vmax.f32 %v2257_v5, 0.0 }
 0x3a6   : > { %2609 = vmatpush.bf16.msra.mxu3 %v4153_v62 }
 0x3a7   : > { %v2063_v0 = vpop.f32.mrf.mxu0 }
 0x3a8   : > { %v2176_v1 = vpop.f32.mrf.mxu1 }
 0x3a9   : > { %v2177_v6 = vadd.f32 %v2176_v1, %v2063_v0 }
 0x3aa   : > { %2110 = vmatmul.f32.gmra.mxu0 %v1996_v2 }
 0x3ab   : > { %v2258_v7 = vadd.f32 %v5596_v3, %v2177_v6  ;;  %2223 = vmatmul.f32.gmra.mxu1 %v1948_v4 }
 0x3ad   : > { %v2290_v9 = vmax.f32 %v2258_v7, 0.0 }
 0x3af   : > { %v2317_v10 = vpack.c.bf16 %v2290_v9, %v2289_v8  ;;  %v2066_v11 = vpop.f32.mrf.mxu0 }
 0x3b0   : > { %v2179_v12 = vpop.f32.mrf.mxu1 }
 0x3b1   : > { %2425 = vmatmul.bf16.gmra.mxu2 %v2317_v10  ;;  %v2180_v14 = vadd.f32 %v2179_v12, %v2066_v11 }
 0x3b2   : > { %2113 = vmatmul.f32.gmra.mxu0 %v1997_v25 }
 0x3b3   : > { %2226 = vmatmul.f32.gmra.mxu1 %v1949_v13  ;;  %v2259_v34 = vadd.f32 %v5596_v3, %v2180_v14 }
 0x3b5   : > { %v2291_v38 = vmax.f32 %v2259_v34, 0.0 }
 0x3b7   : > { %v2069_v31 = vpop.f32.mrf.mxu0 }
 0x3b8   : > { %v2182_v15 = vpop.f32.mrf.mxu1 }
 0x3b9   : > { %v2183_v37 = vadd.f32 %v2182_v15, %v2069_v31  ;;  %v5634_v31 = vld [vmem:[%s6378_s6] ss:$0 sm:$0xff] }
 0x3ba   : > { %2116 = vmatmul.f32.gmra.mxu0 %v1998_v16 }
 0x3bb   : > { %v2260_v18 = vadd.f32 %v5596_v3, %v2183_v37  ;;  %2229 = vmatmul.f32.gmra.mxu1 %v1950_v17 }
 0x3bd   : > { %v2292_v19 = vmax.f32 %v2260_v18, 0.0 }
 0x3bf   : > { %v2318_v20 = vpack.c.bf16 %v2292_v19, %v2291_v38  ;;  %v2072_v21 = vpop.f32.mrf.mxu0 }
 0x3c0   : > { %v2185_v22 = vpop.f32.mrf.mxu1 }
 0x3c1   : > { %2430 = vmatmul.bf16.gmra.mxu2 %v2318_v20  ;;  %v2186_v27 = vadd.f32 %v2185_v22, %v2072_v21 }
 0x3c2   : > { %2119 = vmatmul.f32.gmra.mxu0 %v1999_v23 }
 0x3c3   : > { %2232 = vmatmul.f32.gmra.mxu1 %v1951_v24  ;;  %v2261_v35 = vadd.f32 %v5596_v3, %v2186_v27 }
 0x3c5   : > { %v2293_v40 = vmax.f32 %v2261_v35, 0.0 }
 0x3c7   : > { %v2075_v29 = vpop.f32.mrf.mxu0 }
 0x3c8   : > { %v2188_v30 = vpop.f32.mrf.mxu1 }
 0x3c9   : > { %v2189_v36 = vadd.f32 %v2188_v30, %v2075_v29 }
 0x3ca   : > { %2122 = vmatmul.f32.gmra.mxu0 %v2000_v32 }
 0x3cb   : > { %v2262_v43 = vadd.f32 %v5596_v3, %v2189_v36  ;;  %2235 = vmatmul.f32.gmra.mxu1 %v1952_v33 }
 0x3cd   : > { %v2294_v41 = vmax.f32 %v2262_v43, 0.0 }
 0x3cf   : > { %v2319_v44 = vpack.c.bf16 %v2294_v41, %v2293_v40  ;;  %v2078_v45 = vpop.f32.mrf.mxu0 }
 0x3d0   : > { %v2191_v46 = vpop.f32.mrf.mxu1 }
 0x3d1   : > { %2435 = vmatmul.bf16.gmra.mxu2 %v2319_v44  ;;  %v2192_v50 = vadd.f32 %v2191_v46, %v2078_v45 }
 0x3d2   : > { %2125 = vmatmul.f32.gmra.mxu0 %v2001_v47 }
 0x3d3   : > { %2238 = vmatmul.f32.gmra.mxu1 %v1953_v48  ;;  %v2263_v56 = vadd.f32 %v5596_v3, %v2192_v50 }
 0x3d5   : > { %v2295_v60 = vmax.f32 %v2263_v56, 0.0 }
 0x3d7   : > { %v2081_v52 = vpop.f32.mrf.mxu0 }
 0x3d8   : > { %v2194_v53 = vpop.f32.mrf.mxu1 }
 0x3d9   : > { %v2195_v57 = vadd.f32 %v2194_v53, %v2081_v52 }
 0x3da   : > { %2128 = vmatmul.f32.gmra.mxu0 %v2002_v54 }
 0x3db   : > { %v2264_v59 = vadd.f32 %v5596_v3, %v2195_v57  ;;  %2241 = vmatmul.f32.gmra.mxu1 %v1954_v55 }
 0x3dd   : > { %v2296_v61 = vmax.f32 %v2264_v59, 0.0 }
 0x3df   : > { %v2320_v63 = vpack.c.bf16 %v2296_v61, %v2295_v60  ;;  %v2084_v0 = vpop.f32.mrf.mxu0 }
 0x3e0   : > { %v2197_v1 = vpop.f32.mrf.mxu1 }
 0x3e1   : > { %2440 = vmatmul.bf16.gmra.mxu2 %v2320_v63  ;;  %v2198_v2 = vadd.f32 %v2197_v1, %v2084_v0 }
 0x3e3   : > { %v2265_v6 = vadd.f32 %v5596_v3, %v2198_v2 }
 0x3e5   : > { %v2297_v9 = vmax.f32 %v2265_v6, 0.0 }
 0x3e7   : > { %v2087_v4 = vpop.f32.mrf.mxu0 }
 0x3e8   : > { %v2200_v5 = vpop.f32.mrf.mxu1 }
 0x3e9   : > { %v2201_v7 = vadd.f32 %v2200_v5, %v2087_v4 }
 0x3eb   : > { %v2266_v8 = vadd.f32 %v5596_v3, %v2201_v7 }
 0x3ed   : > { %v2298_v10 = vmax.f32 %v2266_v8, 0.0 }
 0x3ef   : > { %v2321_v11 = vpack.c.bf16 %v2298_v10, %v2297_v9  ;;  %v2090_v12 = vpop.f32.mrf.mxu0 }
 0x3f0   : > { %v2203_v25 = vpop.f32.mrf.mxu1 }
 0x3f1   : > { %2445 = vmatmul.bf16.gmra.mxu2 %v2321_v11  ;;  %v2204_v14 = vadd.f32 %v2203_v25, %v2090_v12 }
 0x3f3   : > { %v2267_v17 = vadd.f32 %v5596_v3, %v2204_v14 }
 0x3f4   : > { %v2406_v13 = vpop.f32.mrf.mxu2 }
 0x3f5   : > { %v2407_v37 = vadd.f32 %v5634_v31, %v2406_v13  ;;  %v2299_v19 = vmax.f32 %v2267_v17, 0.0 }
 0x3f7   : > { %v2093_v15 = vpop.f32.mrf.mxu0  ;;  %v2486_v22 = vmax.f32 %v2407_v37, 0.0 }
 0x3f8   : > { %v2206_v16 = vpop.f32.mrf.mxu1 }
 0x3f9   : > { %v2207_v34 = vadd.f32 %v2206_v16, %v2093_v15 }
 0x3fb   : > { %v2268_v18 = vadd.f32 %v5596_v3, %v2207_v34 }
 0x3fc   : > { %v2408_v38 = vpop.f32.mrf.mxu2 }
 0x3fd   : > { %v2300_v20 = vmax.f32 %v2268_v18, 0.0  ;;  %v2409_v21 = vadd.f32 %v5634_v31, %v2408_v38 }
 0x3ff   : > { %v2487_v23 = vmax.f32 %v2409_v21, 0.0  ;;  %v2322_v24 = vpack.c.bf16 %v2300_v20, %v2299_v19  ;;  %v2096_v26 = vpop.f32.mrf.mxu0 }
 0x400   : > { %v2209_v27 = vpop.f32.mrf.mxu1 }
 0x401   : > { %2450 = vmatmul.bf16.gmra.mxu2 %v2322_v24  ;;  %v2518_v28 = vpack.c.bf16 %v2487_v23, %v2486_v22  ;;  %v2210_v30 = vadd.f32 %v2209_v27, %v2096_v26 }
 0x403   : > { %2610 = vmatmul.bf16.vlgmr.msra.gmra.mxu3 %v2518_v28  ;;  %v2269_v35 = vadd.f32 %v5596_v3, %v2210_v30 }
 0x404   : > { %v2411_v29 = vpop.f32.mrf.mxu2 }
 0x405   : > { %v2412_v39 = vadd.f32 %v5634_v31, %v2411_v29  ;;  %v2301_v41 = vmax.f32 %v2269_v35, 0.0 }
 0x407   : > { %v2099_v32 = vpop.f32.mrf.mxu0  ;;  %v2488_v45 = vmax.f32 %v2412_v39, 0.0 }
 0x408   : > { %v2212_v33 = vpop.f32.mrf.mxu1 }
 0x409   : > { %v2213_v36 = vadd.f32 %v2212_v33, %v2099_v32 }
 0x40b   : > { %v2270_v43 = vadd.f32 %v5596_v3, %v2213_v36 }
 0x40c   : > { %v2413_v40 = vpop.f32.mrf.mxu2 }
 0x40d   : > { %v2302_v42 = vmax.f32 %v2270_v43, 0.0  ;;  %v2414_v44 = vadd.f32 %v5634_v31, %v2413_v40 }
 0x40f   : > { %v2489_v46 = vmax.f32 %v2414_v44, 0.0  ;;  %v2323_v47 = vpack.c.bf16 %v2302_v42, %v2301_v41  ;;  %v2102_v48 = vpop.f32.mrf.mxu0 }
 0x410   : > { %v2215_v49 = vpop.f32.mrf.mxu1 }
 0x411   : > { %2455 = vmatmul.bf16.gmra.mxu2 %v2323_v47  ;;  %v2519_v50 = vpack.c.bf16 %v2489_v46, %v2488_v45  ;;  %v2216_v52 = vadd.f32 %v2215_v49, %v2102_v48 }
 0x413   : > { %2615 = vmatmul.bf16.gmra.mxu3 %v2519_v50  ;;  %v2271_v55 = vadd.f32 %v5596_v3, %v2216_v52 }
 0x414   : > { %v2416_v51 = vpop.f32.mrf.mxu2 }
 0x415   : > { %v2417_v57 = vadd.f32 %v5634_v31, %v2416_v51  ;;  %v2303_v60 = vmax.f32 %v2271_v55, 0.0 }
 0x417   : > { %v2105_v53 = vpop.f32.mrf.mxu0  ;;  %v2490_v63 = vmax.f32 %v2417_v57, 0.0 }
 0x418   : > { %v2218_v54 = vpop.f32.mrf.mxu1 }
 0x419   : > { %v2219_v56 = vadd.f32 %v2218_v54, %v2105_v53 }
 0x41b   : > { %v2272_v58 = vadd.f32 %v5596_v3, %v2219_v56 }
 0x41c   : > { %v2418_v59 = vpop.f32.mrf.mxu2 }
 0x41d   : > { %v2304_v61 = vmax.f32 %v2272_v58, 0.0  ;;  %v2419_v62 = vadd.f32 %v5634_v31, %v2418_v59 }
 0x41f   : > { %v2491_v0 = vmax.f32 %v2419_v62, 0.0  ;;  %v2324_v1 = vpack.c.bf16 %v2304_v61, %v2303_v60  ;;  %v2108_v2 = vpop.f32.mrf.mxu0 }
 0x420   : > { %v2221_v4 = vpop.f32.mrf.mxu1 }
 0x421   : > { %2460 = vmatmul.bf16.gmra.mxu2 %v2324_v1  ;;  %v2520_v5 = vpack.c.bf16 %v2491_v0, %v2490_v63  ;;  %v2222_v7 = vadd.f32 %v2221_v4, %v2108_v2 }
 0x423   : > { %2620 = vmatmul.bf16.gmra.mxu3 %v2520_v5  ;;  %v2273_v10 = vadd.f32 %v5596_v3, %v2222_v7 }
 0x424   : > { %v2421_v6 = vpop.f32.mrf.mxu2 }
 0x425   : > { %v2422_v12 = vadd.f32 %v5634_v31, %v2421_v6  ;;  %v2305_v14 = vmax.f32 %v2273_v10, 0.0 }
 0x427   : > { %v2111_v8 = vpop.f32.mrf.mxu0  ;;  %v2492_v17 = vmax.f32 %v2422_v12, 0.0 }
 0x428   : > { %v2224_v9 = vpop.f32.mrf.mxu1 }
 0x429   : > { %v2225_v11 = vadd.f32 %v2224_v9, %v2111_v8 }
 0x42b   : > { %v2274_v25 = vadd.f32 %v5596_v3, %v2225_v11 }
 0x42c   : > { %v2423_v13 = vpop.f32.mrf.mxu2 }
 0x42d   : > { %v2306_v15 = vmax.f32 %v2274_v25, 0.0  ;;  %v2424_v16 = vadd.f32 %v5634_v31, %v2423_v13 }
 0x42f   : > { %v2493_v34 = vmax.f32 %v2424_v16, 0.0  ;;  %v2325_v37 = vpack.c.bf16 %v2306_v15, %v2305_v14  ;;  %v2114_v18 = vpop.f32.mrf.mxu0 }
 0x430   : > { %v2227_v38 = vpop.f32.mrf.mxu1 }
 0x431   : > { %2465 = vmatmul.bf16.gmra.mxu2 %v2325_v37  ;;  %v2521_v19 = vpack.c.bf16 %v2493_v34, %v2492_v17  ;;  %v2228_v21 = vadd.f32 %v2227_v38, %v2114_v18 }
 0x433   : > { %2625 = vmatmul.bf16.gmra.mxu3 %v2521_v19  ;;  %v2275_v24 = vadd.f32 %v5596_v3, %v2228_v21 }
 0x434   : > { %v2426_v20 = vpop.f32.mrf.mxu2 }
 0x435   : > { %v2427_v27 = vadd.f32 %v5634_v31, %v2426_v20  ;;  %v2307_v30 = vmax.f32 %v2275_v24, 0.0 }
 0x437   : > { %v2117_v22 = vpop.f32.mrf.mxu0  ;;  %v2494_v35 = vmax.f32 %v2427_v27, 0.0 }
 0x438   : > { %v2230_v23 = vpop.f32.mrf.mxu1 }
 0x439   : > { %v2231_v26 = vadd.f32 %v2230_v23, %v2117_v22  ;;  %v5671_v23 = vld [vmem:[%s6379_s4] ss:$0 sm:$0xff] }
 0x43b   : > { %v2276_v28 = vadd.f32 %v5596_v3, %v2231_v26 }
 0x43c   : > { %v2428_v29 = vpop.f32.mrf.mxu2 }
 0x43d   : > { %v2308_v32 = vmax.f32 %v2276_v28, 0.0  ;;  %v2429_v33 = vadd.f32 %v5634_v31, %v2428_v29 }
 0x43f   : > { %v2495_v36 = vmax.f32 %v2429_v33, 0.0  ;;  %v2326_v39 = vpack.c.bf16 %v2308_v32, %v2307_v30  ;;  %v2120_v43 = vpop.f32.mrf.mxu0 }
 0x440   : > { %v2233_v40 = vpop.f32.mrf.mxu1 }
 0x441   : > { %2470 = vmatmul.bf16.gmra.mxu2 %v2326_v39  ;;  %v2522_v41 = vpack.c.bf16 %v2495_v36, %v2494_v35  ;;  %v2234_v44 = vadd.f32 %v2233_v40, %v2120_v43 }
 0x443   : > { %2630 = vmatmul.bf16.gmra.mxu3 %v2522_v41  ;;  %v2277_v47 = vadd.f32 %v5596_v3, %v2234_v44 }
 0x444   : > { %v2431_v42 = vpop.f32.mrf.mxu2 }
 0x445   : > { %v2432_v49 = vadd.f32 %v5634_v31, %v2431_v42  ;;  %v2309_v52 = vmax.f32 %v2277_v47, 0.0 }
 0x447   : > { %v2123_v45 = vpop.f32.mrf.mxu0  ;;  %v2496_v55 = vmax.f32 %v2432_v49, 0.0 }
 0x448   : > { %v2236_v46 = vpop.f32.mrf.mxu1 }
 0x449   : > { %v2237_v48 = vadd.f32 %v2236_v46, %v2123_v45 }
 0x44b   : > { %v2278_v50 = vadd.f32 %v5596_v3, %v2237_v48 }
 0x44c   : > { %v2433_v51 = vpop.f32.mrf.mxu2 }
 0x44d   : > { %v2310_v53 = vmax.f32 %v2278_v50, 0.0  ;;  %v2434_v54 = vadd.f32 %v5634_v31, %v2433_v51 }
 0x44f   : > { %v2497_v56 = vmax.f32 %v2434_v54, 0.0  ;;  %v2327_v57 = vpack.c.bf16 %v2310_v53, %v2309_v52  ;;  %v2126_v58 = vpop.f32.mrf.mxu0 }
 0x450   : > { %v2239_v59 = vpop.f32.mrf.mxu1 }
 0x451   : > { %2475 = vmatmul.bf16.gmra.mxu2 %v2327_v57  ;;  %v2523_v60 = vpack.c.bf16 %v2497_v56, %v2496_v55  ;;  %v2240_v62 = vadd.f32 %v2239_v59, %v2126_v58 }
 0x453   : > { %2635 = vmatmul.bf16.gmra.mxu3 %v2523_v60  ;;  %v2279_v1 = vadd.f32 %v5596_v3, %v2240_v62 }
 0x454   : > { %v2436_v61 = vpop.f32.mrf.mxu2 }
 0x455   : > { %v2437_v4 = vadd.f32 %v5634_v31, %v2436_v61  ;;  %v2311_v7 = vmax.f32 %v2279_v1, 0.0 }
 0x457   : > { %v2129_v63 = vpop.f32.mrf.mxu0  ;;  %v2498_v10 = vmax.f32 %v2437_v4, 0.0 }
 0x458   : > { %v2242_v0 = vpop.f32.mrf.mxu1 }
 0x459   : > { %v2243_v2 = vadd.f32 %v2242_v0, %v2129_v63 }
 0x45b   : > { %v2280_v5 = vadd.f32 %v5596_v3, %v2243_v2 }
 0x45c   : > { %v2438_v6 = vpop.f32.mrf.mxu2 }
 0x45d   : > { %v2312_v8 = vmax.f32 %v2280_v5, 0.0  ;;  %v2439_v9 = vadd.f32 %v5634_v31, %v2438_v6 }
 0x45f   : > { %v2499_v11 = vmax.f32 %v2439_v9, 0.0  ;;  %v2328_v12 = vpack.c.bf16 %v2312_v8, %v2311_v7 }
 0x461   : > { %2480 = vmatmul.bf16.gmra.mxu2 %v2328_v12  ;;  %v2524_v25 = vpack.c.bf16 %v2499_v11, %v2498_v10 }
 0x463   : > { %2640 = vmatmul.bf16.gmra.mxu3 %v2524_v25 }
 0x464   : > { %v2441_v13 = vpop.f32.mrf.mxu2 }
 0x465   : > { %v2442_v14 = vadd.f32 %v5634_v31, %v2441_v13 }
 0x467   : > { %v2500_v17 = vmax.f32 %v2442_v14, 0.0 }
 0x46c   : > { %v2443_v15 = vpop.f32.mrf.mxu2 }
 0x46d   : > { %v2444_v16 = vadd.f32 %v5634_v31, %v2443_v15 }
 0x46f   : > { %v2501_v34 = vmax.f32 %v2444_v16, 0.0 }
 0x471   : > { %v2525_v3 = vpack.c.bf16 %v2501_v34, %v2500_v17 }
 0x473   : > { %2645 = vmatmul.bf16.gmra.mxu3 %v2525_v3 }
 0x474   : > { %v2446_v37 = vpop.f32.mrf.mxu2 }
 0x475   : > { %v2447_v18 = vadd.f32 %v5634_v31, %v2446_v37 }
 0x477   : > { %v2502_v20 = vmax.f32 %v2447_v18, 0.0 }
 0x47c   : > { %v2448_v38 = vpop.f32.mrf.mxu2 }
 0x47d   : > { %v2449_v19 = vadd.f32 %v5634_v31, %v2448_v38 }
 0x47f   : > { %v2503_v21 = vmax.f32 %v2449_v19, 0.0 }
 0x481   : > { %v2526_v22 = vpack.c.bf16 %v2503_v21, %v2502_v20 }
 0x483   : > { %2650 = vmatmul.bf16.gmra.mxu3 %v2526_v22 }
 0x484   : > { %v2451_v24 = vpop.f32.mrf.mxu2 }
 0x485   : > { %v2452_v28 = vadd.f32 %v5634_v31, %v2451_v24 }
 0x486   : > { %v2611_v26 = vpop.f32.mrf.mxu3 }
 0x487   : > { %v5674_v27 = vadd.f32 %v5671_v23, %v2611_v26  ;;  %v2504_v33 = vmax.f32 %v2452_v28, 0.0 }
 0x489   : > { %2691 = vadd.xlane.f32.xlu0 %v5674_v27 }
 0x48c   : > { %v2453_v29 = vpop.f32.mrf.mxu2 }
 0x48d   : > { %v2454_v30 = vadd.f32 %v5634_v31, %v2453_v29 }
 0x48e   : > { %v2613_v32 = vpop.f32.mrf.mxu3 }
 0x48f   : > { %v2505_v35 = vmax.f32 %v2454_v30, 0.0  ;;  %v5680_v36 = vadd.f32 %v5671_v23, %v2613_v32  ;;  %v4851_v30 = vmov 128.0  }
 0x490   : > { %4371 = vrcp.f32 %v4851_v30 }
 0x491   : > { %2693 = vadd.xlane.f32.xlu0 %v5680_v36  ;;  %v2527_v39 = vpack.c.bf16 %v2505_v35, %v2504_v33 }
 0x493   : > { %2655 = vmatmul.bf16.gmra.mxu3 %v2527_v39 }
 0x494   : > { %v2456_v43 = vpop.f32.mrf.mxu2 }
 0x495   : > { %v2457_v42 = vadd.f32 %v5634_v31, %v2456_v43 }
 0x496   : > { %v2616_v40 = vpop.f32.mrf.mxu3  ;;  %v4372_v35 = vpop.eup %4371 }
 0x497   : > { %v5684_v41 = vadd.f32 %v5671_v23, %v2616_v40  ;;  %v2506_v47 = vmax.f32 %v2457_v42, 0.0  ;;  %v2756_v43 = vmul.f32 128.0, %v4372_v35  ;;  %vm2760_vm0 = vweird.f32 %v4372_v35 }
 0x499   : > { %2695 = vadd.xlane.f32.xlu1 %v5684_v41 }
 0x49c   : > { %v2458_v44 = vpop.f32.mrf.mxu2 }
 0x49d   : > { %v2459_v45 = vadd.f32 %v5634_v31, %v2458_v44 }
 0x49e   : > { %v2618_v46 = vpop.f32.mrf.mxu3 }
 0x49f   : > { %v2507_v48 = vmax.f32 %v2459_v45, 0.0  ;;  %v5690_v49 = vadd.f32 %v5671_v23, %v2618_v46  ;;  %v2757_v46 = vsub.f32 1.0, %v2756_v43 }
 0x4a1   : > { %2697 = vadd.xlane.f32.xlu1 %v5690_v49  ;;  %v2528_v50 = vpack.c.bf16 %v2507_v48, %v2506_v47 }
 0x4a3   : > { %2660 = vmatmul.bf16.gmra.mxu3 %v2528_v50 }
 0x4a4   : > { %v2461_v51 = vpop.f32.mrf.mxu2 }
 0x4a5   : > { %v2462_v54 = vadd.f32 %v5634_v31, %v2461_v51 }
 0x4a6   : > { %v2621_v52 = vpop.f32.mrf.mxu3 }
 0x4a7   : > { %v5694_v53 = vadd.f32 %v5671_v23, %v2621_v52  ;;  %v2508_v58 = vmax.f32 %v2462_v54, 0.0  ;;  %v2758_v52 = vmul.f32 %v4372_v35, %v2757_v46 }
 0x4a9   : > { %2699 = vadd.xlane.f32.xlu2 %v5694_v53 }
 0x4ac   : > { %v2463_v55 = vpop.f32.mrf.mxu2 }
 0x4ad   : > { %v2464_v56 = vadd.f32 %v5634_v31, %v2463_v55  ;;  %v2759_v55 = vadd.f32 %v4372_v35, %v2758_v52 }
 0x4ae   : > { %v2623_v57 = vpop.f32.mrf.mxu3 }
 0x4af   : > { %v2509_v59 = vmax.f32 %v2464_v56, 0.0  ;;  %v5700_v60 = vadd.f32 %v5671_v23, %v2623_v57 }
 0x4b1   : > { %2701 = vadd.xlane.f32.xlu2 %v5700_v60  ;;  %v2529_v61 = vpack.c.bf16 %v2509_v59, %v2508_v58 }
 0x4b3   : > { %2665 = vmatmul.bf16.gmra.mxu3 %v2529_v61 }
 0x4b4   : > { %v2466_v62 = vpop.f32.mrf.mxu2 }
 0x4b5   : > { %v2467_v1 = vadd.f32 %v5634_v31, %v2466_v62 }
 0x4b6   : > { %v2626_v63 = vpop.f32.mrf.mxu3 }
 0x4b7   : > { %v5704_v0 = vadd.f32 %v5671_v23, %v2626_v63  ;;  %v2510_v6 = vmax.f32 %v2467_v1, 0.0 }
 0x4b9   : > { %2703 = vadd.xlane.f32.xlu0 %v5704_v0 }
 0x4bc   : > { %v2468_v2 = vpop.f32.mrf.mxu2 }
 0x4bd   : > { %v2469_v4 = vadd.f32 %v5634_v31, %v2468_v2 }
 0x4be   : > { %v2628_v5 = vpop.f32.mrf.mxu3 }
 0x4bf   : > { %v2511_v7 = vmax.f32 %v2469_v4, 0.0  ;;  %v5710_v8 = vadd.f32 %v5671_v23, %v2628_v5 }
 0x4c1   : > { %v2530_v9 = vpack.c.bf16 %v2511_v7, %v2510_v6  ;;  %2705 = vadd.xlane.f32.xlu1 %v5710_v8 }
 0x4c3   : > { %2670 = vmatmul.bf16.gmra.mxu3 %v2530_v9 }
 0x4c4   : > { %v2471_v10 = vpop.f32.mrf.mxu2 }
 0x4c5   : > { %v2472_v25 = vadd.f32 %v5634_v31, %v2471_v10 }
 0x4c6   : > { %v2631_v11 = vpop.f32.mrf.mxu3 }
 0x4c7   : > { %v5714_v12 = vadd.f32 %v5671_v23, %v2631_v11  ;;  %v2512_v16 = vmax.f32 %v2472_v25, 0.0 }
 0x4c9   : > { %2707 = vadd.xlane.f32.xlu2 %v5714_v12 }
 0x4cc   : > { %v2473_v13 = vpop.f32.mrf.mxu2 }
 0x4cd   : > { %v2474_v14 = vadd.f32 %v5634_v31, %v2473_v13 }
 0x4ce   : > { %v2633_v15 = vpop.f32.mrf.mxu3 }
 0x4cf   : > { %v2513_v17 = vmax.f32 %v2474_v14, 0.0  ;;  %v5720_v34 = vadd.f32 %v5671_v23, %v2633_v15 }
 0x4d1   : > { %v2531_v3 = vpack.c.bf16 %v2513_v17, %v2512_v16  ;;  %2709 = vadd.xlane.f32.xlu0 %v5720_v34 }
 0x4d3   : > { %2675 = vmatmul.bf16.gmra.mxu3 %v2531_v3 }
 0x4d4   : > { %v2476_v37 = vpop.f32.mrf.mxu2 }
 0x4d5   : > { %v2477_v19 = vadd.f32 %v5634_v31, %v2476_v37 }
 0x4d6   : > { %v2636_v18 = vpop.f32.mrf.mxu3 }
 0x4d7   : > { %v5724_v38 = vadd.f32 %v5671_v23, %v2636_v18  ;;  %v2514_v24 = vmax.f32 %v2477_v19, 0.0 }
 0x4d9   : > { %2711 = vadd.xlane.f32.xlu1 %v5724_v38 }
 0x4dc   : > { %v2478_v20 = vpop.f32.mrf.mxu2 }
 0x4dd   : > { %v2479_v21 = vadd.f32 %v5634_v31, %v2478_v20 }
 0x4de   : > { %v2638_v22 = vpop.f32.mrf.mxu3 }
 0x4df   : > { %v2515_v26 = vmax.f32 %v2479_v21, 0.0  ;;  %v5730_v28 = vadd.f32 %v5671_v23, %v2638_v22 }
 0x4e1   : > { %v2532_v29 = vpack.c.bf16 %v2515_v26, %v2514_v24  ;;  %2713 = vadd.xlane.f32.xlu2 %v5730_v28 }
 0x4e3   : > { %2680 = vmatmul.bf16.gmra.mxu3 %v2532_v29 }
 0x4e4   : > { %v2481_v32 = vpop.f32.mrf.mxu2 }
 0x4e5   : > { %v2482_v40 = vadd.f32 %v5634_v31, %v2481_v32 }
 0x4e6   : > { %v2641_v33 = vpop.f32.mrf.mxu3 }
 0x4e7   : > { %v5734_v39 = vadd.f32 %v5671_v23, %v2641_v33  ;;  %v2516_v47 = vmax.f32 %v2482_v40, 0.0 }
 0x4e9   : > { %2715 = vadd.xlane.f32.xlu0 %v5734_v39 }
 0x4ec   : > { %v2483_v42 = vpop.f32.mrf.mxu2 }
 0x4ed   : > { %v2484_v44 = vadd.f32 %v5634_v31, %v2483_v42  ;;  %v5747_v31 = vsel %vm2760_vm0, %v4372_v35, %v2759_v55 }
 0x4ee   : > { %v2643_v45 = vpop.f32.mrf.mxu3 }
 0x4ef   : > { %v2517_v48 = vmax.f32 %v2484_v44, 0.0  ;;  %v5740_v50 = vadd.f32 %v5671_v23, %v2643_v45 }
 0x4f1   : > { %v2533_v51 = vpack.c.bf16 %v2517_v48, %v2516_v47  ;;  %2717 = vadd.xlane.f32.xlu1 %v5740_v50 }
 0x4f3   : > { %2685 = vmatmul.bf16.gmra.mxu3 %v2533_v51 }
 0x4f6   : > { %v2646_v54 = vpop.f32.mrf.mxu3 }
 0x4f7   : > { %v5744_v56 = vadd.f32 %v5671_v23, %v2646_v54 }
 0x4f9   : > { %2719 = vadd.xlane.f32.xlu2 %v5744_v56 }
 0x4fc   : > { %v2692_v57 = vpop.xlane.xlu0 %2691 }
 0x4fd   : > { %v2762_v58 = vmul.f32 %v5747_v31, %v2692_v57 }
 0x4fe   : > { %v2648_v59 = vpop.f32.mrf.mxu3 }
 0x4ff   : > { %v5751_v61 = vsub.f32 %v5674_v27, %v2762_v58  ;;  %v5754_v62 = vadd.f32 %v5671_v23, %v2648_v59 }
 0x501   : > { %2721 = vadd.xlane.f32.xlu0 %v5754_v62  ;;  %v2826_v63 = vmul.f32 %v5751_v61, %v5751_v61 }
 0x503   : > { %2858 = vadd.xlane.f32.xlu2 %v2826_v63 }
 0x504   : > { %v2694_v1 = vpop.xlane.xlu0 %2693 }
 0x505   : > { %v2763_v2 = vmul.f32 %v5747_v31, %v2694_v1 }
 0x506   : > { %v2651_v4 = vpop.f32.mrf.mxu3 }
 0x507   : > { %v5761_v5 = vsub.f32 %v5680_v36, %v2763_v2  ;;  %v5764_v6 = vadd.f32 %v5671_v23, %v2651_v4 }
 0x509   : > { %2723 = vadd.xlane.f32.xlu1 %v5764_v6  ;;  %v2827_v27 = vmul.f32 %v5761_v5, %v5761_v5 }
 0x50b   : > { %2860 = vadd.xlane.f32.xlu0 %v2827_v27 }
 0x50c   : > { %v2696_v7 = vpop.xlane.xlu1 %2695 }
 0x50d   : > { %v2764_v9 = vmul.f32 %v5747_v31, %v2696_v7 }
 0x50e   : > { %v2653_v10 = vpop.f32.mrf.mxu3 }
 0x50f   : > { %v5771_v11 = vsub.f32 %v5684_v41, %v2764_v9  ;;  %v5774_v25 = vadd.f32 %v5671_v23, %v2653_v10 }
 0x511   : > { %2725 = vadd.xlane.f32.xlu2 %v5774_v25  ;;  %v2828_v36 = vmul.f32 %v5771_v11, %v5771_v11 }
 0x513   : > { %2862 = vadd.xlane.f32.xlu1 %v2828_v36 }
 0x514   : > { %v2698_v13 = vpop.xlane.xlu1 %2697 }
 0x515   : > { %v2765_v14 = vmul.f32 %v5747_v31, %v2698_v13 }
 0x516   : > { %v2656_v15 = vpop.f32.mrf.mxu3 }
 0x517   : > { %v5781_v16 = vsub.f32 %v5690_v49, %v2765_v14  ;;  %v5784_v17 = vadd.f32 %v5671_v23, %v2656_v15 }
 0x519   : > { %2727 = vadd.xlane.f32.xlu0 %v5784_v17  ;;  %v2829_v41 = vmul.f32 %v5781_v16, %v5781_v16 }
 0x51b   : > { %2864 = vadd.xlane.f32.xlu2 %v2829_v41 }
 0x51c   : > { %v2700_v3 = vpop.xlane.xlu2 %2699 }
 0x51d   : > { %v2766_v37 = vmul.f32 %v5747_v31, %v2700_v3 }
 0x51e   : > { %v2658_v18 = vpop.f32.mrf.mxu3 }
 0x51f   : > { %v5791_v19 = vsub.f32 %v5694_v53, %v2766_v37  ;;  %v5794_v20 = vadd.f32 %v5671_v23, %v2658_v18 }
 0x521   : > { %2729 = vadd.xlane.f32.xlu1 %v5794_v20  ;;  %v2830_v49 = vmul.f32 %v5791_v19, %v5791_v19 }
 0x523   : > { %2866 = vadd.xlane.f32.xlu0 %v2830_v49 }
 0x524   : > { %v2702_v21 = vpop.xlane.xlu2 %2701 }
 0x525   : > { %v2767_v22 = vmul.f32 %v5747_v31, %v2702_v21 }
 0x526   : > { %v2661_v24 = vpop.f32.mrf.mxu3 }
 0x527   : > { %v5801_v26 = vsub.f32 %v5700_v60, %v2767_v22  ;;  %v5804_v29 = vadd.f32 %v5671_v23, %v2661_v24 }
 0x529   : > { %2731 = vadd.xlane.f32.xlu2 %v5804_v29  ;;  %v2831_v53 = vmul.f32 %v5801_v26, %v5801_v26 }
 0x52b   : > { %2868 = vadd.xlane.f32.xlu1 %v2831_v53 }
 0x52c   : > { %v2704_v30 = vpop.xlane.xlu0 %2703 }
 0x52d   : > { %v2768_v32 = vmul.f32 %v5747_v31, %v2704_v30 }
 0x52e   : > { %v2663_v33 = vpop.f32.mrf.mxu3 }
 0x52f   : > { %v5811_v35 = vsub.f32 %v5704_v0, %v2768_v32  ;;  %v5814_v43 = vadd.f32 %v5671_v23, %v2663_v33 }
 0x531   : > { %2733 = vadd.xlane.f32.xlu0 %v5814_v43  ;;  %v2832_v60 = vmul.f32 %v5811_v35, %v5811_v35 }
 0x533   : > { %2870 = vadd.xlane.f32.xlu2 %v2832_v60 }
 0x534   : > { %v2706_v40 = vpop.xlane.xlu1 %2705 }
 0x535   : > { %v2769_v42 = vmul.f32 %v5747_v31, %v2706_v40 }
 0x536   : > { %v2666_v44 = vpop.f32.mrf.mxu3 }
 0x537   : > { %v5821_v45 = vsub.f32 %v5710_v8, %v2769_v42  ;;  %v5824_v46 = vadd.f32 %v5671_v23, %v2666_v44 }
 0x539   : > { %2735 = vadd.xlane.f32.xlu1 %v5824_v46  ;;  %v2833_v0 = vmul.f32 %v5821_v45, %v5821_v45 }
 0x53b   : > { %2872 = vadd.xlane.f32.xlu0 %v2833_v0 }
 0x53c   : > { %v2708_v47 = vpop.xlane.xlu2 %2707 }
 0x53d   : > { %v2770_v48 = vmul.f32 %v5747_v31, %v2708_v47 }
 0x53e   : > { %v2668_v51 = vpop.f32.mrf.mxu3 }
 0x53f   : > { %v5831_v52 = vsub.f32 %v5714_v12, %v2770_v48  ;;  %v5834_v54 = vadd.f32 %v5671_v23, %v2668_v51 }
 0x541   : > { %2737 = vadd.xlane.f32.xlu2 %v5834_v54  ;;  %v2834_v8 = vmul.f32 %v5831_v52, %v5831_v52 }
 0x543   : > { %2874 = vadd.xlane.f32.xlu1 %v2834_v8 }
 0x544   : > { %v2710_v55 = vpop.xlane.xlu0 %2709 }
 0x545   : > { %v2771_v57 = vmul.f32 %v5747_v31, %v2710_v55 }
 0x546   : > { %v2671_v58 = vpop.f32.mrf.mxu3 }
 0x547   : > { %v5841_v59 = vsub.f32 %v5720_v34, %v2771_v57  ;;  %v5844_v63 = vadd.f32 %v5671_v23, %v2671_v58 }
 0x549   : > { %2739 = vadd.xlane.f32.xlu0 %v5844_v63  ;;  %v2835_v12 = vmul.f32 %v5841_v59, %v5841_v59 }
 0x54b   : > { %2876 = vadd.xlane.f32.xlu2 %v2835_v12 }
 0x54c   : > { %v2712_v1 = vpop.xlane.xlu1 %2711 }
 0x54d   : > { %v2772_v2 = vmul.f32 %v5747_v31, %v2712_v1 }
 0x54e   : > { %v2673_v4 = vpop.f32.mrf.mxu3 }
 0x54f   : > { %v5851_v27 = vsub.f32 %v5724_v38, %v2772_v2  ;;  %v5854_v7 = vadd.f32 %v5671_v23, %v2673_v4 }
 0x551   : > { %2741 = vadd.xlane.f32.xlu1 %v5854_v7  ;;  %v2836_v34 = vmul.f32 %v5851_v27, %v5851_v27 }
 0x553   : > { %2878 = vadd.xlane.f32.xlu0 %v2836_v34 }
 0x554   : > { %v2714_v9 = vpop.xlane.xlu2 %2713 }
 0x555   : > { %v2773_v10 = vmul.f32 %v5747_v31, %v2714_v9 }
 0x556   : > { %v2676_v36 = vpop.f32.mrf.mxu3 }
 0x557   : > { %v5861_v13 = vsub.f32 %v5730_v28, %v2773_v10  ;;  %v5864_v14 = vadd.f32 %v5671_v23, %v2676_v36 }
 0x559   : > { %2743 = vadd.xlane.f32.xlu2 %v5864_v14  ;;  %v2837_v38 = vmul.f32 %v5861_v13, %v5861_v13 }
 0x55b   : > { %2880 = vadd.xlane.f32.xlu1 %v2837_v38 }
 0x55c   : > { %v2716_v15 = vpop.xlane.xlu0 %2715 }
 0x55d   : > { %v2774_v41 = vmul.f32 %v5747_v31, %v2716_v15 }
 0x55e   : > { %v2678_v3 = vpop.f32.mrf.mxu3 }
 0x55f   : > { %v5871_v37 = vsub.f32 %v5734_v39, %v2774_v41  ;;  %v5874_v18 = vadd.f32 %v5671_v23, %v2678_v3 }
 0x561   : > { %2745 = vadd.xlane.f32.xlu0 %v5874_v18  ;;  %v2838_v28 = vmul.f32 %v5871_v37, %v5871_v37 }
 0x563   : > { %2882 = vadd.xlane.f32.xlu2 %v2838_v28 }
 0x564   : > { %v2718_v49 = vpop.xlane.xlu1 %2717 }
 0x565   : > { %v2775_v21 = vmul.f32 %v5747_v31, %v2718_v49 }
 0x566   : > { %v2681_v22 = vpop.f32.mrf.mxu3 }
 0x567   : > { %v5881_v24 = vsub.f32 %v5740_v50, %v2775_v21  ;;  %v5884_v53 = vadd.f32 %v5671_v23, %v2681_v22 }
 0x569   : > { %2747 = vadd.xlane.f32.xlu1 %v5884_v53  ;;  %v2839_v39 = vmul.f32 %v5881_v24, %v5881_v24 }
 0x56b   : > { %2884 = vadd.xlane.f32.xlu0 %v2839_v39 }
 0x56c   : > { %v2720_v30 = vpop.xlane.xlu2 %2719 }
 0x56e   : > { %v2683_v32 = vpop.f32.mrf.mxu3 }
 0x56f   : > { %v5890_v33 = vadd.f32 %v5671_v23, %v2683_v32 }
 0x571   : > { %2749 = vadd.xlane.f32.xlu2 %v5890_v33 }
 0x574   : > { %v2722_v60 = vpop.xlane.xlu0 %2721 }
 0x575   : > { %v2777_v50 = vmul.f32 %v5747_v31, %v2722_v60 }
 0x576   : > { %v2686_v40 = vpop.f32.mrf.mxu3  ;;  %v2859_v42 = vpop.xlane.xlu2 %2858 }
 0x577   : > { %v5895_v44 = vsub.f32 %v5754_v62, %v2777_v50  ;;  %v5898_v0 = vadd.f32 %v5671_v23, %v2686_v40  ;;  %v2922_v47 = vmul.f32 %v2859_v42, %v5747_v31  ;;  %v2776_v62 = vmul.f32 %v5747_v31, %v2720_v30  ;;  %v5926_v30 = vld [vmem:[%s6380_s23] ss:$0 sm:$0xff] }
 0x578   : > { %v5934_v42 = vld [vmem:[%s6382_s18] ss:$0 sm:$0xff] }
 0x579   : > { %v2954_v48 = vadd.f32 1e-05, %v2922_v47  ;;  %2751 = vadd.xlane.f32.xlu0 %v5898_v0  ;;  %v2841_v51 = vmul.f32 %v5895_v44, %v5895_v44  ;;  %v5917_v36 = vsub.f32 %v5744_v56, %v2776_v62 }
 0x57b   : > { %4373 = vrsqrt.f32 %v2954_v48  ;;  %2888 = vadd.xlane.f32.xlu2 %v2841_v51  ;;  %v2840_v28 = vmul.f32 %v5917_v36, %v5917_v36  ;;  %vm2992_vm2 = vweird.f32 %v2954_v48 }
 0x57c   : > { %v2724_v8 = vpop.xlane.xlu1 %2723 }
 0x57d   : > { %v2778_v55 = vmul.f32 %v5747_v31, %v2724_v8 }
 0x57e   : > { %v2688_v57 = vpop.f32.mrf.mxu3  ;;  %v2861_v58 = vpop.xlane.xlu0 %2860 }
 0x57f   : > { %v5907_v12 = vsub.f32 %v5764_v6, %v2778_v55  ;;  %v5910_v1 = vadd.f32 %v5671_v23, %v2688_v57  ;;  %v2923_v2 = vmul.f32 %v2861_v58, %v5747_v31 }
 0x581   : > { %v4374_v4 = vpop.eup %4373  ;;  %v2955_v34 = vadd.f32 1e-05, %v2923_v2  ;;  %2753 = vadd.xlane.f32.xlu1 %v5910_v1  ;;  %v2842_v9 = vmul.f32 %v5907_v12, %v5907_v12 }
 0x582   : > { %v2987_v10 = vmul.f32 %v4374_v4, %v2954_v48  ;;  %vm2993_vm1 = vweird.f32 %v4374_v4 }
 0x583   : > { %4375 = vrsqrt.f32 %v2955_v34  ;;  %2890 = vadd.xlane.f32.xlu0 %v2842_v9  ;;  %vm2994_vm3 = vmor %vm2992_vm2, %vm2993_vm1  ;;  %vm3002_vm5 = vweird.f32 %v2955_v34 }
 0x584   : > { %v2988_v6 = vmul.f32 %v4374_v4, %v2987_v10  ;;  %v2726_v38 = vpop.xlane.xlu2 %2725 }
 0x585   : > { %v2779_v41 = vmul.f32 %v5747_v31, %v2726_v38 }
 0x586   : > { %v2989_v15 = vmul.f32 0.5, %v2988_v6  ;;  %v2863_v23 = vpop.xlane.xlu1 %2862 }
 0x587   : > { %v2924_v3 = vmul.f32 %v2863_v23, %v5747_v31  ;;  %v5929_v32 = vsub.f32 %v5774_v25, %v2779_v41 }
 0x588   : > { %v2990_v49 = vsub.f32 1.5, %v2989_v15 }
 0x589   : > { %v4376_v21 = vpop.eup %4375  ;;  %v2956_v22 = vadd.f32 1e-05, %v2924_v3  ;;  %2886 = vadd.xlane.f32.xlu1 %v2840_v28  ;;  %v2843_v58 = vmul.f32 %v5929_v32, %v5929_v32 }
 0x58a   : > { %v2991_v56 = vmul.f32 %v4374_v4, %v2990_v49  ;;  %v2997_v39 = vmul.f32 %v4376_v21, %v2955_v34  ;;  %vm3003_vm4 = vweird.f32 %v4376_v21 }
 0x58b   : > { %4377 = vrsqrt.f32 %v2956_v22  ;;  %vm3004_vm6 = vmor %vm3002_vm5, %vm3003_vm4  ;;  %vm3012_vm8 = vweird.f32 %v2956_v22 }
 0x58c   : > { %v2995_v60 = vsel %vm2994_vm3, %v4374_v4, %v2991_v56  ;;  %v2998_v50 = vmul.f32 %v4376_v21, %v2997_v39  ;;  %v2728_v40 = vpop.xlane.xlu0 %2727 }
 0x58d   : > { %v3306_v47 = vmul.f32 %v2995_v60, %v5751_v61  ;;  %v2780_v48 = vmul.f32 %v5747_v31, %v2728_v40 }
 0x58e   : > { %v2999_v51 = vmul.f32 0.5, %v2998_v50  ;;  %v2865_v8 = vpop.xlane.xlu2 %2864 }
 0x58f   : > { %v3342_v55 = vmul.f32 %v5926_v30, %v3306_v47  ;;  %v5940_v25 = vsub.f32 %v5784_v17, %v2780_v48  ;;  %v2925_v57 = vmul.f32 %v2865_v8, %v5747_v31 }
 0x590   : > { %v3000_v62 = vsub.f32 1.5, %v2999_v51 }
 0x591   : > { %v4378_v2 = vpop.eup %4377  ;;  %v3378_v61 = vadd.f32 %v5934_v42, %v3342_v55  ;;  %v2957_v4 = vadd.f32 1e-05, %v2925_v57  ;;  %2892 = vadd.xlane.f32.xlu1 %v2843_v58  ;;  %v2844_v9 = vmul.f32 %v5940_v25, %v5940_v25 }
 0x592   : > { %v3001_v10 = vmul.f32 %v4376_v21, %v3000_v62  ;;  %v3007_v6 = vmul.f32 %v4378_v2, %v2956_v22  ;;  %vm3013_vm7 = vweird.f32 %v4378_v2 }
 0x593   : > { %3410 = vst [vmem:[%s5298_s13] sm:$0xff] %v3378_v61  ;;  %4379 = vrsqrt.f32 %v2957_v4  ;;  %2894 = vadd.xlane.f32.xlu2 %v2844_v9  ;;  %vm3014_vm9 = vmor %vm3012_vm8, %vm3013_vm7  ;;  %vm3022_vm11 = vweird.f32 %v2957_v4 }
 0x594   : > { %v3005_v17 = vsel %vm3004_vm6, %v4376_v21, %v3001_v10  ;;  %v3008_v38 = vmul.f32 %v4378_v2, %v3007_v6  ;;  %v2730_v15 = vpop.xlane.xlu1 %2729 }
 0x595   : > { %v3307_v23 = vmul.f32 %v3005_v17, %v5761_v5  ;;  %v2781_v41 = vmul.f32 %v5747_v31, %v2730_v15 }
 0x596   : > { %v3009_v3 = vmul.f32 0.5, %v3008_v38  ;;  %v2867_v28 = vpop.xlane.xlu0 %2866 }
 0x597   : > { %v3343_v49 = vmul.f32 %v5926_v30, %v3307_v23  ;;  %v5953_v56 = vsub.f32 %v5794_v20, %v2781_v41  ;;  %v2926_v34 = vmul.f32 %v2867_v28, %v5747_v31 }
 0x598   : > { %v3010_v39 = vsub.f32 1.5, %v3009_v3 }
 0x599   : > { %v4380_v60 = vpop.eup %4379  ;;  %v3379_v21 = vadd.f32 %v5934_v42, %v3343_v49  ;;  %v2958_v50 = vadd.f32 1e-05, %v2926_v34  ;;  %v2845_v5 = vmul.f32 %v5953_v56, %v5953_v56 }
 0x59a   : > { %v3011_v40 = vmul.f32 %v4378_v2, %v3010_v39  ;;  %v3017_v47 = vmul.f32 %v4380_v60, %v2957_v4  ;;  %vm3023_vm10 = vweird.f32 %v4380_v60 }
 0x59b   : > { %3411 = vst [vmem:[%s5298_s13 + $0x8] sm:$0xff] %v3379_v21  ;;  %4381 = vrsqrt.f32 %v2958_v50  ;;  %2896 = vadd.xlane.f32.xlu0 %v2845_v5  ;;  %vm3024_vm12 = vmor %vm3022_vm11, %vm3023_vm10  ;;  %vm3032_vm14 = vweird.f32 %v2958_v50 }
 0x59c   : > { %v3015_v20 = vsel %vm3014_vm9, %v4378_v2, %v3011_v40  ;;  %v3018_v48 = vmul.f32 %v4380_v60, %v3017_v47  ;;  %v2732_v51 = vpop.xlane.xlu2 %2731 }
 0x59d   : > { %v3308_v8 = vmul.f32 %v3015_v20, %v5771_v11  ;;  %v2782_v55 = vmul.f32 %v5747_v31, %v2732_v51 }
 0x59e   : > { %v3019_v57 = vmul.f32 0.5, %v3018_v48  ;;  %v2869_v58 = vpop.xlane.xlu1 %2868 }
 0x59f   : > { %v3344_v62 = vmul.f32 %v5926_v30, %v3308_v8  ;;  %v5964_v61 = vsub.f32 %v5804_v29, %v2782_v55  ;;  %v2927_v22 = vmul.f32 %v2869_v58, %v5747_v31 }
 0x5a0   : > { %v3020_v9 = vsub.f32 1.5, %v3019_v57 }
 0x5a1   : > { %v4382_v10 = vpop.eup %4381  ;;  %v3380_v2 = vadd.f32 %v5934_v42, %v3344_v62  ;;  %v2959_v6 = vadd.f32 1e-05, %v2927_v22  ;;  %v2846_v11 = vmul.f32 %v5964_v61, %v5964_v61 }
 0x5a2   : > { %v3021_v17 = vmul.f32 %v4380_v60, %v3020_v9  ;;  %v3027_v38 = vmul.f32 %v4382_v10, %v2958_v50  ;;  %vm3033_vm13 = vweird.f32 %v4382_v10 }
 0x5a3   : > { %3412 = vst [vmem:[%s5298_s13 + $0x10] sm:$0xff] %v3380_v2  ;;  %4383 = vrsqrt.f32 %v2959_v6  ;;  %2898 = vadd.xlane.f32.xlu1 %v2846_v11  ;;  %vm3034_vm15 = vmor %vm3032_vm14, %vm3033_vm13  ;;  %vm3042_vm1 = vweird.f32 %v2959_v6 }
 0x5a4   : > { %v3025_v29 = vsel %vm3024_vm12, %v4380_v60, %v3021_v17  ;;  %v3028_v15 = vmul.f32 %v4382_v10, %v3027_v38  ;;  %v2734_v23 = vpop.xlane.xlu0 %2733 }
 0x5a5   : > { %v3309_v41 = vmul.f32 %v3025_v29, %v5781_v16  ;;  %v2783_v3 = vmul.f32 %v5747_v31, %v2734_v23 }
 0x5a6   : > { %v3029_v28 = vmul.f32 0.5, %v3028_v15  ;;  %v2871_v49 = vpop.xlane.xlu2 %2870 }
 0x5a7   : > { %v3345_v34 = vmul.f32 %v5926_v30, %v3309_v41  ;;  %v5975_v39 = vsub.f32 %v5814_v43, %v2783_v3  ;;  %v2928_v4 = vmul.f32 %v2871_v49, %v5747_v31 }
 0x5a8   : > { %v3030_v21 = vsub.f32 1.5, %v3029_v28 }
 0x5a9   : > { %v4384_v5 = vpop.eup %4383  ;;  %v3381_v60 = vadd.f32 %v5934_v42, %v3345_v34  ;;  %v2960_v40 = vadd.f32 1e-05, %v2928_v4  ;;  %v2847_v16 = vmul.f32 %v5975_v39, %v5975_v39 }
 0x5aa   : > { %v3031_v47 = vmul.f32 %v4382_v10, %v3030_v21  ;;  %v3037_v20 = vmul.f32 %v4384_v5, %v2959_v6  ;;  %vm3043_vm0 = vweird.f32 %v4384_v5 }
 0x5ab   : > { %3413 = vst [vmem:[%s5298_s13 + $0x18] sm:$0xff] %v3381_v60  ;;  %4385 = vrsqrt.f32 %v2960_v40  ;;  %2900 = vadd.xlane.f32.xlu2 %v2847_v16  ;;  %vm3044_vm2 = vmor %vm3042_vm1, %vm3043_vm0  ;;  %vm3052_vm4 = vweird.f32 %v2960_v40 }
 0x5ac   : > { %v3035_v43 = vsel %vm3034_vm15, %v4382_v10, %v3031_v47  ;;  %v3038_v48 = vmul.f32 %v4384_v5, %v3037_v20  ;;  %v2736_v51 = vpop.xlane.xlu1 %2735 }
 0x5ad   : > { %v3310_v8 = vmul.f32 %v3035_v43, %v5791_v19  ;;  %v2784_v55 = vmul.f32 %v5747_v31, %v2736_v51 }
 0x5ae   : > { %v3039_v57 = vmul.f32 0.5, %v3038_v48  ;;  %v2873_v58 = vpop.xlane.xlu0 %2872 }
 0x5af   : > { %v3346_v62 = vmul.f32 %v5926_v30, %v3310_v8  ;;  %v5986_v22 = vsub.f32 %v5824_v46, %v2784_v55  ;;  %v2929_v50 = vmul.f32 %v2873_v58, %v5747_v31 }
 0x5b0   : > { %v3040_v9 = vsub.f32 1.5, %v3039_v57 }
 0x5b1   : > { %v4386_v2 = vpop.eup %4385  ;;  %v3382_v10 = vadd.f32 %v5934_v42, %v3346_v62  ;;  %v2961_v11 = vadd.f32 1e-05, %v2929_v50  ;;  %v2848_v19 = vmul.f32 %v5986_v22, %v5986_v22 }
 0x5b2   : > { %v3041_v17 = vmul.f32 %v4384_v5, %v3040_v9  ;;  %v3047_v38 = vmul.f32 %v4386_v2, %v2960_v40  ;;  %vm3053_vm3 = vweird.f32 %v4386_v2 }
 0x5b3   : > { %3414 = vst [vmem:[%s5298_s13 + $0x20] sm:$0xff] %v3382_v10  ;;  %4387 = vrsqrt.f32 %v2961_v11  ;;  %2902 = vadd.xlane.f32.xlu0 %v2848_v19  ;;  %vm3054_vm5 = vmor %vm3052_vm4, %vm3053_vm3  ;;  %vm3062_vm7 = vweird.f32 %v2961_v11 }
 0x5b4   : > { %v3045_v46 = vsel %vm3044_vm2, %v4384_v5, %v3041_v17  ;;  %v3048_v29 = vmul.f32 %v4386_v2, %v3047_v38  ;;  %v2738_v15 = vpop.xlane.xlu2 %2737 }
 0x5b5   : > { %v3311_v23 = vmul.f32 %v3045_v46, %v5801_v26  ;;  %v2785_v41 = vmul.f32 %v5747_v31, %v2738_v15 }
 0x5b6   : > { %v3049_v3 = vmul.f32 0.5, %v3048_v29  ;;  %v2875_v28 = vpop.xlane.xlu1 %2874 }
 0x5b7   : > { %v3347_v49 = vmul.f32 %v5926_v30, %v3311_v23  ;;  %v5997_v34 = vsub.f32 %v5834_v54, %v2785_v41  ;;  %v2930_v6 = vmul.f32 %v2875_v28, %v5747_v31 }
 0x5b8   : > { %v3050_v4 = vsub.f32 1.5, %v3049_v3 }
 0x5b9   : > { %v4388_v21 = vpop.eup %4387  ;;  %v3383_v5 = vadd.f32 %v5934_v42, %v3347_v49  ;;  %v2962_v60 = vadd.f32 1e-05, %v2930_v6  ;;  %v2849_v26 = vmul.f32 %v5997_v34, %v5997_v34 }
 0x5ba   : > { %v3051_v16 = vmul.f32 %v4386_v2, %v3050_v4  ;;  %v3057_v47 = vmul.f32 %v4388_v21, %v2961_v11  ;;  %vm3063_vm6 = vweird.f32 %v4388_v21 }
 0x5bb   : > { %3415 = vst [vmem:[%s5298_s13 + $0x28] sm:$0xff] %v3383_v5  ;;  %4389 = vrsqrt.f32 %v2962_v60  ;;  %2904 = vadd.xlane.f32.xlu1 %v2849_v26  ;;  %vm3064_vm8 = vmor %vm3062_vm7, %vm3063_vm6  ;;  %vm3072_vm10 = vweird.f32 %v2962_v60 }
 0x5bc   : > { %v3055_v54 = vsel %vm3054_vm5, %v4386_v2, %v3051_v16  ;;  %v3058_v20 = vmul.f32 %v4388_v21, %v3057_v47  ;;  %v2740_v43 = vpop.xlane.xlu0 %2739 }
 0x5bd   : > { %v3312_v48 = vmul.f32 %v3055_v54, %v5811_v35  ;;  %v2786_v51 = vmul.f32 %v5747_v31, %v2740_v43 }
 0x5be   : > { %v3059_v8 = vmul.f32 0.5, %v3058_v20  ;;  %v2877_v55 = vpop.xlane.xlu2 %2876 }
 0x5bf   : > { %v3348_v57 = vmul.f32 %v5926_v30, %v3312_v48  ;;  %v6008_v58 = vsub.f32 %v5844_v63, %v2786_v51  ;;  %v2931_v40 = vmul.f32 %v2877_v55, %v5747_v31 }
 0x5c0   : > { %v3060_v62 = vsub.f32 1.5, %v3059_v8 }
 0x5c1   : > { %v4390_v50 = vpop.eup %4389  ;;  %v3384_v9 = vadd.f32 %v5934_v42, %v3348_v57  ;;  %v2963_v2 = vadd.f32 1e-05, %v2931_v40  ;;  %v2850_v35 = vmul.f32 %v6008_v58, %v6008_v58 }
 0x5c2   : > { %v3061_v10 = vmul.f32 %v4388_v21, %v3060_v62  ;;  %v3067_v19 = vmul.f32 %v4390_v50, %v2962_v60  ;;  %vm3073_vm9 = vweird.f32 %v4390_v50 }
 0x5c3   : > { %3416 = vst [vmem:[%s5298_s13 + $0x30] sm:$0xff] %v3384_v9  ;;  %4391 = vrsqrt.f32 %v2963_v2  ;;  %2906 = vadd.xlane.f32.xlu2 %v2850_v35  ;;  %vm3074_vm11 = vmor %vm3072_vm10, %vm3073_vm9  ;;  %vm3082_vm13 = vweird.f32 %v2963_v2 }
 0x5c4   : > { %v3065_v63 = vsel %vm3064_vm8, %v4388_v21, %v3061_v10  ;;  %v3068_v17 = vmul.f32 %v4390_v50, %v3067_v19  ;;  %v2742_v38 = vpop.xlane.xlu1 %2741 }
 0x5c5   : > { %v3313_v46 = vmul.f32 %v3065_v63, %v5821_v45  ;;  %v2787_v29 = vmul.f32 %v5747_v31, %v2742_v38 }
 0x5c6   : > { %v3069_v15 = vmul.f32 0.5, %v3068_v17  ;;  %v2879_v23 = vpop.xlane.xlu0 %2878 }
 0x5c7   : > { %v3349_v41 = vmul.f32 %v5926_v30, %v3313_v46  ;;  %v6019_v3 = vsub.f32 %v5854_v7, %v2787_v29  ;;  %v2932_v11 = vmul.f32 %v2879_v23, %v5747_v31 }
 0x5c8   : > { %v3070_v28 = vsub.f32 1.5, %v3069_v15 }
 0x5c9   : > { %v4392_v49 = vpop.eup %4391  ;;  %v3385_v6 = vadd.f32 %v5934_v42, %v3349_v41  ;;  %v2964_v4 = vadd.f32 1e-05, %v2932_v11  ;;  %v2851_v45 = vmul.f32 %v6019_v3, %v6019_v3 }
 0x5ca   : > { %v3071_v21 = vmul.f32 %v4390_v50, %v3070_v28  ;;  %v3077_v5 = vmul.f32 %v4392_v49, %v2963_v2  ;;  %vm3083_vm12 = vweird.f32 %v4392_v49 }
 0x5cb   : > { %3417 = vst [vmem:[%s5298_s13 + $0x38] sm:$0xff] %v3385_v6  ;;  %4393 = vrsqrt.f32 %v2964_v4  ;;  %2908 = vadd.xlane.f32.xlu0 %v2851_v45  ;;  %vm3084_vm14 = vmor %vm3082_vm13, %vm3083_vm12  ;;  %vm3092_vm0 = vweird.f32 %v2964_v4 }
 0x5cc   : > { %v3075_v7 = vsel %vm3074_vm11, %v4390_v50, %v3071_v21  ;;  %v3078_v26 = vmul.f32 %v4392_v49, %v3077_v5  ;;  %v2744_v16 = vpop.xlane.xlu2 %2743 }
 0x5cd   : > { %v3314_v47 = vmul.f32 %v3075_v7, %v5831_v52  ;;  %v2788_v54 = vmul.f32 %v5747_v31, %v2744_v16 }
 0x5ce   : > { %v3079_v20 = vmul.f32 0.5, %v3078_v26  ;;  %v2881_v43 = vpop.xlane.xlu1 %2880 }
 0x5cf   : > { %v3350_v48 = vmul.f32 %v5926_v30, %v3314_v47  ;;  %v6030_v51 = vsub.f32 %v5864_v14, %v2788_v54  ;;  %v2933_v60 = vmul.f32 %v2881_v43, %v5747_v31 }
 0x5d0   : > { %v3080_v8 = vsub.f32 1.5, %v3079_v20 }
 0x5d1   : > { %v4394_v55 = vpop.eup %4393  ;;  %v3386_v57 = vadd.f32 %v5934_v42, %v3350_v48  ;;  %v2965_v40 = vadd.f32 1e-05, %v2933_v60  ;;  %v2852_v52 = vmul.f32 %v6030_v51, %v6030_v51 }
 0x5d2   : > { %v3081_v62 = vmul.f32 %v4392_v49, %v3080_v8  ;;  %v3087_v50 = vmul.f32 %v4394_v55, %v2964_v4  ;;  %vm3093_vm15 = vweird.f32 %v4394_v55 }
 0x5d3   : > { %3418 = vst [vmem:[%s5298_s13 + $0x40] sm:$0xff] %v3386_v57  ;;  %4395 = vrsqrt.f32 %v2965_v40  ;;  %2910 = vadd.xlane.f32.xlu1 %v2852_v52  ;;  %vm3094_vm1 = vmor %vm3092_vm0, %vm3093_vm15  ;;  %vm3102_vm3 = vweird.f32 %v2965_v40 }
 0x5d4   : > { %v3085_v14 = vsel %vm3084_vm14, %v4392_v49, %v3081_v62  ;;  %v3088_v9 = vmul.f32 %v4394_v55, %v3087_v50  ;;  %v2746_v35 = vpop.xlane.xlu0 %2745 }
 0x5d5   : > { %v3315_v10 = vmul.f32 %v3085_v14, %v5841_v59  ;;  %v2789_v19 = vmul.f32 %v5747_v31, %v2746_v35 }
 0x5d6   : > { %v3089_v63 = vmul.f32 0.5, %v3088_v9  ;;  %v2883_v17 = vpop.xlane.xlu2 %2882 }
 0x5d7   : > { %v3351_v38 = vmul.f32 %v5926_v30, %v3315_v10  ;;  %v6041_v46 = vsub.f32 %v5874_v18, %v2789_v19  ;;  %v2934_v2 = vmul.f32 %v2883_v17, %v5747_v31 }
 0x5d8   : > { %v3090_v29 = vsub.f32 1.5, %v3089_v63 }
 0x5d9   : > { %v4396_v15 = vpop.eup %4395  ;;  %v3387_v23 = vadd.f32 %v5934_v42, %v3351_v38  ;;  %v2966_v41 = vadd.f32 1e-05, %v2934_v2  ;;  %v2853_v59 = vmul.f32 %v6041_v46, %v6041_v46 }
 0x5da   : > { %v3091_v11 = vmul.f32 %v4394_v55, %v3090_v29  ;;  %v3097_v28 = vmul.f32 %v4396_v15, %v2965_v40  ;;  %vm3103_vm2 = vweird.f32 %v4396_v15 }
 0x5db   : > { %3419 = vst [vmem:[%s5298_s13 + $0x48] sm:$0xff] %v3387_v23  ;;  %4397 = vrsqrt.f32 %v2966_v41  ;;  %2912 = vadd.xlane.f32.xlu2 %v2853_v59  ;;  %vm3104_vm4 = vmor %vm3102_vm3, %vm3103_vm2  ;;  %vm3112_vm6 = vweird.f32 %v2966_v41 }
 0x5dc   : > { %v3095_v18 = vsel %vm3094_vm1, %v4394_v55, %v3091_v11  ;;  %v3098_v49 = vmul.f32 %v4396_v15, %v3097_v28  ;;  %v2748_v6 = vpop.xlane.xlu1 %2747 }
 0x5dd   : > { %v3316_v45 = vmul.f32 %v3095_v18, %v5851_v27  ;;  %v2790_v21 = vmul.f32 %v5747_v31, %v2748_v6 }
 0x5de   : > { %v3099_v5 = vmul.f32 0.5, %v3098_v49  ;;  %v2885_v7 = vpop.xlane.xlu0 %2884 }
 0x5df   : > { %v3352_v26 = vmul.f32 %v5926_v30, %v3316_v45  ;;  %v6052_v16 = vsub.f32 %v5884_v53, %v2790_v21  ;;  %v2935_v4 = vmul.f32 %v2885_v7, %v5747_v31 }
 0x5e0   : > { %v3100_v47 = vsub.f32 1.5, %v3099_v5 }
 0x5e1   : > { %v4398_v54 = vpop.eup %4397  ;;  %v3388_v20 = vadd.f32 %v5934_v42, %v3352_v26  ;;  %v2967_v43 = vadd.f32 1e-05, %v2935_v4  ;;  %v2854_v27 = vmul.f32 %v6052_v16, %v6052_v16 }
 0x5e2   : > { %v3101_v48 = vmul.f32 %v4396_v15, %v3100_v47  ;;  %v3107_v60 = vmul.f32 %v4398_v54, %v2966_v41  ;;  %vm3113_vm5 = vweird.f32 %v4398_v54 }
 0x5e3   : > { %3420 = vst [vmem:[%s5298_s13 + $0x50] sm:$0xff] %v3388_v20  ;;  %4399 = vrsqrt.f32 %v2967_v43  ;;  %2914 = vadd.xlane.f32.xlu0 %v2854_v27  ;;  %vm3114_vm7 = vmor %vm3112_vm6, %vm3113_vm5  ;;  %vm3122_vm9 = vweird.f32 %v2967_v43 }
 0x5e4   : > { %v3105_v53 = vsel %vm3104_vm4, %v4396_v15, %v3101_v48  ;;  %v3108_v8 = vmul.f32 %v4398_v54, %v3107_v60  ;;  %v2750_v55 = vpop.xlane.xlu2 %2749 }
 0x5e5   : > { %v3317_v57 = vmul.f32 %v3105_v53, %v5861_v13  ;;  %v2791_v52 = vmul.f32 %v5747_v31, %v2750_v55 }
 0x5e6   : > { %v3109_v62 = vmul.f32 0.5, %v3108_v8 }
 0x5e7   : > { %v3353_v50 = vmul.f32 %v5926_v30, %v3317_v57  ;;  %v6063_v14 = vsub.f32 %v5890_v33, %v2791_v52 }
 0x5e8   : > { %v3110_v40 = vsub.f32 1.5, %v3109_v62 }
 0x5e9   : > { %v4400_v9 = vpop.eup %4399  ;;  %v3389_v35 = vadd.f32 %v5934_v42, %v3353_v50  ;;  %v2855_v10 = vmul.f32 %v6063_v14, %v6063_v14 }
 0x5ea   : > { %v3111_v19 = vmul.f32 %v4398_v54, %v3110_v40  ;;  %v3117_v63 = vmul.f32 %v4400_v9, %v2967_v43  ;;  %vm3123_vm8 = vweird.f32 %v4400_v9 }
 0x5eb   : > { %3421 = vst [vmem:[%s5298_s13 + $0x58] sm:$0xff] %v3389_v35  ;;  %2916 = vadd.xlane.f32.xlu1 %v2855_v10  ;;  %vm3124_vm10 = vmor %vm3122_vm9, %vm3123_vm8 }
 0x5ec   : > { %v3115_v13 = vsel %vm3114_vm7, %v4398_v54, %v3111_v19  ;;  %v3118_v17 = vmul.f32 %v4400_v9, %v3117_v63  ;;  %v2752_v38 = vpop.xlane.xlu0 %2751 }
 0x5ed   : > { %v3318_v33 = vmul.f32 %v3115_v13, %v5871_v37  ;;  %v2792_v2 = vmul.f32 %v5747_v31, %v2752_v38 }
 0x5ee   : > { %v3119_v29 = vmul.f32 0.5, %v3118_v17  ;;  %v2889_v15 = vpop.xlane.xlu2 %2888 }
 0x5ef   : > { %v3354_v23 = vmul.f32 %v5926_v30, %v3318_v33  ;;  %v6073_v59 = vsub.f32 %v5898_v0, %v2792_v2  ;;  %v2937_v41 = vmul.f32 %v2889_v15, %v5747_v31 }
 0x5f0   : > { %v3120_v11 = vsub.f32 1.5, %v3119_v29 }
 0x5f1   : > { %v3390_v28 = vadd.f32 %v5934_v42, %v3354_v23  ;;  %v2969_v18 = vadd.f32 1e-05, %v2937_v41  ;;  %v2856_v49 = vmul.f32 %v6073_v59, %v6073_v59 }
 0x5f2   : > { %v3121_v37 = vmul.f32 %v4400_v9, %v3120_v11 }
 0x5f3   : > { %3422 = vst [vmem:[%s5298_s13 + $0x60] sm:$0xff] %v3390_v28  ;;  %4401 = vrsqrt.f32 %v2969_v18  ;;  %2918 = vadd.xlane.f32.xlu2 %v2856_v49  ;;  %vm3142_vm12 = vweird.f32 %v2969_v18 }
 0x5f4   : > { %v3125_v6 = vsel %vm3124_vm10, %v4400_v9, %v3121_v37  ;;  %v2754_v0 = vpop.xlane.xlu1 %2753 }
 0x5f5   : > { %v3319_v45 = vmul.f32 %v3125_v6, %v5881_v24  ;;  %v2793_v21 = vmul.f32 %v5747_v31, %v2754_v0 }
 0x5f6   : > { %v2891_v5 = vpop.xlane.xlu0 %2890 }
 0x5f7   : > { %v3355_v7 = vmul.f32 %v5926_v30, %v3319_v45  ;;  %v6084_v26 = vsub.f32 %v5910_v1, %v2793_v21  ;;  %v2938_v4 = vmul.f32 %v2891_v5, %v5747_v31 }
 0x5f9   : > { %v4402_v47 = vpop.eup %4401  ;;  %v3391_v54 = vadd.f32 %v5934_v42, %v3355_v7  ;;  %v2970_v20 = vadd.f32 1e-05, %v2938_v4  ;;  %v2857_v43 = vmul.f32 %v6084_v26, %v6084_v26 }
 0x5fa   : > { %v3137_v27 = vmul.f32 %v4402_v47, %v2969_v18  ;;  %vm3143_vm11 = vweird.f32 %v4402_v47 }
 0x5fb   : > { %3423 = vst [vmem:[%s5298_s13 + $0x68] sm:$0xff] %v3391_v54  ;;  %4403 = vrsqrt.f32 %v2970_v20  ;;  %2920 = vadd.xlane.f32.xlu0 %v2857_v43  ;;  %vm3144_vm13 = vmor %vm3142_vm12, %vm3143_vm11  ;;  %vm3152_vm15 = vweird.f32 %v2970_v20 }
 0x5fc   : > { %v3138_v24 = vmul.f32 %v4402_v47, %v3137_v27  ;;  %v2887_v48 = vpop.xlane.xlu1 %2886 }
 0x5fd   : > { %v2936_v60 = vmul.f32 %v2887_v48, %v5747_v31 }
 0x5fe   : > { %v3139_v53 = vmul.f32 0.5, %v3138_v24 }
 0x5ff   : > { %v2968_v1 = vadd.f32 1e-05, %v2936_v60 }
 0x600   : > { %v3140_v8 = vsub.f32 1.5, %v3139_v53 }
 0x601   : > { %v4404_v55 = vpop.eup %4403  ;;  %4405 = vrsqrt.f32 %v2968_v1  ;;  %vm3132_vm2 = vweird.f32 %v2968_v1 }
 0x602   : > { %v3141_v57 = vmul.f32 %v4402_v47, %v3140_v8  ;;  %v3147_v52 = vmul.f32 %v4404_v55, %v2970_v20  ;;  %vm3153_vm14 = vweird.f32 %v4404_v55 }
 0x603   : > { %vm3154_vm0 = vmor %vm3152_vm15, %vm3153_vm14 }
 0x604   : > { %v3145_v62 = vsel %vm3144_vm13, %v4402_v47, %v3141_v57  ;;  %v3148_v50 = vmul.f32 %v4404_v55, %v3147_v52  ;;  %v2893_v40 = vpop.xlane.xlu1 %2892 }
 0x605   : > { %v3321_v9 = vmul.f32 %v3145_v62, %v5895_v44  ;;  %v2939_v35 = vmul.f32 %v2893_v40, %v5747_v31 }
 0x606   : > { %v3149_v10 = vmul.f32 0.5, %v3148_v50  ;;  %v2895_v19 = vpop.xlane.xlu2 %2894 }
 0x607   : > { %v4406_v63 = vpop.eup %4405  ;;  %v3357_v13 = vmul.f32 %v5926_v30, %v3321_v9  ;;  %v2971_v17 = vadd.f32 1e-05, %v2939_v35  ;;  %v2940_v38 = vmul.f32 %v2895_v19, %v5747_v31 }
 0x608   : > { %v3150_v33 = vsub.f32 1.5, %v3149_v10  ;;  %v3127_v2 = vmul.f32 %v4406_v63, %v2968_v1  ;;  %vm3133_vm1 = vweird.f32 %v4406_v63 }
 0x609   : > { %v3393_v29 = vadd.f32 %v5934_v42, %v3357_v13  ;;  %4407 = vrsqrt.f32 %v2971_v17  ;;  %v2972_v15 = vadd.f32 1e-05, %v2940_v38  ;;  %vm3134_vm3 = vmor %vm3132_vm2, %vm3133_vm1  ;;  %vm3162_vm5 = vweird.f32 %v2971_v17 }
 0x60a   : > { %v3151_v23 = vmul.f32 %v4404_v55, %v3150_v33  ;;  %v3128_v44 = vmul.f32 %v4406_v63, %v3127_v2 }
 0x60b   : > { %3425 = vst [vmem:[%s5298_s13 + $0x78] sm:$0xff] %v3393_v29  ;;  %4409 = vrsqrt.f32 %v2972_v15  ;;  %vm3172_vm8 = vweird.f32 %v2972_v15 }
 0x60c   : > { %v3155_v41 = vsel %vm3154_vm0, %v4404_v55, %v3151_v23  ;;  %v3129_v11 = vmul.f32 0.5, %v3128_v44 }
 0x60d   : > { %v3322_v28 = vmul.f32 %v3155_v41, %v5907_v12 }
 0x60e   : > { %v3130_v18 = vsub.f32 1.5, %v3129_v11  ;;  %v2897_v49 = vpop.xlane.xlu0 %2896 }
 0x60f   : > { %v4408_v37 = vpop.eup %4407  ;;  %v3358_v6 = vmul.f32 %v5926_v30, %v3322_v28  ;;  %v2941_v0 = vmul.f32 %v2897_v49, %v5747_v31 }
 0x610   : > { %v3131_v45 = vmul.f32 %v4406_v63, %v3130_v18  ;;  %v3157_v21 = vmul.f32 %v4408_v37, %v2971_v17  ;;  %vm3163_vm4 = vweird.f32 %v4408_v37 }
 0x611   : > { %v4410_v5 = vpop.eup %4409  ;;  %v3394_v7 = vadd.f32 %v5934_v42, %v3358_v6  ;;  %v2973_v4 = vadd.f32 1e-05, %v2941_v0  ;;  %vm3164_vm7 = vmor %vm3162_vm5, %vm3163_vm4 }
 0x612   : > { %v3135_v47 = vsel %vm3134_vm3, %v4406_v63, %v3131_v45  ;;  %v3158_v54 = vmul.f32 %v4408_v37, %v3157_v21  ;;  %v3167_v12 = vmul.f32 %v4410_v5, %v2972_v15  ;;  %vm3173_vm6 = vweird.f32 %v4410_v5 }
 0x613   : > { %3426 = vst [vmem:[%s5298_s13 + $0x80] sm:$0xff] %v3394_v7  ;;  %v3320_v20 = vmul.f32 %v3135_v47, %v5917_v36  ;;  %4411 = vrsqrt.f32 %v2973_v4  ;;  %vm3174_vm9 = vmor %vm3172_vm8, %vm3173_vm6  ;;  %vm3182_vm11 = vweird.f32 %v2973_v4 }
 0x614   : > { %v3159_v43 = vmul.f32 0.5, %v3158_v54  ;;  %v3168_v27 = vmul.f32 %v4410_v5, %v3167_v12 }
 0x615   : > { %v3356_v24 = vmul.f32 %v5926_v30, %v3320_v20 }
 0x616   : > { %v3160_v48 = vsub.f32 1.5, %v3159_v43  ;;  %v3169_v60 = vmul.f32 0.5, %v3168_v27  ;;  %v2899_v53 = vpop.xlane.xlu1 %2898 }
 0x617   : > { %v3392_v1 = vadd.f32 %v5934_v42, %v3356_v24  ;;  %v2942_v8 = vmul.f32 %v2899_v53, %v5747_v31 }
 0x618   : > { %v3161_v55 = vmul.f32 %v4408_v37, %v3160_v48  ;;  %v3170_v57 = vsub.f32 1.5, %v3169_v60 }
 0x619   : > { %v4412_v52 = vpop.eup %4411  ;;  %3424 = vst [vmem:[%s5298_s13 + $0x70] sm:$0xff] %v3392_v1  ;;  %v2974_v36 = vadd.f32 1e-05, %v2942_v8 }
 0x61a   : > { %v3165_v62 = vsel %vm3164_vm7, %v4408_v37, %v3161_v55  ;;  %v3171_v50 = vmul.f32 %v4410_v5, %v3170_v57  ;;  %v3177_v40 = vmul.f32 %v4412_v52, %v2973_v4  ;;  %vm3183_vm10 = vweird.f32 %v4412_v52 }
 0x61b   : > { %v3323_v9 = vmul.f32 %v3165_v62, %v5929_v32  ;;  %4413 = vrsqrt.f32 %v2974_v36  ;;  %vm3184_vm12 = vmor %vm3182_vm11, %vm3183_vm10  ;;  %vm3192_vm14 = vweird.f32 %v2974_v36 }
 0x61c   : > { %v3175_v35 = vsel %vm3174_vm9, %v4410_v5, %v3171_v50  ;;  %v3178_v10 = vmul.f32 %v4412_v52, %v3177_v40 }
 0x61d   : > { %v3359_v19 = vmul.f32 %v5926_v30, %v3323_v9  ;;  %v3324_v63 = vmul.f32 %v3175_v35, %v5940_v25 }
 0x61e   : > { %v3179_v13 = vmul.f32 0.5, %v3178_v10  ;;  %v2901_v17 = vpop.xlane.xlu2 %2900 }
 0x61f   : > { %v3395_v38 = vadd.f32 %v5934_v42, %v3359_v19  ;;  %v3360_v33 = vmul.f32 %v5926_v30, %v3324_v63  ;;  %v2943_v2 = vmul.f32 %v2901_v17, %v5747_v31 }
 0x620   : > { %v3180_v29 = vsub.f32 1.5, %v3179_v13 }
 0x621   : > { %v4414_v32 = vpop.eup %4413  ;;  %3427 = vst [vmem:[%s5298_s13 + $0x88] sm:$0xff] %v3395_v38  ;;  %v3396_v15 = vadd.f32 %v5934_v42, %v3360_v33  ;;  %v2975_v23 = vadd.f32 1e-05, %v2943_v2 }
 0x622   : > { %v3181_v44 = vmul.f32 %v4412_v52, %v3180_v29  ;;  %v3187_v41 = vmul.f32 %v4414_v32, %v2974_v36  ;;  %vm3193_vm13 = vweird.f32 %v4414_v32 }
 0x623   : > { %3428 = vst [vmem:[%s5298_s13 + $0x90] sm:$0xff] %v3396_v15  ;;  %4415 = vrsqrt.f32 %v2975_v23  ;;  %vm3194_vm15 = vmor %vm3192_vm14, %vm3193_vm13  ;;  %vm3202_vm1 = vweird.f32 %v2975_v23 }
 0x624   : > { %v3185_v25 = vsel %vm3184_vm12, %v4412_v52, %v3181_v44  ;;  %v3188_v11 = vmul.f32 %v4414_v32, %v3187_v41 }
 0x625   : > { %v3325_v28 = vmul.f32 %v3185_v25, %v5953_v56 }
 0x626   : > { %v3189_v18 = vmul.f32 0.5, %v3188_v11  ;;  %v2903_v49 = vpop.xlane.xlu0 %2902 }
 0x627   : > { %v3361_v37 = vmul.f32 %v5926_v30, %v3325_v28  ;;  %v2944_v6 = vmul.f32 %v2903_v49, %v5747_v31 }
 0x628   : > { %v3190_v0 = vsub.f32 1.5, %v3189_v18 }
 0x629   : > { %v4416_v45 = vpop.eup %4415  ;;  %v3397_v21 = vadd.f32 %v5934_v42, %v3361_v37  ;;  %v2976_v5 = vadd.f32 1e-05, %v2944_v6 }
 0x62a   : > { %v3191_v7 = vmul.f32 %v4414_v32, %v3190_v0  ;;  %v3197_v4 = vmul.f32 %v4416_v45, %v2975_v23  ;;  %vm3203_vm0 = vweird.f32 %v4416_v45 }
 0x62b   : > { %3429 = vst [vmem:[%s5298_s13 + $0x98] sm:$0xff] %v3397_v21  ;;  %4417 = vrsqrt.f32 %v2976_v5  ;;  %vm3204_vm2 = vmor %vm3202_vm1, %vm3203_vm0  ;;  %vm3212_vm4 = vweird.f32 %v2976_v5 }
 0x62c   : > { %v3195_v56 = vsel %vm3194_vm15, %v4414_v32, %v3191_v7  ;;  %v3198_v47 = vmul.f32 %v4416_v45, %v3197_v4 }
 0x62d   : > { %v3326_v54 = vmul.f32 %v3195_v56, %v5964_v61 }
 0x62e   : > { %v3199_v12 = vmul.f32 0.5, %v3198_v47  ;;  %v2905_v20 = vpop.xlane.xlu1 %2904 }
 0x62f   : > { %v3362_v43 = vmul.f32 %v5926_v30, %v3326_v54  ;;  %v2945_v27 = vmul.f32 %v2905_v20, %v5747_v31 }
 0x630   : > { %v3200_v24 = vsub.f32 1.5, %v3199_v12  ;;  %v6146_v12 = vld [vmem:[%s6381_s20] ss:$0 sm:$0xff] }
 0x631   : > { %v4418_v48 = vpop.eup %4417  ;;  %v3398_v60 = vadd.f32 %v5934_v42, %v3362_v43  ;;  %v2977_v53 = vadd.f32 1e-05, %v2945_v27 }
 0x632   : > { %v3201_v1 = vmul.f32 %v4416_v45, %v3200_v24  ;;  %v3207_v8 = vmul.f32 %v4418_v48, %v2976_v5  ;;  %vm3213_vm3 = vweird.f32 %v4418_v48  ;;  %v6153_v24 = vld [vmem:[%s6382_s18] ss:$0 sm:$0xff] }
 0x633   : > { %3430 = vst [vmem:[%s5298_s13 + $0xa0] sm:$0xff] %v3398_v60  ;;  %4419 = vrsqrt.f32 %v2977_v53  ;;  %vm3214_vm5 = vmor %vm3212_vm4, %vm3213_vm3  ;;  %vm3222_vm7 = vweird.f32 %v2977_v53 }
 0x634   : > { %v3205_v61 = vsel %vm3204_vm2, %v4416_v45, %v3201_v1  ;;  %v3208_v55 = vmul.f32 %v4418_v48, %v3207_v8 }
 0x635   : > { %v3327_v57 = vmul.f32 %v3205_v61, %v5975_v39 }
 0x636   : > { %v3209_v52 = vmul.f32 0.5, %v3208_v55  ;;  %v2907_v36 = vpop.xlane.xlu2 %2906 }
 0x637   : > { %v3363_v62 = vmul.f32 %v5926_v30, %v3327_v57  ;;  %v2946_v50 = vmul.f32 %v2907_v36, %v5747_v31 }
 0x638   : > { %v3210_v40 = vsub.f32 1.5, %v3209_v52 }
 0x639   : > { %v4420_v9 = vpop.eup %4419  ;;  %v3399_v35 = vadd.f32 %v5934_v42, %v3363_v62  ;;  %v2978_v10 = vadd.f32 1e-05, %v2946_v50 }
 0x63a   : > { %v3211_v19 = vmul.f32 %v4418_v48, %v3210_v40  ;;  %v3217_v63 = vmul.f32 %v4420_v9, %v2977_v53  ;;  %vm3223_vm6 = vweird.f32 %v4420_v9 }
 0x63b   : > { %3431 = vst [vmem:[%s5298_s13 + $0xa8] sm:$0xff] %v3399_v35  ;;  %4421 = vrsqrt.f32 %v2978_v10  ;;  %vm3224_vm8 = vmor %vm3222_vm7, %vm3223_vm6  ;;  %vm3232_vm10 = vweird.f32 %v2978_v10 }
 0x63c   : > { %v3215_v39 = vsel %vm3214_vm5, %v4418_v48, %v3211_v19  ;;  %v3218_v13 = vmul.f32 %v4420_v9, %v3217_v63 }
 0x63d   : > { %v3328_v17 = vmul.f32 %v3215_v39, %v5986_v22 }
 0x63e   : > { %v3219_v38 = vmul.f32 0.5, %v3218_v13  ;;  %v2909_v33 = vpop.xlane.xlu0 %2908 }
 0x63f   : > { %v3364_v2 = vmul.f32 %v5926_v30, %v3328_v17  ;;  %v2947_v29 = vmul.f32 %v2909_v33, %v5747_v31 }
 0x640   : > { %v3220_v32 = vsub.f32 1.5, %v3219_v38 }
 0x641   : > { %v4422_v15 = vpop.eup %4421  ;;  %v3400_v23 = vadd.f32 %v5934_v42, %v3364_v2  ;;  %v2979_v44 = vadd.f32 1e-05, %v2947_v29 }
 0x642   : > { %v3221_v41 = vmul.f32 %v4420_v9, %v3220_v32  ;;  %v3227_v25 = vmul.f32 %v4422_v15, %v2978_v10  ;;  %vm3233_vm9 = vweird.f32 %v4422_v15 }
 0x643   : > { %3432 = vst [vmem:[%s5298_s13 + $0xb0] sm:$0xff] %v3400_v23  ;;  %4423 = vrsqrt.f32 %v2979_v44  ;;  %vm3234_vm11 = vmor %vm3232_vm10, %vm3233_vm9  ;;  %vm3242_vm13 = vweird.f32 %v2979_v44 }
 0x644   : > { %v3225_v22 = vsel %vm3224_vm8, %v4420_v9, %v3221_v41  ;;  %v3228_v11 = vmul.f32 %v4422_v15, %v3227_v25 }
 0x645   : > { %v3329_v28 = vmul.f32 %v3225_v22, %v5997_v34 }
 0x646   : > { %v3229_v18 = vmul.f32 0.5, %v3228_v11  ;;  %v2911_v49 = vpop.xlane.xlu1 %2910 }
 0x647   : > { %v3365_v37 = vmul.f32 %v5926_v30, %v3329_v28  ;;  %v2948_v6 = vmul.f32 %v2911_v49, %v5747_v31 }
 0x648   : > { %v3230_v0 = vsub.f32 1.5, %v3229_v18 }
 0x649   : > { %v4424_v45 = vpop.eup %4423  ;;  %v3401_v21 = vadd.f32 %v5934_v42, %v3365_v37  ;;  %v2980_v5 = vadd.f32 1e-05, %v2948_v6 }
 0x64a   : > { %v3231_v7 = vmul.f32 %v4422_v15, %v3230_v0  ;;  %v3237_v4 = vmul.f32 %v4424_v45, %v2979_v44  ;;  %vm3243_vm12 = vweird.f32 %v4424_v45 }
 0x64b   : > { %3433 = vst [vmem:[%s5298_s13 + $0xb8] sm:$0xff] %v3401_v21  ;;  %4425 = vrsqrt.f32 %v2980_v5  ;;  %vm3244_vm14 = vmor %vm3242_vm13, %vm3243_vm12  ;;  %vm3252_vm0 = vweird.f32 %v2980_v5 }
 0x64c   : > { %v3235_v56 = vsel %vm3234_vm11, %v4422_v15, %v3231_v7  ;;  %v3238_v34 = vmul.f32 %v4424_v45, %v3237_v4 }
 0x64d   : > { %v3330_v47 = vmul.f32 %v3235_v56, %v6008_v58 }
 0x64e   : > { %v3239_v30 = vmul.f32 0.5, %v3238_v34  ;;  %v2913_v54 = vpop.xlane.xlu2 %2912 }
 0x64f   : > { %v3366_v42 = vmul.f32 %v6146_v12, %v3330_v47  ;;  %v2949_v20 = vmul.f32 %v2913_v54, %v5747_v31 }
 0x650   : > { %v3240_v43 = vsub.f32 1.5, %v3239_v30 }
 0x651   : > { %v4426_v27 = vpop.eup %4425  ;;  %v3402_v58 = vadd.f32 %v6153_v24, %v3366_v42  ;;  %v2981_v48 = vadd.f32 1e-05, %v2949_v20 }
 0x652   : > { %v3241_v60 = vmul.f32 %v4424_v45, %v3240_v43  ;;  %v3247_v53 = vmul.f32 %v4426_v27, %v2980_v5  ;;  %vm3253_vm15 = vweird.f32 %v4426_v27 }
 0x653   : > { %3434 = vst [vmem:[%s5298_s13 + $0xc0] sm:$0xff] %v3402_v58  ;;  %4427 = vrsqrt.f32 %v2981_v48  ;;  %vm3254_vm1 = vmor %vm3252_vm0, %vm3253_vm15  ;;  %vm3262_vm3 = vweird.f32 %v2981_v48 }
 0x654   : > { %v3245_v1 = vsel %vm3244_vm14, %v4424_v45, %v3241_v60  ;;  %v3248_v8 = vmul.f32 %v4426_v27, %v3247_v53 }
 0x655   : > { %v3331_v61 = vmul.f32 %v3245_v1, %v6019_v3 }
 0x656   : > { %v3249_v55 = vmul.f32 0.5, %v3248_v8  ;;  %v2915_v57 = vpop.xlane.xlu0 %2914 }
 0x657   : > { %v3367_v52 = vmul.f32 %v6146_v12, %v3331_v61  ;;  %v2950_v36 = vmul.f32 %v2915_v57, %v5747_v31 }
 0x658   : > { %v3250_v62 = vsub.f32 1.5, %v3249_v55 }
 0x659   : > { %v4428_v50 = vpop.eup %4427  ;;  %v3403_v40 = vadd.f32 %v6153_v24, %v3367_v52  ;;  %v2982_v9 = vadd.f32 1e-05, %v2950_v36 }
 0x65a   : > { %v3251_v35 = vmul.f32 %v4426_v27, %v3250_v62  ;;  %v3257_v10 = vmul.f32 %v4428_v50, %v2981_v48  ;;  %vm3263_vm2 = vweird.f32 %v4428_v50 }
 0x65b   : > { %3435 = vst [vmem:[%s5298_s13 + $0xc8] sm:$0xff] %v3403_v40  ;;  %4429 = vrsqrt.f32 %v2982_v9  ;;  %vm3264_vm4 = vmor %vm3262_vm3, %vm3263_vm2  ;;  %vm3272_vm6 = vweird.f32 %v2982_v9 }
 0x65c   : > { %v3255_v3 = vsel %vm3254_vm1, %v4426_v27, %v3251_v35  ;;  %v3258_v19 = vmul.f32 %v4428_v50, %v3257_v10 }
 0x65d   : > { %v3332_v63 = vmul.f32 %v3255_v3, %v6030_v51 }
 0x65e   : > { %v3259_v39 = vmul.f32 0.5, %v3258_v19  ;;  %v2917_v13 = vpop.xlane.xlu1 %2916 }
 0x65f   : > { %v3368_v17 = vmul.f32 %v6146_v12, %v3332_v63  ;;  %v2951_v38 = vmul.f32 %v2917_v13, %v5747_v31 }
 0x660   : > { %v3260_v33 = vsub.f32 1.5, %v3259_v39 }
 0x661   : > { %v4430_v2 = vpop.eup %4429  ;;  %v3404_v29 = vadd.f32 %v6153_v24, %v3368_v17  ;;  %v2983_v32 = vadd.f32 1e-05, %v2951_v38 }
 0x662   : > { %v3261_v15 = vmul.f32 %v4428_v50, %v3260_v33  ;;  %v3267_v23 = vmul.f32 %v4430_v2, %v2982_v9  ;;  %vm3273_vm5 = vweird.f32 %v4430_v2 }
 0x663   : > { %3436 = vst [vmem:[%s5298_s13 + $0xd0] sm:$0xff] %v3404_v29  ;;  %4431 = vrsqrt.f32 %v2983_v32  ;;  %vm3274_vm7 = vmor %vm3272_vm6, %vm3273_vm5  ;;  %vm3282_vm9 = vweird.f32 %v2983_v32 }
 0x664   : > { %v3265_v51 = vsel %vm3264_vm4, %v4428_v50, %v3261_v15  ;;  %v3268_v44 = vmul.f32 %v4430_v2, %v3267_v23 }
 0x665   : > { %v3333_v41 = vmul.f32 %v3265_v51, %v6041_v46 }
 0x666   : > { %v3269_v25 = vmul.f32 0.5, %v3268_v44  ;;  %v2919_v22 = vpop.xlane.xlu2 %2918 }
 0x667   : > { %v3369_v11 = vmul.f32 %v6146_v12, %v3333_v41  ;;  %v2952_v28 = vmul.f32 %v2919_v22, %v5747_v31 }
 0x668   : > { %v3270_v18 = vsub.f32 1.5, %v3269_v25 }
 0x669   : > { %v4432_v49 = vpop.eup %4431  ;;  %v3405_v37 = vadd.f32 %v6153_v24, %v3369_v11  ;;  %v2984_v6 = vadd.f32 1e-05, %v2952_v28 }
 0x66a   : > { %v3271_v0 = vmul.f32 %v4430_v2, %v3270_v18  ;;  %v3277_v45 = vmul.f32 %v4432_v49, %v2983_v32  ;;  %vm3283_vm8 = vweird.f32 %v4432_v49 }
 0x66b   : > { %3437 = vst [vmem:[%s5298_s13 + $0xd8] sm:$0xff] %v3405_v37  ;;  %4433 = vrsqrt.f32 %v2984_v6  ;;  %vm3284_vm10 = vmor %vm3282_vm9, %vm3283_vm8  ;;  %vm3292_vm12 = vweird.f32 %v2984_v6 }
 0x66c   : > { %v3275_v46 = vsel %vm3274_vm7, %v4430_v2, %v3271_v0  ;;  %v3278_v21 = vmul.f32 %v4432_v49, %v3277_v45 }
 0x66d   : > { %v3334_v5 = vmul.f32 %v3275_v46, %v6052_v16 }
 0x66e   : > { %v3279_v7 = vmul.f32 0.5, %v3278_v21  ;;  %v2921_v4 = vpop.xlane.xlu0 %2920 }
 0x66f   : > { %v3370_v56 = vmul.f32 %v6146_v12, %v3334_v5  ;;  %v2953_v34 = vmul.f32 %v2921_v4, %v5747_v31 }
 0x670   : > { %v3280_v47 = vsub.f32 1.5, %v3279_v7 }
 0x671   : > { %v4434_v30 = vpop.eup %4433  ;;  %v3406_v54 = vadd.f32 %v6153_v24, %v3370_v56  ;;  %v2985_v42 = vadd.f32 1e-05, %v2953_v34 }
 0x672   : > { %v3281_v20 = vmul.f32 %v4432_v49, %v3280_v47  ;;  %v3287_v43 = vmul.f32 %v4434_v30, %v2984_v6  ;;  %vm3293_vm11 = vweird.f32 %v4434_v30 }
 0x673   : > { %3438 = vst [vmem:[%s5298_s13 + $0xe0] sm:$0xff] %v3406_v54  ;;  %4435 = vrsqrt.f32 %v2985_v42  ;;  %vm3294_vm13 = vmor %vm3292_vm12, %vm3293_vm11  ;;  %vm3302_vm15 = vweird.f32 %v2985_v42 }
 0x674   : > { %v3285_v16 = vsel %vm3284_vm10, %v4432_v49, %v3281_v20  ;;  %v3288_v27 = vmul.f32 %v4434_v30, %v3287_v43 }
 0x675   : > { %v3335_v58 = vmul.f32 %v3285_v16, %v6063_v14 }
 0x676   : > { %v3289_v48 = vmul.f32 0.5, %v3288_v27 }
 0x677   : > { %v3371_v31 = vmul.f32 %v6146_v12, %v3335_v58 }
 0x678   : > { %v3290_v60 = vsub.f32 1.5, %v3289_v48 }
 0x679   : > { %v4436_v53 = vpop.eup %4435  ;;  %v3407_v1 = vadd.f32 %v6153_v24, %v3371_v31 }
 0x67a   : > { %v3291_v8 = vmul.f32 %v4434_v30, %v3290_v60  ;;  %v3297_v61 = vmul.f32 %v4436_v53, %v2985_v42  ;;  %vm3303_vm14 = vweird.f32 %v4436_v53 }
 0x67b   : > { %3439 = vst [vmem:[%s5298_s13 + $0xe8] sm:$0xff] %v3407_v1  ;;  %vm3304_vm0 = vmor %vm3302_vm15, %vm3303_vm14 }
 0x67c   : > { %v3295_v55 = vsel %vm3294_vm13, %v4434_v30, %v3291_v8  ;;  %v3298_v57 = vmul.f32 %v4436_v53, %v3297_v61 }
 0x67d   : > { %v3336_v52 = vmul.f32 %v3295_v55, %v6073_v59 }
 0x67e   : > { %v3299_v14 = vmul.f32 0.5, %v3298_v57 }
 0x67f   : > { %v3372_v36 = vmul.f32 %v6146_v12, %v3336_v52 }
 0x680   : > { %v3300_v62 = vsub.f32 1.5, %v3299_v14 }
 0x681   : > { %v3408_v50 = vadd.f32 %v6153_v24, %v3372_v36 }
 0x682   : > { %v3301_v40 = vmul.f32 %v4436_v53, %v3300_v62 }
 0x683   : > { %3440 = vst [vmem:[%s5298_s13 + $0xf0] sm:$0xff] %v3408_v50 }
 0x684   : > { %v3305_v9 = vsel %vm3304_vm0, %v4436_v53, %v3301_v40 }
 0x685   : > { %v3337_v35 = vmul.f32 %v3305_v9, %v6084_v26 }
 0x687   : > { %v3373_v10 = vmul.f32 %v6146_v12, %v3337_v35 }
 0x689   : > { %v3409_v3 = vadd.f32 %v6153_v24, %v3373_v10 }
 0x68b   : > { %3441 = vst [vmem:[%s5298_s13 + $0xf8] sm:$0xff] %v3409_v3 }
 0x68c PF: > { %s6383_s24 = sld [smem:[#allocation39_spill]]  ;;  %s3455_s9 = sshll.u32 %s5298_s13, 4  ;;  %s3456_s9 = int_to_ptr.vmem [resolvable:$true] %s3455_s9 }
 0x68d   : > { %s6384_s7 = sld [smem:[#allocation60_spill]]  ;;  %s3443_s4 = scalar_lea.sflag [#allocation8], %s5264_s12 }
 0x68e   : > { %p6385_p5 = scmp.ne.s32.totalorder %s6344_s10, 0 }
 0x692   : > { %s4161_s29 = sshll.u32 %s6383_s24, 8 }
 0x693   : > { %s3454_s6 = scalar_lea.hbm %s6384_s7, %s4161_s29  ;;  %s4693_s17 = scalar_lea.hbm %s6384_s7, 512 }
 0x694   : > { %s3457_s11 = sshll.u32 %s3454_s6, 4  ;;  %s3458_s11 = int_to_ptr.hbm [resolvable:$true] %s3457_s11 }
 0x695   : > { %s4687_s14 = sshra.s32 %s3458_s11, 4  ;;  %s4688_s14 = int_to_ptr.hbm [resolvable:$true] %s4687_s14 }
 0x696   : > { %s4689_s5 = scalar_lea.hbm %s4688_s14, 256  ;;  %p4694_p8 = scmp.lt.s32.totalorder %s4688_s14, %s6384_s7 }
 0x697   : > { %p4690_p12 = scmp.ne.s32.totalorder %s4688_s14, %s4689_s5  ;;  %p4695_p7 = scmp.lt.s32.totalorder %s4693_s17, %s4689_s5 }
 0x699   : > { %p4691_p4 = pnand %p4690_p12, %p6385_p5  ;;  %p4696_p3 = por %p4695_p7, %p4694_p8 }
 0x69b   : > { %p4692_p1 = pneg %p4691_p4 }
 0x69d   : > { %p4697_p10 = pnand %p4696_p3, %p4692_p1 }
 0x69f   : > { %4700 = shalt.err (!%p4697_p10)
}
 0x6a0   : > { %s4852_s12 = smov 128   ;;  %s4853_s13 = smov 8  }
 0x6a1   : > { %4192 = dma.vmem_to_hbm [thread:$0]  (%p6385_p5), %s3456_s9, 4096, %s3458_s11, %s3443_s4, %s4852_s12, %s4852_s12, %s4853_s13  }
 0x6a2 PF: > { %p4238_p13 = scmp.ge.s32.totalorder %s4837_s16, 2  ;;  %s3472_s15 = sand.u32 1, %s4809_s25  }
 0x6a3   : > { %s3473_s21 = scalar_lea.sflag [#allocation8], %s3472_s15 }
 0x6a4   : > { %p4226_p2 = pnand %p4238_p13, %p5182_p6 }
 0x6a6   : > { %p4227_p9 = pneg %p4226_p2 }
 0x6a8   : > { %4780 = dma.done.wait (%p4227_p9), %s3473_s21, 4096  }
 0x6a9   : > { %4782 = vsyncadd (%p4227_p9), %s3473_s21, 4294963200  ;;  %s48_s16 = sadd.s32 1, %s4837_s16   ;;  %s6387_s0 = sld [smem:[#allocation34_spill]] }
 0x6aa   : > { %p6210_p0 = scmp.ge.s32.totalorder %s48_s16, 8   ;;  %s6388_s1 = sld [smem:[#allocation35_spill]] }
 0x6ab   : > { %s6389_s22 = sld [smem:[#allocation36_spill]]  ;;  %s6397_s21 = smov %s5237_s3 }
 0x6ac   : > { %s6390_s23 = sld [smem:[#allocation37_spill]]  ;;  %s6399_s25 = smov %s4813_s26 }
 0x6ad   : > { %s6391_s10 = sld [smem:[#allocation46_spill]]  ;;  %s6400_s26 = smov %s4817_s27 }
 0x6ae   : > { %s6392_s28 = sld [smem:[#allocation47_spill]] }
 0x6af   : > { %s6393_s29 = sld [smem:[#allocation40_spill]] }
 0x6b0   : > { %s6394_s19 = sld [smem:[#allocation42_spill]] }
 0x6b1   : > { %s6395_s15 = sld [smem:[#allocation43_spill]] }
 0x6b2   :  { %47 = sbr.rel (!%p6210_p0) target bundleno = 33 (0x21), region = 165 }
 0x6b3   : > { %s6398_s24 = smov %s6391_s10 }
 0x6b4   : > { %s6401_s27 = smov %s6392_s28  ;;  %s6402_s28 = smov %s4829_s30 }
 0x6b6   : > { %s6403_s30 = smov %s6394_s19 }
 0x6b7   :  { %3479 = vsyncpa [#allocation7], 1 }
 0x6b8   :  { %3481 = vsyncpa [#allocation7 + $0x1], 1 }
 0x6b9   :  { %3482 = vsyncpa [#allocation10], 1 }
 0x6ba   :  { %3484 = vsyncpa [#allocation10 + $0x1], 1 }
 0x6bb   :  { %3485 = vsyncpa [#allocation13], 1 }
 0x6bc   :  { %3486 = vsyncpa [#allocation16], 1 }
 0x6bd   :  { %3487 = vsyncpa [#allocation8], 1 }
 0x6be   :  { %3489 = vsyncpa [#allocation8 + $0x1], 1 }

</bundles_post_ra>
